<compile_context>
chip_gen: v6e
topology: v6e:2x2x1
jax: 0.10.0
libtpu: 0.0.40
codegen_flags: <defaults>
</compile_context>

<pallas_src>
import functools

import jax
import jax.numpy as jnp
from jax import lax
from jax.experimental import pallas as pl
from jax.experimental.pallas import tpu as pltpu


# ---------------------------------------------------------------------------
# Fused kernel: conv1..conv5 (+pool+relu), one batch element per grid step.
# ---------------------------------------------------------------------------
def _alexnet_kernel(p1_ref, w1_ref, b1_ref, w2_ref, b2_ref, w3_ref, b3_ref,
                    w4_ref, b4_ref, w5_ref, b5_ref, out_ref, *, L):
    f32 = jnp.float32
    bf16 = jnp.bfloat16

    def pool_relu(y, p, out_dtype):
        # floor-mode maxpool (window p, stride p) along W, then ReLU, then cast.
        W, C = y.shape
        y = y.reshape(W // p, p, C).max(axis=1)
        return jnp.maximum(y, 0.0).astype(out_dtype)

    def pad_w(x, lo, hi):
        # zero-pad along W inside VMEM (no HBM round trip).
        C = x.shape[1]
        parts = []
        if lo > 0:
            parts.append(jnp.zeros((lo, C), x.dtype))
        parts.append(x)
        if hi > 0:
            parts.append(jnp.zeros((hi, C), x.dtype))
        return jnp.concatenate(parts, axis=0) if len(parts) > 1 else x

    def grouped_conv(xpad, w_ref, b_ref, W, G):
        # xpad : (W + K - 1, Cin) bf16, padded activation
        # w_ref: (K // G, G * Cin, Cout) bf16, tap-grouped weights
        # Output rows w = 0..W-1 (position W of the 'same' conv is discarded by
        # the following floor-mode maxpool anyway).
        n_groups, _, Cout = w_ref.shape
        acc = jnp.zeros((W, Cout), f32)
        for g in range(n_groups):                      # static unroll
            k0 = g * G
            if G == 1:
                lhs = xpad[k0:k0 + W, :]
            else:
                lhs = jnp.concatenate(
                    [xpad[k0 + j:k0 + j + W, :] for j in range(G)], axis=1)
            acc = acc + jnp.dot(lhs, w_ref[g], preferred_element_type=f32)
        return acc + b_ref[...]

    # conv1: im2col slab (L, 128) @ (128, 16)  -> pool 4 -> relu
    y1 = jnp.dot(p1_ref[...], w1_ref[...], preferred_element_type=f32) + b1_ref[...]
    a1 = pool_relu(y1, 4, bf16)                        # (L//4, 16)

    # conv2: K=64, 8 groups x (8 taps * 16 ch = 128)   -> pool 4 -> relu
    y2 = grouped_conv(pad_w(a1, 32, 31), w2_ref, b2_ref, L // 4, 8)
    a2 = pool_relu(y2, 4, bf16)                        # (L//16, 32)

    # conv3: K=16, 2 groups x (8 taps * 32 ch = 256)   -> pool 4 -> relu
    y3 = grouped_conv(pad_w(a2, 8, 7), w3_ref, b3_ref, L // 16, 8)
    a3 = pool_relu(y3, 4, bf16)                        # (L//64, 64)

    # conv4: K=4, 1 group x (4 taps * 64 ch = 256)     -> pool 2 -> relu
    y4 = grouped_conv(pad_w(a3, 2, 1), w4_ref, b4_ref, L // 64, 4)
    a4 = pool_relu(y4, 2, bf16)                        # (L//128, 128)

    # conv5: K=2, 1 group x (2 taps * 128 ch = 256)    -> pool 2 -> relu
    y5 = grouped_conv(pad_w(a4, 1, 0), w5_ref, b5_ref, L // 128, 2)
    out_ref[...] = pool_relu(y5, 2, out_ref.dtype)     # (L//256, 256), lane-dense


# ---------------------------------------------------------------------------
# Wrapper
# ---------------------------------------------------------------------------
def _group_weight(w, G):
    """(K, Cin, Cout) -> (K//G, G*Cin, Cout) bf16, row j*Cin+ci of group g is tap g*G+j."""
    K, Cin, Cout = w.shape
    return w.reshape(K // G, G * Cin, Cout).astype(jnp.bfloat16)


def alexnet_backbone_forward(params, x_nchw):
    N, C, H, L = x_nchw.shape
    assert C == 1 and H == 1, "AlexNetBackbone expects NCHW input with C = H = 1"
    assert L % 256 == 0, "signal length must be a multiple of 256"

    sig = x_nchw.reshape(N, L).astype(jnp.float32)
    # im2col for conv1 (K=128, padding 64). Only conv outputs 0..L-1 are needed,
    # because the following floor-mode maxpool discards position L -> pad (64, 63).
    sp = jnp.pad(sig, ((0, 0), (64, 63)))
    patches = jnp.stack([sp[:, k:k + L] for k in range(128)], axis=-1)
    patches = patches.astype(jnp.bfloat16)                      # (N, L, 128)

    w1 = params['conv1_w'].reshape(128, 16).astype(jnp.bfloat16)
    w2 = _group_weight(params['conv2_w'], 8)                    # (8, 128, 32)
    w3 = _group_weight(params['conv3_w'], 8)                    # (2, 256, 64)
    w4 = _group_weight(params['conv4_w'], 4)                    # (1, 256, 128)
    w5 = _group_weight(params['conv5_w'], 2)                    # (1, 256, 256)
    bias = lambda v: v.reshape(1, -1).astype(jnp.float32)

    W5 = L // 256
    zero2 = lambda n: (0, 0)
    zero3 = lambda n: (0, 0, 0)

    out = pl.pallas_call(
        functools.partial(_alexnet_kernel, L=L),
        out_shape=jax.ShapeDtypeStruct((N, W5, 256), jnp.float32),
        grid=(N,),
        in_specs=[
            pl.BlockSpec((None, L, 128), lambda n: (n, 0, 0)),   # conv1 im2col slab
            pl.BlockSpec((128, 16), zero2),
            pl.BlockSpec((1, 16), zero2),
            pl.BlockSpec((8, 128, 32), zero3),
            pl.BlockSpec((1, 32), zero2),
            pl.BlockSpec((2, 256, 64), zero3),
            pl.BlockSpec((1, 64), zero2),
            pl.BlockSpec((1, 256, 128), zero3),
            pl.BlockSpec((1, 128), zero2),
            pl.BlockSpec((1, 256, 256), zero3),
            pl.BlockSpec((1, 256), zero2),
        ],
        out_specs=pl.BlockSpec((None, W5, 256), lambda n: (n, 0, 0)),
        compiler_params=pltpu.CompilerParams(
            dimension_semantics=("parallel",)),
    )(patches, w1, bias(params['conv1_b']),
      w2, bias(params['conv2_b']),
      w3, bias(params['conv3_b']),
      w4, bias(params['conv4_b']),
      w5, bias(params['conv5_b']))

    # torch.nn.Flatten(1, 3) on NCHW (N, 256, 1, W5): channel-major flatten.
    return jnp.transpose(out, (0, 2, 1)).reshape(N, -1)


# ---------------------------------------------------------------------------
# Deterministic PyTorch-default-style parameter init
# ---------------------------------------------------------------------------
def init_params(key):
    ks = jax.random.split(key, 10)

    def conv(kw, kb, K, Cin, Cout):
        bound = 1.0 / ((Cin * K) ** 0.5)
        w = jax.random.uniform(kw, (K, Cin, Cout), jnp.float32, -bound, bound)
        b = jax.random.uniform(kb, (Cout,), jnp.float32, -bound, bound)
        return w, b

    p = {}
    p['conv1_w'], p['conv1_b'] = conv(ks[0], ks[1], 128, 1, 16)
    p['conv2_w'], p['conv2_b'] = conv(ks[2], ks[3], 64, 16, 32)
    p['conv3_w'], p['conv3_b'] = conv(ks[4], ks[5], 16, 32, 64)
    p['conv4_w'], p['conv4_b'] = conv(ks[6], ks[7], 4, 64, 128)
    p['conv5_w'], p['conv5_b'] = conv(ks[8], ks[9], 2, 128, 256)
    return p


# ---------------------------------------------------------------------------
# Pure-JAX f32 reference (exact module semantics, for the correctness check)
# ---------------------------------------------------------------------------
def _ref_pool(y, p):
    N, Wc, C = y.shape
    Wo = Wc // p                                     # floor mode, like MaxPool2d
    return y[:, :Wo * p, :].reshape(N, Wo, p, C).max(axis=2)


def alexnet_backbone_reference(params, x_nchw):
    N, _, _, L = x_nchw.shape
    h = x_nchw.reshape(N, L, 1).astype(jnp.float32)

    def stage(h, w, b, pool):
        K = w.shape[0]
        y = lax.conv_general_dilated(
            h, w, window_strides=(1,), padding=[(K // 2, K // 2)],
            dimension_numbers=('NWC', 'WIO', 'NWC'),
            precision=lax.Precision.HIGHEST) + b[None, None, :]
        return jax.nn.relu(_ref_pool(y, pool))

    h = stage(h, params['conv1_w'], params['conv1_b'], 4)
    h = stage(h, params['conv2_w'], params['conv2_b'], 4)
    h = stage(h, params['conv3_w'], params['conv3_b'], 4)
    h = stage(h, params['conv4_w'], params['conv4_b'], 2)
    h = stage(h, params['conv5_w'], params['conv5_b'], 2)
    return jnp.transpose(h, (0, 2, 1)).reshape(N, -1)


if __name__ == "__main__":
    key = jax.random.PRNGKey(0)
    pkey, xkey = jax.random.split(key)
    params = init_params(pkey)

    N, L = 2, 512                                    # small version of the 4096-length signal
    x = jax.random.normal(xkey, (N, 1, 1, L), jnp.float32)   # NCHW like PyTorch

    out = jax.jit(alexnet_backbone_forward)(params, x)
    out = jax.block_until_ready(out)

    ref = alexnet_backbone_reference(params, x)
    assert out.shape == (N, 256 * (L // 256)), out.shape
    max_err = float(jnp.max(jnp.abs(out - ref)))
    assert bool(jnp.allclose(out, ref, atol=2e-2, rtol=2e-2)), f"max abs err = {max_err}"

    print("KERNEL_OK")
</pallas_src>

<mosaic_0001>
module attributes {stable_mosaic.version = 11 : i64} {
  func.func @_alexnet_kernel(%arg0: i32, %arg1: memref<1x512x128xbf16, #tpu.memory_space<vmem>>, %arg2: memref<128x16xbf16, #tpu.memory_space<vmem>>, %arg3: memref<1x16xf32, #tpu.memory_space<vmem>>, %arg4: memref<8x128x32xbf16, #tpu.memory_space<vmem>>, %arg5: memref<1x32xf32, #tpu.memory_space<vmem>>, %arg6: memref<2x256x64xbf16, #tpu.memory_space<vmem>>, %arg7: memref<1x64xf32, #tpu.memory_space<vmem>>, %arg8: memref<1x256x128xbf16, #tpu.memory_space<vmem>>, %arg9: memref<1x128xf32, #tpu.memory_space<vmem>>, %arg10: memref<1x256x256xbf16, #tpu.memory_space<vmem>>, %arg11: memref<1x256xf32, #tpu.memory_space<vmem>>, %arg12: memref<1x2x256xf32, #tpu.memory_space<vmem>>) attributes {dimension_semantics = [#tpu.dimension_semantics<parallel>], iteration_bounds = array<i64: 2>, scalar_prefetch = 0 : i64, scratch_operands = 0 : i64, tpu.core_type = #tpu.core_type<tc>, window_params = [{transform_indices = @transform_0, window_bounds = array<i64: 1, 512, 128>}, {pipeline_mode = #tpu.pipeline_mode<synchronous>, transform_indices = @transform_1, window_bounds = array<i64: 128, 16>}, {pipeline_mode = #tpu.pipeline_mode<synchronous>, transform_indices = @transform_2, window_bounds = array<i64: 1, 16>}, {pipeline_mode = #tpu.pipeline_mode<synchronous>, transform_indices = @transform_3, window_bounds = array<i64: 8, 128, 32>}, {pipeline_mode = #tpu.pipeline_mode<synchronous>, transform_indices = @transform_4, window_bounds = array<i64: 1, 32>}, {pipeline_mode = #tpu.pipeline_mode<synchronous>, transform_indices = @transform_5, window_bounds = array<i64: 2, 256, 64>}, {pipeline_mode = #tpu.pipeline_mode<synchronous>, transform_indices = @transform_6, window_bounds = array<i64: 1, 64>}, {pipeline_mode = #tpu.pipeline_mode<synchronous>, transform_indices = @transform_7, window_bounds = array<i64: 1, 256, 128>}, {pipeline_mode = #tpu.pipeline_mode<synchronous>, transform_indices = @transform_8, window_bounds = array<i64: 1, 128>}, {pipeline_mode = #tpu.pipeline_mode<synchronous>, transform_indices = @transform_9, window_bounds = array<i64: 1, 256, 256>}, {pipeline_mode = #tpu.pipeline_mode<synchronous>, transform_indices = @transform_10, window_bounds = array<i64: 1, 256>}, {transform_indices = @transform_11, window_bounds = array<i64: 1, 2, 256>}]} {
    %c0 = arith.constant 0 : index
    %c0_0 = arith.constant 0 : index
    %c0_1 = arith.constant 0 : index
    %0 = vector.load %arg1[%c0, %c0_0, %c0_1] : memref<1x512x128xbf16, #tpu.memory_space<vmem>>, vector<1x512x128xbf16>
    %1 = vector.shape_cast %0 : vector<1x512x128xbf16> to vector<512x128xbf16>
    %c0_2 = arith.constant 0 : index
    %c0_3 = arith.constant 0 : index
    %2 = vector.load %arg2[%c0_2, %c0_3] : memref<128x16xbf16, #tpu.memory_space<vmem>>, vector<128x16xbf16>
    %cst = arith.constant dense<0.000000e+00> : vector<512x16xf32>
    %3 = tpu.matmul %1, %2, %cst {dimension_numbers = #tpu.dot_dimension_numbers<[1], [0], [0], [1], [0, 0, 1, 1], [], []>} : vector<512x128xbf16>, vector<128x16xbf16>, vector<512x16xf32> -> vector<512x16xf32>
    %c0_4 = arith.constant 0 : index
    %c0_5 = arith.constant 0 : index
    %4 = vector.load %arg3[%c0_4, %c0_5] : memref<1x16xf32, #tpu.memory_space<vmem>>, vector<1x16xf32>
    %5 = vector.broadcast %4 : vector<1x16xf32> to vector<512x16xf32>
    %6 = arith.addf %3, %5 : vector<512x16xf32>
    %7 = vector.shape_cast %6 : vector<512x16xf32> to vector<128x4x16xf32>
    %cst_6 = arith.constant dense<0xFF800000> : vector<128x16xf32>
    %8 = vector.multi_reduction <maximumf>, %7, %cst_6 [1] : vector<128x4x16xf32> to vector<128x16xf32>
    %cst_7 = arith.constant 0.000000e+00 : f32
    %9 = vector.broadcast %cst_7 : f32 to vector<128x16xf32>
    %10 = arith.maximumf %8, %9 : vector<128x16xf32>
    %11 = arith.truncf %10 : vector<128x16xf32> to vector<128x16xbf16>
    %cst_8 = arith.constant 0.000000e+00 : bf16
    %12 = vector.broadcast %cst_8 : bf16 to vector<32x16xbf16>
    %cst_9 = arith.constant 0.000000e+00 : bf16
    %13 = vector.broadcast %cst_9 : bf16 to vector<31x16xbf16>
    %14 = tpu.concatenate %12, %11, %13 in 0 : vector<32x16xbf16>, vector<128x16xbf16>, vector<31x16xbf16> -> vector<191x16xbf16>
    %cst_10 = arith.constant 0.000000e+00 : f32
    %15 = vector.broadcast %cst_10 : f32 to vector<128x32xf32>
    %16 = vector.extract_strided_slice %14 {offsets = [0, 0], sizes = [128, 16], strides = [1, 1]} : vector<191x16xbf16> to vector<128x16xbf16>
    %17 = vector.extract_strided_slice %14 {offsets = [1, 0], sizes = [128, 16], strides = [1, 1]} : vector<191x16xbf16> to vector<128x16xbf16>
    %18 = vector.extract_strided_slice %14 {offsets = [2, 0], sizes = [128, 16], strides = [1, 1]} : vector<191x16xbf16> to vector<128x16xbf16>
    %19 = vector.extract_strided_slice %14 {offsets = [3, 0], sizes = [128, 16], strides = [1, 1]} : vector<191x16xbf16> to vector<128x16xbf16>
    %20 = vector.extract_strided_slice %14 {offsets = [4, 0], sizes = [128, 16], strides = [1, 1]} : vector<191x16xbf16> to vector<128x16xbf16>
    %21 = vector.extract_strided_slice %14 {offsets = [5, 0], sizes = [128, 16], strides = [1, 1]} : vector<191x16xbf16> to vector<128x16xbf16>
    %22 = vector.extract_strided_slice %14 {offsets = [6, 0], sizes = [128, 16], strides = [1, 1]} : vector<191x16xbf16> to vector<128x16xbf16>
    %23 = vector.extract_strided_slice %14 {offsets = [7, 0], sizes = [128, 16], strides = [1, 1]} : vector<191x16xbf16> to vector<128x16xbf16>
    %24 = tpu.concatenate %16, %17, %18, %19, %20, %21, %22, %23 in 1 : vector<128x16xbf16>, vector<128x16xbf16>, vector<128x16xbf16>, vector<128x16xbf16>, vector<128x16xbf16>, vector<128x16xbf16>, vector<128x16xbf16>, vector<128x16xbf16> -> vector<128x128xbf16>
    %c0_11 = arith.constant 0 : index
    %c0_12 = arith.constant 0 : index
    %c0_13 = arith.constant 0 : index
    %25 = vector.load %arg4[%c0_11, %c0_12, %c0_13] : memref<8x128x32xbf16, #tpu.memory_space<vmem>>, vector<1x128x32xbf16>
    %26 = vector.shape_cast %25 : vector<1x128x32xbf16> to vector<128x32xbf16>
    %cst_14 = arith.constant dense<0.000000e+00> : vector<128x32xf32>
    %27 = tpu.matmul %24, %26, %cst_14 {dimension_numbers = #tpu.dot_dimension_numbers<[1], [0], [0], [1], [0, 0, 1, 1], [], []>} : vector<128x128xbf16>, vector<128x32xbf16>, vector<128x32xf32> -> vector<128x32xf32>
    %28 = arith.addf %15, %27 : vector<128x32xf32>
    %29 = vector.extract_strided_slice %14 {offsets = [8, 0], sizes = [128, 16], strides = [1, 1]} : vector<191x16xbf16> to vector<128x16xbf16>
    %30 = vector.extract_strided_slice %14 {offsets = [9, 0], sizes = [128, 16], strides = [1, 1]} : vector<191x16xbf16> to vector<128x16xbf16>
    %31 = vector.extract_strided_slice %14 {offsets = [10, 0], sizes = [128, 16], strides = [1, 1]} : vector<191x16xbf16> to vector<128x16xbf16>
    %32 = vector.extract_strided_slice %14 {offsets = [11, 0], sizes = [128, 16], strides = [1, 1]} : vector<191x16xbf16> to vector<128x16xbf16>
    %33 = vector.extract_strided_slice %14 {offsets = [12, 0], sizes = [128, 16], strides = [1, 1]} : vector<191x16xbf16> to vector<128x16xbf16>
    %34 = vector.extract_strided_slice %14 {offsets = [13, 0], sizes = [128, 16], strides = [1, 1]} : vector<191x16xbf16> to vector<128x16xbf16>
    %35 = vector.extract_strided_slice %14 {offsets = [14, 0], sizes = [128, 16], strides = [1, 1]} : vector<191x16xbf16> to vector<128x16xbf16>
    %36 = vector.extract_strided_slice %14 {offsets = [15, 0], sizes = [128, 16], strides = [1, 1]} : vector<191x16xbf16> to vector<128x16xbf16>
    %37 = tpu.concatenate %29, %30, %31, %32, %33, %34, %35, %36 in 1 : vector<128x16xbf16>, vector<128x16xbf16>, vector<128x16xbf16>, vector<128x16xbf16>, vector<128x16xbf16>, vector<128x16xbf16>, vector<128x16xbf16>, vector<128x16xbf16> -> vector<128x128xbf16>
    %c1 = arith.constant 1 : index
    %c0_15 = arith.constant 0 : index
    %c0_16 = arith.constant 0 : index
    %38 = vector.load %arg4[%c1, %c0_15, %c0_16] : memref<8x128x32xbf16, #tpu.memory_space<vmem>>, vector<1x128x32xbf16>
    %39 = vector.shape_cast %38 : vector<1x128x32xbf16> to vector<128x32xbf16>
    %cst_17 = arith.constant dense<0.000000e+00> : vector<128x32xf32>
    %40 = tpu.matmul %37, %39, %cst_17 {dimension_numbers = #tpu.dot_dimension_numbers<[1], [0], [0], [1], [0, 0, 1, 1], [], []>} : vector<128x128xbf16>, vector<128x32xbf16>, vector<128x32xf32> -> vector<128x32xf32>
    %41 = arith.addf %28, %40 : vector<128x32xf32>
    %42 = vector.extract_strided_slice %14 {offsets = [16, 0], sizes = [128, 16], strides = [1, 1]} : vector<191x16xbf16> to vector<128x16xbf16>
    %43 = vector.extract_strided_slice %14 {offsets = [17, 0], sizes = [128, 16], strides = [1, 1]} : vector<191x16xbf16> to vector<128x16xbf16>
    %44 = vector.extract_strided_slice %14 {offsets = [18, 0], sizes = [128, 16], strides = [1, 1]} : vector<191x16xbf16> to vector<128x16xbf16>
    %45 = vector.extract_strided_slice %14 {offsets = [19, 0], sizes = [128, 16], strides = [1, 1]} : vector<191x16xbf16> to vector<128x16xbf16>
    %46 = vector.extract_strided_slice %14 {offsets = [20, 0], sizes = [128, 16], strides = [1, 1]} : vector<191x16xbf16> to vector<128x16xbf16>
    %47 = vector.extract_strided_slice %14 {offsets = [21, 0], sizes = [128, 16], strides = [1, 1]} : vector<191x16xbf16> to vector<128x16xbf16>
    %48 = vector.extract_strided_slice %14 {offsets = [22, 0], sizes = [128, 16], strides = [1, 1]} : vector<191x16xbf16> to vector<128x16xbf16>
    %49 = vector.extract_strided_slice %14 {offsets = [23, 0], sizes = [128, 16], strides = [1, 1]} : vector<191x16xbf16> to vector<128x16xbf16>
    %50 = tpu.concatenate %42, %43, %44, %45, %46, %47, %48, %49 in 1 : vector<128x16xbf16>, vector<128x16xbf16>, vector<128x16xbf16>, vector<128x16xbf16>, vector<128x16xbf16>, vector<128x16xbf16>, vector<128x16xbf16>, vector<128x16xbf16> -> vector<128x128xbf16>
    %c2 = arith.constant 2 : index
    %c0_18 = arith.constant 0 : index
    %c0_19 = arith.constant 0 : index
    %51 = vector.load %arg4[%c2, %c0_18, %c0_19] : memref<8x128x32xbf16, #tpu.memory_space<vmem>>, vector<1x128x32xbf16>
    %52 = vector.shape_cast %51 : vector<1x128x32xbf16> to vector<128x32xbf16>
    %cst_20 = arith.constant dense<0.000000e+00> : vector<128x32xf32>
    %53 = tpu.matmul %50, %52, %cst_20 {dimension_numbers = #tpu.dot_dimension_numbers<[1], [0], [0], [1], [0, 0, 1, 1], [], []>} : vector<128x128xbf16>, vector<128x32xbf16>, vector<128x32xf32> -> vector<128x32xf32>
    %54 = arith.addf %41, %53 : vector<128x32xf32>
    %55 = vector.extract_strided_slice %14 {offsets = [24, 0], sizes = [128, 16], strides = [1, 1]} : vector<191x16xbf16> to vector<128x16xbf16>
    %56 = vector.extract_strided_slice %14 {offsets = [25, 0], sizes = [128, 16], strides = [1, 1]} : vector<191x16xbf16> to vector<128x16xbf16>
    %57 = vector.extract_strided_slice %14 {offsets = [26, 0], sizes = [128, 16], strides = [1, 1]} : vector<191x16xbf16> to vector<128x16xbf16>
    %58 = vector.extract_strided_slice %14 {offsets = [27, 0], sizes = [128, 16], strides = [1, 1]} : vector<191x16xbf16> to vector<128x16xbf16>
    %59 = vector.extract_strided_slice %14 {offsets = [28, 0], sizes = [128, 16], strides = [1, 1]} : vector<191x16xbf16> to vector<128x16xbf16>
    %60 = vector.extract_strided_slice %14 {offsets = [29, 0], sizes = [128, 16], strides = [1, 1]} : vector<191x16xbf16> to vector<128x16xbf16>
    %61 = vector.extract_strided_slice %14 {offsets = [30, 0], sizes = [128, 16], strides = [1, 1]} : vector<191x16xbf16> to vector<128x16xbf16>
    %62 = vector.extract_strided_slice %14 {offsets = [31, 0], sizes = [128, 16], strides = [1, 1]} : vector<191x16xbf16> to vector<128x16xbf16>
    %63 = tpu.concatenate %55, %56, %57, %58, %59, %60, %61, %62 in 1 : vector<128x16xbf16>, vector<128x16xbf16>, vector<128x16xbf16>, vector<128x16xbf16>, vector<128x16xbf16>, vector<128x16xbf16>, vector<128x16xbf16>, vector<128x16xbf16> -> vector<128x128xbf16>
    %c3 = arith.constant 3 : index
    %c0_21 = arith.constant 0 : index
    %c0_22 = arith.constant 0 : index
    %64 = vector.load %arg4[%c3, %c0_21, %c0_22] : memref<8x128x32xbf16, #tpu.memory_space<vmem>>, vector<1x128x32xbf16>
    %65 = vector.shape_cast %64 : vector<1x128x32xbf16> to vector<128x32xbf16>
    %cst_23 = arith.constant dense<0.000000e+00> : vector<128x32xf32>
    %66 = tpu.matmul %63, %65, %cst_23 {dimension_numbers = #tpu.dot_dimension_numbers<[1], [0], [0], [1], [0, 0, 1, 1], [], []>} : vector<128x128xbf16>, vector<128x32xbf16>, vector<128x32xf32> -> vector<128x32xf32>
    %67 = arith.addf %54, %66 : vector<128x32xf32>
    %68 = vector.extract_strided_slice %14 {offsets = [32, 0], sizes = [128, 16], strides = [1, 1]} : vector<191x16xbf16> to vector<128x16xbf16>
    %69 = vector.extract_strided_slice %14 {offsets = [33, 0], sizes = [128, 16], strides = [1, 1]} : vector<191x16xbf16> to vector<128x16xbf16>
    %70 = vector.extract_strided_slice %14 {offsets = [34, 0], sizes = [128, 16], strides = [1, 1]} : vector<191x16xbf16> to vector<128x16xbf16>
    %71 = vector.extract_strided_slice %14 {offsets = [35, 0], sizes = [128, 16], strides = [1, 1]} : vector<191x16xbf16> to vector<128x16xbf16>
    %72 = vector.extract_strided_slice %14 {offsets = [36, 0], sizes = [128, 16], strides = [1, 1]} : vector<191x16xbf16> to vector<128x16xbf16>
    %73 = vector.extract_strided_slice %14 {offsets = [37, 0], sizes = [128, 16], strides = [1, 1]} : vector<191x16xbf16> to vector<128x16xbf16>
    %74 = vector.extract_strided_slice %14 {offsets = [38, 0], sizes = [128, 16], strides = [1, 1]} : vector<191x16xbf16> to vector<128x16xbf16>
    %75 = vector.extract_strided_slice %14 {offsets = [39, 0], sizes = [128, 16], strides = [1, 1]} : vector<191x16xbf16> to vector<128x16xbf16>
    %76 = tpu.concatenate %68, %69, %70, %71, %72, %73, %74, %75 in 1 : vector<128x16xbf16>, vector<128x16xbf16>, vector<128x16xbf16>, vector<128x16xbf16>, vector<128x16xbf16>, vector<128x16xbf16>, vector<128x16xbf16>, vector<128x16xbf16> -> vector<128x128xbf16>
    %c4 = arith.constant 4 : index
    %c0_24 = arith.constant 0 : index
    %c0_25 = arith.constant 0 : index
    %77 = vector.load %arg4[%c4, %c0_24, %c0_25] : memref<8x128x32xbf16, #tpu.memory_space<vmem>>, vector<1x128x32xbf16>
    %78 = vector.shape_cast %77 : vector<1x128x32xbf16> to vector<128x32xbf16>
    %cst_26 = arith.constant dense<0.000000e+00> : vector<128x32xf32>
    %79 = tpu.matmul %76, %78, %cst_26 {dimension_numbers = #tpu.dot_dimension_numbers<[1], [0], [0], [1], [0, 0, 1, 1], [], []>} : vector<128x128xbf16>, vector<128x32xbf16>, vector<128x32xf32> -> vector<128x32xf32>
    %80 = arith.addf %67, %79 : vector<128x32xf32>
    %81 = vector.extract_strided_slice %14 {offsets = [40, 0], sizes = [128, 16], strides = [1, 1]} : vector<191x16xbf16> to vector<128x16xbf16>
    %82 = vector.extract_strided_slice %14 {offsets = [41, 0], sizes = [128, 16], strides = [1, 1]} : vector<191x16xbf16> to vector<128x16xbf16>
    %83 = vector.extract_strided_slice %14 {offsets = [42, 0], sizes = [128, 16], strides = [1, 1]} : vector<191x16xbf16> to vector<128x16xbf16>
    %84 = vector.extract_strided_slice %14 {offsets = [43, 0], sizes = [128, 16], strides = [1, 1]} : vector<191x16xbf16> to vector<128x16xbf16>
    %85 = vector.extract_strided_slice %14 {offsets = [44, 0], sizes = [128, 16], strides = [1, 1]} : vector<191x16xbf16> to vector<128x16xbf16>
    %86 = vector.extract_strided_slice %14 {offsets = [45, 0], sizes = [128, 16], strides = [1, 1]} : vector<191x16xbf16> to vector<128x16xbf16>
    %87 = vector.extract_strided_slice %14 {offsets = [46, 0], sizes = [128, 16], strides = [1, 1]} : vector<191x16xbf16> to vector<128x16xbf16>
    %88 = vector.extract_strided_slice %14 {offsets = [47, 0], sizes = [128, 16], strides = [1, 1]} : vector<191x16xbf16> to vector<128x16xbf16>
    %89 = tpu.concatenate %81, %82, %83, %84, %85, %86, %87, %88 in 1 : vector<128x16xbf16>, vector<128x16xbf16>, vector<128x16xbf16>, vector<128x16xbf16>, vector<128x16xbf16>, vector<128x16xbf16>, vector<128x16xbf16>, vector<128x16xbf16> -> vector<128x128xbf16>
    %c5 = arith.constant 5 : index
    %c0_27 = arith.constant 0 : index
    %c0_28 = arith.constant 0 : index
    %90 = vector.load %arg4[%c5, %c0_27, %c0_28] : memref<8x128x32xbf16, #tpu.memory_space<vmem>>, vector<1x128x32xbf16>
    %91 = vector.shape_cast %90 : vector<1x128x32xbf16> to vector<128x32xbf16>
    %cst_29 = arith.constant dense<0.000000e+00> : vector<128x32xf32>
    %92 = tpu.matmul %89, %91, %cst_29 {dimension_numbers = #tpu.dot_dimension_numbers<[1], [0], [0], [1], [0, 0, 1, 1], [], []>} : vector<128x128xbf16>, vector<128x32xbf16>, vector<128x32xf32> -> vector<128x32xf32>
    %93 = arith.addf %80, %92 : vector<128x32xf32>
    %94 = vector.extract_strided_slice %14 {offsets = [48, 0], sizes = [128, 16], strides = [1, 1]} : vector<191x16xbf16> to vector<128x16xbf16>
    %95 = vector.extract_strided_slice %14 {offsets = [49, 0], sizes = [128, 16], strides = [1, 1]} : vector<191x16xbf16> to vector<128x16xbf16>
    %96 = vector.extract_strided_slice %14 {offsets = [50, 0], sizes = [128, 16], strides = [1, 1]} : vector<191x16xbf16> to vector<128x16xbf16>
    %97 = vector.extract_strided_slice %14 {offsets = [51, 0], sizes = [128, 16], strides = [1, 1]} : vector<191x16xbf16> to vector<128x16xbf16>
    %98 = vector.extract_strided_slice %14 {offsets = [52, 0], sizes = [128, 16], strides = [1, 1]} : vector<191x16xbf16> to vector<128x16xbf16>
    %99 = vector.extract_strided_slice %14 {offsets = [53, 0], sizes = [128, 16], strides = [1, 1]} : vector<191x16xbf16> to vector<128x16xbf16>
    %100 = vector.extract_strided_slice %14 {offsets = [54, 0], sizes = [128, 16], strides = [1, 1]} : vector<191x16xbf16> to vector<128x16xbf16>
    %101 = vector.extract_strided_slice %14 {offsets = [55, 0], sizes = [128, 16], strides = [1, 1]} : vector<191x16xbf16> to vector<128x16xbf16>
    %102 = tpu.concatenate %94, %95, %96, %97, %98, %99, %100, %101 in 1 : vector<128x16xbf16>, vector<128x16xbf16>, vector<128x16xbf16>, vector<128x16xbf16>, vector<128x16xbf16>, vector<128x16xbf16>, vector<128x16xbf16>, vector<128x16xbf16> -> vector<128x128xbf16>
    %c6 = arith.constant 6 : index
    %c0_30 = arith.constant 0 : index
    %c0_31 = arith.constant 0 : index
    %103 = vector.load %arg4[%c6, %c0_30, %c0_31] : memref<8x128x32xbf16, #tpu.memory_space<vmem>>, vector<1x128x32xbf16>
    %104 = vector.shape_cast %103 : vector<1x128x32xbf16> to vector<128x32xbf16>
    %cst_32 = arith.constant dense<0.000000e+00> : vector<128x32xf32>
    %105 = tpu.matmul %102, %104, %cst_32 {dimension_numbers = #tpu.dot_dimension_numbers<[1], [0], [0], [1], [0, 0, 1, 1], [], []>} : vector<128x128xbf16>, vector<128x32xbf16>, vector<128x32xf32> -> vector<128x32xf32>
    %106 = arith.addf %93, %105 : vector<128x32xf32>
    %107 = vector.extract_strided_slice %14 {offsets = [56, 0], sizes = [128, 16], strides = [1, 1]} : vector<191x16xbf16> to vector<128x16xbf16>
    %108 = vector.extract_strided_slice %14 {offsets = [57, 0], sizes = [128, 16], strides = [1, 1]} : vector<191x16xbf16> to vector<128x16xbf16>
    %109 = vector.extract_strided_slice %14 {offsets = [58, 0], sizes = [128, 16], strides = [1, 1]} : vector<191x16xbf16> to vector<128x16xbf16>
    %110 = vector.extract_strided_slice %14 {offsets = [59, 0], sizes = [128, 16], strides = [1, 1]} : vector<191x16xbf16> to vector<128x16xbf16>
    %111 = vector.extract_strided_slice %14 {offsets = [60, 0], sizes = [128, 16], strides = [1, 1]} : vector<191x16xbf16> to vector<128x16xbf16>
    %112 = vector.extract_strided_slice %14 {offsets = [61, 0], sizes = [128, 16], strides = [1, 1]} : vector<191x16xbf16> to vector<128x16xbf16>
    %113 = vector.extract_strided_slice %14 {offsets = [62, 0], sizes = [128, 16], strides = [1, 1]} : vector<191x16xbf16> to vector<128x16xbf16>
    %114 = vector.extract_strided_slice %14 {offsets = [63, 0], sizes = [128, 16], strides = [1, 1]} : vector<191x16xbf16> to vector<128x16xbf16>
    %115 = tpu.concatenate %107, %108, %109, %110, %111, %112, %113, %114 in 1 : vector<128x16xbf16>, vector<128x16xbf16>, vector<128x16xbf16>, vector<128x16xbf16>, vector<128x16xbf16>, vector<128x16xbf16>, vector<128x16xbf16>, vector<128x16xbf16> -> vector<128x128xbf16>
    %c7 = arith.constant 7 : index
    %c0_33 = arith.constant 0 : index
    %c0_34 = arith.constant 0 : index
    %116 = vector.load %arg4[%c7, %c0_33, %c0_34] : memref<8x128x32xbf16, #tpu.memory_space<vmem>>, vector<1x128x32xbf16>
    %117 = vector.shape_cast %116 : vector<1x128x32xbf16> to vector<128x32xbf16>
    %cst_35 = arith.constant dense<0.000000e+00> : vector<128x32xf32>
    %118 = tpu.matmul %115, %117, %cst_35 {dimension_numbers = #tpu.dot_dimension_numbers<[1], [0], [0], [1], [0, 0, 1, 1], [], []>} : vector<128x128xbf16>, vector<128x32xbf16>, vector<128x32xf32> -> vector<128x32xf32>
    %119 = arith.addf %106, %118 : vector<128x32xf32>
    %c0_36 = arith.constant 0 : index
    %c0_37 = arith.constant 0 : index
    %120 = vector.load %arg5[%c0_36, %c0_37] : memref<1x32xf32, #tpu.memory_space<vmem>>, vector<1x32xf32>
    %121 = vector.broadcast %120 : vector<1x32xf32> to vector<128x32xf32>
    %122 = arith.addf %119, %121 : vector<128x32xf32>
    %123 = vector.shape_cast %122 : vector<128x32xf32> to vector<32x4x32xf32>
    %cst_38 = arith.constant dense<0xFF800000> : vector<32x32xf32>
    %124 = vector.multi_reduction <maximumf>, %123, %cst_38 [1] : vector<32x4x32xf32> to vector<32x32xf32>
    %cst_39 = arith.constant 0.000000e+00 : f32
    %125 = vector.broadcast %cst_39 : f32 to vector<32x32xf32>
    %126 = arith.maximumf %124, %125 : vector<32x32xf32>
    %127 = arith.truncf %126 : vector<32x32xf32> to vector<32x32xbf16>
    %cst_40 = arith.constant 0.000000e+00 : bf16
    %128 = vector.broadcast %cst_40 : bf16 to vector<8x32xbf16>
    %cst_41 = arith.constant 0.000000e+00 : bf16
    %129 = vector.broadcast %cst_41 : bf16 to vector<7x32xbf16>
    %130 = tpu.concatenate %128, %127, %129 in 0 : vector<8x32xbf16>, vector<32x32xbf16>, vector<7x32xbf16> -> vector<47x32xbf16>
    %cst_42 = arith.constant 0.000000e+00 : f32
    %131 = vector.broadcast %cst_42 : f32 to vector<32x64xf32>
    %132 = vector.extract_strided_slice %130 {offsets = [0, 0], sizes = [32, 32], strides = [1, 1]} : vector<47x32xbf16> to vector<32x32xbf16>
    %133 = vector.extract_strided_slice %130 {offsets = [1, 0], sizes = [32, 32], strides = [1, 1]} : vector<47x32xbf16> to vector<32x32xbf16>
    %134 = vector.extract_strided_slice %130 {offsets = [2, 0], sizes = [32, 32], strides = [1, 1]} : vector<47x32xbf16> to vector<32x32xbf16>
    %135 = vector.extract_strided_slice %130 {offsets = [3, 0], sizes = [32, 32], strides = [1, 1]} : vector<47x32xbf16> to vector<32x32xbf16>
    %136 = vector.extract_strided_slice %130 {offsets = [4, 0], sizes = [32, 32], strides = [1, 1]} : vector<47x32xbf16> to vector<32x32xbf16>
    %137 = vector.extract_strided_slice %130 {offsets = [5, 0], sizes = [32, 32], strides = [1, 1]} : vector<47x32xbf16> to vector<32x32xbf16>
    %138 = vector.extract_strided_slice %130 {offsets = [6, 0], sizes = [32, 32], strides = [1, 1]} : vector<47x32xbf16> to vector<32x32xbf16>
    %139 = vector.extract_strided_slice %130 {offsets = [7, 0], sizes = [32, 32], strides = [1, 1]} : vector<47x32xbf16> to vector<32x32xbf16>
    %140 = tpu.concatenate %132, %133, %134, %135, %136, %137, %138, %139 in 1 : vector<32x32xbf16>, vector<32x32xbf16>, vector<32x32xbf16>, vector<32x32xbf16>, vector<32x32xbf16>, vector<32x32xbf16>, vector<32x32xbf16>, vector<32x32xbf16> -> vector<32x256xbf16>
    %c0_43 = arith.constant 0 : index
    %c0_44 = arith.constant 0 : index
    %c0_45 = arith.constant 0 : index
    %141 = vector.load %arg6[%c0_43, %c0_44, %c0_45] : memref<2x256x64xbf16, #tpu.memory_space<vmem>>, vector<1x256x64xbf16>
    %142 = vector.shape_cast %141 : vector<1x256x64xbf16> to vector<256x64xbf16>
    %cst_46 = arith.constant dense<0.000000e+00> : vector<32x64xf32>
    %143 = tpu.matmul %140, %142, %cst_46 {dimension_numbers = #tpu.dot_dimension_numbers<[1], [0], [0], [1], [0, 0, 1, 1], [], []>} : vector<32x256xbf16>, vector<256x64xbf16>, vector<32x64xf32> -> vector<32x64xf32>
    %144 = arith.addf %131, %143 : vector<32x64xf32>
    %145 = vector.extract_strided_slice %130 {offsets = [8, 0], sizes = [32, 32], strides = [1, 1]} : vector<47x32xbf16> to vector<32x32xbf16>
    %146 = vector.extract_strided_slice %130 {offsets = [9, 0], sizes = [32, 32], strides = [1, 1]} : vector<47x32xbf16> to vector<32x32xbf16>
    %147 = vector.extract_strided_slice %130 {offsets = [10, 0], sizes = [32, 32], strides = [1, 1]} : vector<47x32xbf16> to vector<32x32xbf16>
    %148 = vector.extract_strided_slice %130 {offsets = [11, 0], sizes = [32, 32], strides = [1, 1]} : vector<47x32xbf16> to vector<32x32xbf16>
    %149 = vector.extract_strided_slice %130 {offsets = [12, 0], sizes = [32, 32], strides = [1, 1]} : vector<47x32xbf16> to vector<32x32xbf16>
    %150 = vector.extract_strided_slice %130 {offsets = [13, 0], sizes = [32, 32], strides = [1, 1]} : vector<47x32xbf16> to vector<32x32xbf16>
    %151 = vector.extract_strided_slice %130 {offsets = [14, 0], sizes = [32, 32], strides = [1, 1]} : vector<47x32xbf16> to vector<32x32xbf16>
    %152 = vector.extract_strided_slice %130 {offsets = [15, 0], sizes = [32, 32], strides = [1, 1]} : vector<47x32xbf16> to vector<32x32xbf16>
    %153 = tpu.concatenate %145, %146, %147, %148, %149, %150, %151, %152 in 1 : vector<32x32xbf16>, vector<32x32xbf16>, vector<32x32xbf16>, vector<32x32xbf16>, vector<32x32xbf16>, vector<32x32xbf16>, vector<32x32xbf16>, vector<32x32xbf16> -> vector<32x256xbf16>
    %c1_47 = arith.constant 1 : index
    %c0_48 = arith.constant 0 : index
    %c0_49 = arith.constant 0 : index
    %154 = vector.load %arg6[%c1_47, %c0_48, %c0_49] : memref<2x256x64xbf16, #tpu.memory_space<vmem>>, vector<1x256x64xbf16>
    %155 = vector.shape_cast %154 : vector<1x256x64xbf16> to vector<256x64xbf16>
    %cst_50 = arith.constant dense<0.000000e+00> : vector<32x64xf32>
    %156 = tpu.matmul %153, %155, %cst_50 {dimension_numbers = #tpu.dot_dimension_numbers<[1], [0], [0], [1], [0, 0, 1, 1], [], []>} : vector<32x256xbf16>, vector<256x64xbf16>, vector<32x64xf32> -> vector<32x64xf32>
    %157 = arith.addf %144, %156 : vector<32x64xf32>
    %c0_51 = arith.constant 0 : index
    %c0_52 = arith.constant 0 : index
    %158 = vector.load %arg7[%c0_51, %c0_52] : memref<1x64xf32, #tpu.memory_space<vmem>>, vector<1x64xf32>
    %159 = vector.broadcast %158 : vector<1x64xf32> to vector<32x64xf32>
    %160 = arith.addf %157, %159 : vector<32x64xf32>
    %161 = vector.shape_cast %160 : vector<32x64xf32> to vector<8x4x64xf32>
    %cst_53 = arith.constant dense<0xFF800000> : vector<8x64xf32>
    %162 = vector.multi_reduction <maximumf>, %161, %cst_53 [1] : vector<8x4x64xf32> to vector<8x64xf32>
    %cst_54 = arith.constant 0.000000e+00 : f32
    %163 = vector.broadcast %cst_54 : f32 to vector<8x64xf32>
    %164 = arith.maximumf %162, %163 : vector<8x64xf32>
    %165 = arith.truncf %164 : vector<8x64xf32> to vector<8x64xbf16>
    %cst_55 = arith.constant 0.000000e+00 : bf16
    %166 = vector.broadcast %cst_55 : bf16 to vector<2x64xbf16>
    %cst_56 = arith.constant 0.000000e+00 : bf16
    %167 = vector.broadcast %cst_56 : bf16 to vector<1x64xbf16>
    %168 = tpu.concatenate %166, %165, %167 in 0 : vector<2x64xbf16>, vector<8x64xbf16>, vector<1x64xbf16> -> vector<11x64xbf16>
    %cst_57 = arith.constant 0.000000e+00 : f32
    %169 = vector.broadcast %cst_57 : f32 to vector<8x128xf32>
    %170 = vector.extract_strided_slice %168 {offsets = [0, 0], sizes = [8, 64], strides = [1, 1]} : vector<11x64xbf16> to vector<8x64xbf16>
    %171 = vector.extract_strided_slice %168 {offsets = [1, 0], sizes = [8, 64], strides = [1, 1]} : vector<11x64xbf16> to vector<8x64xbf16>
    %172 = vector.extract_strided_slice %168 {offsets = [2, 0], sizes = [8, 64], strides = [1, 1]} : vector<11x64xbf16> to vector<8x64xbf16>
    %173 = vector.extract_strided_slice %168 {offsets = [3, 0], sizes = [8, 64], strides = [1, 1]} : vector<11x64xbf16> to vector<8x64xbf16>
    %174 = tpu.concatenate %170, %171, %172, %173 in 1 : vector<8x64xbf16>, vector<8x64xbf16>, vector<8x64xbf16>, vector<8x64xbf16> -> vector<8x256xbf16>
    %c0_58 = arith.constant 0 : index
    %c0_59 = arith.constant 0 : index
    %c0_60 = arith.constant 0 : index
    %175 = vector.load %arg8[%c0_58, %c0_59, %c0_60] : memref<1x256x128xbf16, #tpu.memory_space<vmem>>, vector<1x256x128xbf16>
    %176 = vector.shape_cast %175 : vector<1x256x128xbf16> to vector<256x128xbf16>
    %cst_61 = arith.constant dense<0.000000e+00> : vector<8x128xf32>
    %177 = tpu.matmul %174, %176, %cst_61 {dimension_numbers = #tpu.dot_dimension_numbers<[1], [0], [0], [1], [0, 0, 1, 1], [], []>} : vector<8x256xbf16>, vector<256x128xbf16>, vector<8x128xf32> -> vector<8x128xf32>
    %178 = arith.addf %169, %177 : vector<8x128xf32>
    %c0_62 = arith.constant 0 : index
    %c0_63 = arith.constant 0 : index
    %179 = vector.load %arg9[%c0_62, %c0_63] : memref<1x128xf32, #tpu.memory_space<vmem>>, vector<1x128xf32>
    %180 = vector.broadcast %179 : vector<1x128xf32> to vector<8x128xf32>
    %181 = arith.addf %178, %180 : vector<8x128xf32>
    %182 = vector.shape_cast %181 : vector<8x128xf32> to vector<4x2x128xf32>
    %cst_64 = arith.constant dense<0xFF800000> : vector<4x128xf32>
    %183 = vector.multi_reduction <maximumf>, %182, %cst_64 [1] : vector<4x2x128xf32> to vector<4x128xf32>
    %cst_65 = arith.constant 0.000000e+00 : f32
    %184 = vector.broadcast %cst_65 : f32 to vector<4x128xf32>
    %185 = arith.maximumf %183, %184 : vector<4x128xf32>
    %186 = arith.truncf %185 : vector<4x128xf32> to vector<4x128xbf16>
    %cst_66 = arith.constant 0.000000e+00 : bf16
    %187 = vector.broadcast %cst_66 : bf16 to vector<1x128xbf16>
    %188 = tpu.concatenate %187, %186 in 0 : vector<1x128xbf16>, vector<4x128xbf16> -> vector<5x128xbf16>
    %cst_67 = arith.constant 0.000000e+00 : f32
    %189 = vector.broadcast %cst_67 : f32 to vector<4x256xf32>
    %190 = vector.extract_strided_slice %188 {offsets = [0, 0], sizes = [4, 128], strides = [1, 1]} : vector<5x128xbf16> to vector<4x128xbf16>
    %191 = vector.extract_strided_slice %188 {offsets = [1, 0], sizes = [4, 128], strides = [1, 1]} : vector<5x128xbf16> to vector<4x128xbf16>
    %192 = tpu.concatenate %190, %191 in 1 : vector<4x128xbf16>, vector<4x128xbf16> -> vector<4x256xbf16>
    %c0_68 = arith.constant 0 : index
    %c0_69 = arith.constant 0 : index
    %c0_70 = arith.constant 0 : index
    %193 = vector.load %arg10[%c0_68, %c0_69, %c0_70] : memref<1x256x256xbf16, #tpu.memory_space<vmem>>, vector<1x256x256xbf16>
    %194 = vector.shape_cast %193 : vector<1x256x256xbf16> to vector<256x256xbf16>
    %cst_71 = arith.constant dense<0.000000e+00> : vector<4x256xf32>
    %195 = tpu.matmul %192, %194, %cst_71 {dimension_numbers = #tpu.dot_dimension_numbers<[1], [0], [0], [1], [0, 0, 1, 1], [], []>} : vector<4x256xbf16>, vector<256x256xbf16>, vector<4x256xf32> -> vector<4x256xf32>
    %196 = arith.addf %189, %195 : vector<4x256xf32>
    %c0_72 = arith.constant 0 : index
    %c0_73 = arith.constant 0 : index
    %197 = vector.load %arg11[%c0_72, %c0_73] : memref<1x256xf32, #tpu.memory_space<vmem>>, vector<1x256xf32>
    %198 = vector.broadcast %197 : vector<1x256xf32> to vector<4x256xf32>
    %199 = arith.addf %196, %198 : vector<4x256xf32>
    %200 = vector.shape_cast %199 : vector<4x256xf32> to vector<2x2x256xf32>
    %cst_74 = arith.constant dense<0xFF800000> : vector<2x256xf32>
    %201 = vector.multi_reduction <maximumf>, %200, %cst_74 [1] : vector<2x2x256xf32> to vector<2x256xf32>
    %cst_75 = arith.constant 0.000000e+00 : f32
    %202 = vector.broadcast %cst_75 : f32 to vector<2x256xf32>
    %203 = arith.maximumf %201, %202 : vector<2x256xf32>
    %c0_76 = arith.constant 0 : index
    %c0_77 = arith.constant 0 : index
    %c0_78 = arith.constant 0 : index
    %204 = vector.load %arg12[%c0_76, %c0_77, %c0_78] : memref<1x2x256xf32, #tpu.memory_space<vmem>>, vector<1x2x256xf32>
    %205 = vector.shape_cast %204 : vector<1x2x256xf32> to vector<2x256xf32>
    %206 = vector.shape_cast %203 : vector<2x256xf32> to vector<1x2x256xf32>
    tpu.vector_store %arg12[%c0_76, %c0_77, %c0_78], %206 {strides = array<i32>} : memref<1x2x256xf32, #tpu.memory_space<vmem>>, vector<1x2x256xf32>,
    return
  }
  func.func @transform_0(%arg0: i32) -> (i32, i32, i32) {
    %c0_i32 = arith.constant 0 : i32
    %c0_i32_0 = arith.constant 0 : i32
    %c0_i32_1 = arith.constant 0 : i32
    return %arg0, %c0_i32, %c0_i32_0 : i32, i32, i32
  }
  func.func @transform_1(%arg0: i32) -> (i32, i32) {
    %c0_i32 = arith.constant 0 : i32
    %c0_i32_0 = arith.constant 0 : i32
    %c0_i32_1 = arith.constant 0 : i32
    return %c0_i32, %c0_i32_0 : i32, i32
  }
  func.func @transform_2(%arg0: i32) -> (i32, i32) {
    %c0_i32 = arith.constant 0 : i32
    %c0_i32_0 = arith.constant 0 : i32
    %c0_i32_1 = arith.constant 0 : i32
    return %c0_i32, %c0_i32_0 : i32, i32
  }
  func.func @transform_3(%arg0: i32) -> (i32, i32, i32) {
    %c0_i32 = arith.constant 0 : i32
    %c0_i32_0 = arith.constant 0 : i32
    %c0_i32_1 = arith.constant 0 : i32
    %c0_i32_2 = arith.constant 0 : i32
    return %c0_i32, %c0_i32_0, %c0_i32_1 : i32, i32, i32
  }
  func.func @transform_4(%arg0: i32) -> (i32, i32) {
    %c0_i32 = arith.constant 0 : i32
    %c0_i32_0 = arith.constant 0 : i32
    %c0_i32_1 = arith.constant 0 : i32
    return %c0_i32, %c0_i32_0 : i32, i32
  }
  func.func @transform_5(%arg0: i32) -> (i32, i32, i32) {
    %c0_i32 = arith.constant 0 : i32
    %c0_i32_0 = arith.constant 0 : i32
    %c0_i32_1 = arith.constant 0 : i32
    %c0_i32_2 = arith.constant 0 : i32
    return %c0_i32, %c0_i32_0, %c0_i32_1 : i32, i32, i32
  }
  func.func @transform_6(%arg0: i32) -> (i32, i32) {
    %c0_i32 = arith.constant 0 : i32
    %c0_i32_0 = arith.constant 0 : i32
    %c0_i32_1 = arith.constant 0 : i32
    return %c0_i32, %c0_i32_0 : i32, i32
  }
  func.func @transform_7(%arg0: i32) -> (i32, i32, i32) {
    %c0_i32 = arith.constant 0 : i32
    %c0_i32_0 = arith.constant 0 : i32
    %c0_i32_1 = arith.constant 0 : i32
    %c0_i32_2 = arith.constant 0 : i32
    return %c0_i32, %c0_i32_0, %c0_i32_1 : i32, i32, i32
  }
  func.func @transform_8(%arg0: i32) -> (i32, i32) {
    %c0_i32 = arith.constant 0 : i32
    %c0_i32_0 = arith.constant 0 : i32
    %c0_i32_1 = arith.constant 0 : i32
    return %c0_i32, %c0_i32_0 : i32, i32
  }
  func.func @transform_9(%arg0: i32) -> (i32, i32, i32) {
    %c0_i32 = arith.constant 0 : i32
    %c0_i32_0 = arith.constant 0 : i32
    %c0_i32_1 = arith.constant 0 : i32
    %c0_i32_2 = arith.constant 0 : i32
    return %c0_i32, %c0_i32_0, %c0_i32_1 : i32, i32, i32
  }
  func.func @transform_10(%arg0: i32) -> (i32, i32) {
    %c0_i32 = arith.constant 0 : i32
    %c0_i32_0 = arith.constant 0 : i32
    %c0_i32_1 = arith.constant 0 : i32
    return %c0_i32, %c0_i32_0 : i32, i32
  }
  func.func @transform_11(%arg0: i32) -> (i32, i32, i32) {
    %c0_i32 = arith.constant 0 : i32
    %c0_i32_0 = arith.constant 0 : i32
    %c0_i32_1 = arith.constant 0 : i32
    return %arg0, %c0_i32, %c0_i32_0 : i32, i32, i32
  }
}

</mosaic_0001>

<bundles_post_ra>
// kernel: alexnet_backbone_forward.1
= control target key start
LH: loop header
LB: loop body
LE: loop exit
PB: predicated region body
PF: predicated region fallthrough
CT: control target
= control target key end

     0   :  { %s7858_s17 = smov 0   ;;  %s10501_s0 = inlined_call_operand.vmem [shape: bf16[2,512,128], index: 0, kind: input, shape index: {}]   ;;  %s10502_s1 = inlined_call_operand.vmem [shape: bf16[128,16], index: 1, kind: input, shape index: {}]   ;;  %s10503_s2 = inlined_call_operand.vmem [shape: f32[1,16], index: 2, kind: input, shape index: {}]   ;;  %s10504_s3 = inlined_call_operand.vmem [shape: bf16[8,128,32], index: 3, kind: input, shape index: {}]   ;;  %s10505_s4 = inlined_call_operand.vmem [shape: f32[1,32], index: 4, kind: input, shape index: {}]   ;;  %s10506_s5 = inlined_call_operand.vmem [shape: bf16[2,256,64], index: 5, kind: input, shape index: {}]   ;;  %s10507_s6 = inlined_call_operand.vmem [shape: f32[1,64], index: 6, kind: input, shape index: {}]   ;;  %s10508_s7 = inlined_call_operand.vmem [shape: bf16[1,256,128], index: 7, kind: input, shape index: {}]   ;;  %s10509_s8 = inlined_call_operand.vmem [shape: f32[1,128], index: 8, kind: input, shape index: {}]   ;;  %s10510_s9 = inlined_call_operand.vmem [shape: bf16[1,256,256], index: 9, kind: input, shape index: {}]   ;;  %s10511_s10 = inlined_call_operand.vmem [shape: f32[1,256], index: 10, kind: input, shape index: {}]   ;;  %s10512_s11 = inlined_call_operand.vmem [shape: f32[2,2,256], index: 11, kind: output, shape index: {}]  }
   0x1 LB: > { %s6629_s18 = sadd.s32 4294967295, %s7787_s17   ;;  %p6633_p0 = scmp.ge.s32.totalorder %s7787_s17, 1  ;;  %s7787_s17 = sphi %s7858_s17, %s21_s17  }
   0x2   : > { %p337_p1 = scmp.lt.s32.totalorder %s7787_s17, 3 }
   0x4   : > { %p338_p2 = pnand %p6633_p0, %p337_p1 }
   0x6   : > { %341 = sbr.rel (%p338_p2) target bundleno = 2236 (0x8bc), region = 64 }
   0xb   : > { %v7578_v0 = vld [vmem:[%s10502_s1 + $0x38] sm:$0xff]   ;;  %p377_p3 = scmp.lt.s32.totalorder %s6629_s18, 1  ;;  %v7579_v1 = vld [vmem:[%s10502_s1 + $0x30] sm:$0xff]   ;;  %v7580_v2 = vld [vmem:[%s10502_s1 + $0x28] sm:$0xff]   ;;  %v7789_v40 = vmov 0   ;;  %s7790_s22 = smov 32  }
   0xc   : > { %7220 = vmatprep.subr.bf16.mxu0 %v7578_v0  ;;  %v7581_v3 = vld [vmem:[%s10502_s1 + $0x20] sm:$0xff]   ;;  %v7582_v5 = vld [vmem:[%s10502_s1 + $0x18] sm:$0xff]   ;;  %v7583_v6 = vld [vmem:[%s10502_s1 + $0x10] sm:$0xff]   ;;  %v7931_v41 = vrot.slane %v7789_v40, 1  ;;  %v7936_v42 = vrot.slane %v7789_v40, 2  ;;  %s7791_s23 = smov 64  }
   0xd   : > { %s10652_s18 = smov (!%p377_p3, %s6629_s18), 1  ;;  %7221 = vmatpush3.bf16.msra.mxu0 %v7578_v0  ;;  %v7584_v7 = vld [vmem:[%s10502_s1 + $0x8] sm:$0xff]   ;;  %v7585_v8 = vld [vmem:[%s10502_s1] sm:$0xff]   ;;  %s7792_s24 = smov 48   ;;  %v7947_v44 = vrot.slane %v7789_v40, 3  ;;  %vm1196_vm0 = vcmask 125952  }
   0xe   : > { %7222 = vmatprep.subr.bf16.mxu0 %v7579_v1  ;;  %s6972_s25 = sshll.u32 %s10652_s18, 8  ;;  %10552 = vst [vmem:[#allocation2_spill] sm:$0xff] %v7931_v41  ;;  %2828 = vrot.lane.b32.xlu1 %v7931_v41, %s7790_s22  ;;  %10553 = vst [vmem:[#allocation3_spill] sm:$0xff] %v7936_v42  ;;  %v7940_v43 = vor.u32 %v7936_v42, %v7931_v41  ;;  %s7794_s26 = smov 80   ;;  %v7960_v46 = vld [vmem:[%s10503_s2] ss:$0 sm:$0xff] }
   0xf   : > { %s7881_s28 = scalar_lea.vmem %s10501_s0, %s6972_s25  ;;  %2912 = vrot.lane.b32.xlu0 %v7936_v42, %s7791_s23  ;;  %v7951_v45 = vor.u32 %v7947_v44, %v7936_v42  ;;  %s7793_s25 = smov 96   ;;  %vm10545_vm1 = vcmask 1041409   ;;  %vm10547_vm2 = vcmask 1042434   ;;  %vm10549_vm3 = vcmask 1043459  }
  0x10   : > { %v7586_v4 = vld [vmem:[%s7881_s28] sm:$0xff]   ;;  %v7587_v9 = vld [vmem:[%s7881_s28 + $0x8] sm:$0xff]   ;;  %v7588_v10 = vld [vmem:[%s7881_s28 + $0x10] sm:$0xff]   ;;  %10554 = vst [vmem:[#allocation4_spill] sm:$0xff] %v7940_v43  ;;  %vm2611_vm4 = vcmask 1044484   ;;  %vm2613_vm5 = vcmask 1045509  }
  0x11   : > { %7223 = vmatpush3.bf16.msra.mxu0 %v7579_v1  ;;  %7236 = vmatprep.mubr.bf16.mxu0 %v7586_v4  ;;  %v7589_v11 = vld [vmem:[%s7881_s28 + $0x18] sm:$0xff]   ;;  %v7590_v12 = vld [vmem:[%s7881_s28 + $0x20] sm:$0xff]   ;;  %v7591_v13 = vld [vmem:[%s7881_s28 + $0x28] sm:$0xff]   ;;  %10555 = vst [vmem:[#allocation5_spill] sm:$0xff] %v7951_v45  ;;  %vm10551_vm6 = vcmask 1046534   ;;  %vm10550_vm7 = vcmask 1047559  }
  0x12   : > { %7224 = vmatprep.subr.bf16.mxu0 %v7580_v2  ;;  %v7592_v14 = vld [vmem:[%s7881_s28 + $0x30] sm:$0xff]   ;;  %v7593_v15 = vld [vmem:[%s7881_s28 + $0x38] sm:$0xff]   ;;  %v7594_v16 = vld [vmem:[%s7881_s28 + $0x40] sm:$0xff]   ;;  %2879 = vrot.lane.b32.xlu1 %v7940_v43, %s7792_s24  ;;  %vm3010_vm8 = vsmask.f32 4352  ;;  %s7795_s12 = smov 112  }
  0x13   : > { %v7595_v17 = vld [vmem:[%s7881_s28 + $0x48] sm:$0xff]   ;;  %v7596_v18 = vld [vmem:[%s7881_s28 + $0x50] sm:$0xff]   ;;  %v7597_v19 = vld [vmem:[%s7881_s28 + $0x58] sm:$0xff]   ;;  %2994 = vrot.lane.b32.xlu0 %v7947_v44, %s7793_s25  ;;  %vm2811_vm9 = vcmask 1046528   ;;  %vm2895_vm10 = vcmask 1045504   ;;  %vm2977_vm12 = vcmask 1044480  }
  0x14   : > { %v7598_v20 = vld [vmem:[%s7881_s28 + $0x60] sm:$0xff]   ;;  %v7599_v21 = vld [vmem:[%s7881_s28 + $0x68] sm:$0xff]   ;;  %v7600_v22 = vld [vmem:[%s7881_s28 + $0x70] sm:$0xff]   ;;  %vm10548_vm11 = vsmask.f32 7424  ;;  %s7796_s13 = smov 16  }
  0x15   : > { %7225 = vmatpush3.bf16.msra.mxu0 %v7580_v2  ;;  %v7601_v23 = vld [vmem:[%s7881_s28 + $0x78] sm:$0xff]   ;;  %v7602_v24 = vld [vmem:[%s7881_s28 + $0x80] sm:$0xff]   ;;  %v7603_v25 = vld [vmem:[%s7881_s28 + $0x88] sm:$0xff]   ;;  %vm10544_vm13 = vsmask.f32 6400  ;;  %vm3059_vm15 = vcmask 130048  }
  0x16   : > { %7226 = vmatprep.subr.bf16.mxu0 %v7581_v3  ;;  %v7604_v26 = vld [vmem:[%s7881_s28 + $0x90] sm:$0xff]   ;;  %v7605_v27 = vld [vmem:[%s7881_s28 + $0x98] sm:$0xff]   ;;  %v7606_v28 = vld [vmem:[%s7881_s28 + $0xa0] sm:$0xff]   ;;  %2961 = vrot.lane.b32.xlu1 %v7951_v45, %s7794_s26  ;;  %vm10546_vm14 = vsmask.f32 5376  ;;  %s6973_s30 = sshll.u32 %s10652_s18, 2 }
  0x17   : > { %v7607_v29 = vld [vmem:[%s7881_s28 + $0xa8] sm:$0xff]   ;;  %v7608_v30 = vld [vmem:[%s7881_s28 + $0xb0] sm:$0xff]   ;;  %v7609_v31 = vld [vmem:[%s7881_s28 + $0xb8] sm:$0xff]   ;;  %s386_s16 = scalar_lea.vmem %s10512_s11, %s6973_s30 }
  0x18   : > { %v7610_v32 = vld [vmem:[%s7881_s28 + $0xc0] sm:$0xff]   ;;  %v7611_v33 = vld [vmem:[%s7881_s28 + $0xc8] sm:$0xff]   ;;  %v7612_v34 = vld [vmem:[%s7881_s28 + $0xd0] sm:$0xff]  }
  0x19   : > { %7227 = vmatpush3.bf16.msra.mxu0 %v7581_v3  ;;  %v7613_v35 = vld [vmem:[%s7881_s28 + $0xd8] sm:$0xff]   ;;  %v7614_v36 = vld [vmem:[%s7881_s28 + $0xe0] sm:$0xff]   ;;  %v7615_v37 = vld [vmem:[%s7881_s28 + $0xe8] sm:$0xff]  }
  0x1a   : > { %7228 = vmatprep.subr.bf16.mxu0 %v7582_v5  ;;  %v7616_v38 = vld [vmem:[%s7881_s28 + $0xf0] sm:$0xff]   ;;  %v7617_v39 = vld [vmem:[%s7881_s28 + $0xf8] sm:$0xff]  }
  0x1d   : > { %7229 = vmatpush3.bf16.msra.mxu0 %v7582_v5 }
  0x1e   : > { %7230 = vmatprep.subr.bf16.mxu0 %v7583_v6 }
  0x21   : > { %7231 = vmatpush3.bf16.msra.mxu0 %v7583_v6 }
  0x22   : > { %7232 = vmatprep.subr.bf16.mxu0 %v7584_v7 }
  0x25   : > { %7233 = vmatpush3.bf16.msra.mxu0 %v7584_v7 }
  0x26   : > { %7234 = vmatprep.subr.bf16.mxu0 %v7585_v8 }
  0x29   : > { %7235 = vmatpush3.bf16.msra.mxu0 %v7585_v8 }
  0x2c   : > { %7237 = vmatmul.mubr.bf16.vlgmr.msra.gmra.mxu0 %v7587_v9 }
  0x2d   : > { %7240 = vmatprep.mubr.bf16.mxu0 %v7588_v10 }
  0x34   : > { %7241 = vmatmul.mubr.bf16.gmra.mxu0 %v7589_v11 }
  0x35   : > { %7244 = vmatprep.mubr.bf16.mxu0 %v7590_v12 }
  0x3c   : > { %7245 = vmatmul.mubr.bf16.gmra.mxu0 %v7591_v13 }
  0x3d   : > { %7248 = vmatprep.mubr.bf16.mxu0 %v7592_v14 }
  0x44   : > { %7249 = vmatmul.mubr.bf16.gmra.mxu0 %v7593_v15 }
  0x45   : > { %7252 = vmatprep.mubr.bf16.mxu0 %v7594_v16 }
  0x4c   : > { %7253 = vmatmul.mubr.bf16.gmra.mxu0 %v7595_v17 }
  0x4d   : > { %7256 = vmatprep.mubr.bf16.mxu0 %v7596_v18 }
  0x54   : > { %7257 = vmatmul.mubr.bf16.gmra.mxu0 %v7597_v19 }
  0x55   : > { %7260 = vmatprep.mubr.bf16.mxu0 %v7598_v20 }
  0x5c   : > { %7261 = vmatmul.mubr.bf16.gmra.mxu0 %v7599_v21 }
  0x5d   : > { %7264 = vmatprep.mubr.bf16.mxu0 %v7600_v22 }
  0x64   : > { %7265 = vmatmul.mubr.bf16.gmra.mxu0 %v7601_v23 }
  0x65   : > { %7268 = vmatprep.mubr.bf16.mxu0 %v7602_v24 }
  0x6c   : > { %7269 = vmatmul.mubr.bf16.gmra.mxu0 %v7603_v25 }
  0x6d   : > { %7272 = vmatprep.mubr.bf16.mxu0 %v7604_v26 }
  0x74   : > { %7273 = vmatmul.mubr.bf16.gmra.mxu0 %v7605_v27 }
  0x75   : > { %7276 = vmatprep.mubr.bf16.mxu0 %v7606_v28 }
  0x7c   : > { %7277 = vmatmul.mubr.bf16.gmra.mxu0 %v7607_v29 }
  0x7d   : > { %7280 = vmatprep.mubr.bf16.mxu0 %v7608_v30 }
  0x84   : > { %7281 = vmatmul.mubr.bf16.gmra.mxu0 %v7609_v31 }
  0x85   : > { %7284 = vmatprep.mubr.bf16.mxu0 %v7610_v32 }
  0x8c   : > { %7285 = vmatmul.mubr.bf16.gmra.mxu0 %v7611_v33 }
  0x8d   : > { %7288 = vmatprep.mubr.bf16.mxu0 %v7612_v34 }
  0x94   : > { %7289 = vmatmul.mubr.bf16.gmra.mxu0 %v7613_v35 }
  0x95   : > { %7292 = vmatprep.mubr.bf16.mxu0 %v7614_v36 }
  0x9c   : > { %7293 = vmatmul.mubr.bf16.gmra.mxu0 %v7615_v37 }
  0x9d   : > { %7296 = vmatprep.mubr.bf16.mxu0 %v7616_v38 }
  0xa4   : > { %7297 = vmatmul.mubr.bf16.gmra.mxu0 %v7617_v39 }
  0xec   : > { %v7238_v47 = vpop.f32.mrf.mxu0 }
  0xed   : > { %v758_v48 = vadd.f32 %v7238_v47, %v7960_v46 }
  0xee   : > { %v749_v49 = vpop.f32.mrf.mxu0 }
  0xef   : > { %v1070_v50 = vcombine.high %v758_v48, %v758_v48  ;;  %v1225_v51 = vsel %vm1196_vm0, %v758_v48, -inf  ;;  %v750_v52 = vadd.f32 %v7960_v46, %v749_v49 }
  0xf0   : > { %v7239_v53 = vpop.f32.mrf.mxu0  ;;  %v1226_v56 = vrot.slane %v1225_v51, 4 }
  0xf1   : > { %v1068_v54 = vcombine.high %v750_v52, %v750_v52  ;;  %v1197_v55 = vsel %vm1196_vm0, %v750_v52, -inf  ;;  %v1232_v57 = vsel %vm1196_vm0, %v1070_v50, -inf  ;;  %v761_v61 = vadd.f32 %v7239_v53, %v7960_v46 }
  0xf2   : > { %v1198_v58 = vrot.slane %v1197_v55, 4  ;;  %v752_v59 = vpop.f32.mrf.mxu0  ;;  %v1233_v1 = vrot.slane %v1232_v57, 4  ;;  %v1227_v4 = vmax.f32 %v1225_v51, %v1226_v56 }
  0xf3   : > { %v1204_v60 = vsel %vm1196_vm0, %v1068_v54, -inf  ;;  %v753_v62 = vadd.f32 %v7960_v46, %v752_v59  ;;  %v1071_v7 = vcombine.high %v761_v61, %v761_v61  ;;  %v1239_v11 = vsel %vm1196_vm0, %v761_v61, -inf }
  0xf4   : > { %v1199_v63 = vmax.f32 %v1197_v55, %v1198_v58  ;;  %v1205_v0 = vrot.slane %v1204_v60, 4  ;;  %v1234_v12 = vmax.f32 %v1232_v57, %v1233_v1  ;;  %v1228_v16 = vrot.slane %v1227_v4, 2  ;;  %v7242_v27 = vpop.f32.mrf.mxu0 }
  0xf5   : > { %v1069_v2 = vcombine.high %v753_v62, %v753_v62  ;;  %v1211_v3 = vsel %vm1196_vm0, %v753_v62, -inf  ;;  %v1246_v18 = vsel %vm1196_vm0, %v1071_v7, -inf  ;;  %v1240_v22 = vrot.slane %v1239_v11, 4 }
  0xf6   : > { %v1200_v5 = vrot.slane %v1199_v63, 2  ;;  %v1206_v6 = vmax.f32 %v1204_v60, %v1205_v0  ;;  %v1212_v8 = vrot.slane %v1211_v3, 4  ;;  %v1235_v23 = vrot.slane %v1234_v12, 2  ;;  %v765_v36 = vpop.f32.mrf.mxu0 }
  0xf7   : > { %v1218_v9 = vsel %vm1196_vm0, %v1069_v2, -inf  ;;  %v1229_v28 = vmax.f32 %v1227_v4, %v1228_v16  ;;  %v1247_v29 = vrot.slane %v1246_v18, 4  ;;  %v1241_v35 = vmax.f32 %v1239_v11, %v1240_v22 }
  0xf8   : > { %v1207_v10 = vrot.slane %v1206_v6, 2  ;;  %v1201_v13 = vmax.f32 %v1199_v63, %v1200_v5  ;;  %v1213_v14 = vmax.f32 %v1211_v3, %v1212_v8  ;;  %v1219_v15 = vrot.slane %v1218_v9, 4  ;;  %v7243_v56 = vpop.f32.mrf.mxu0 }
  0xf9   : > { %v1236_v33 = vmax.f32 %v1234_v12, %v1235_v23  ;;  %v1230_v37 = vrot.slane %v1229_v28, 1  ;;  %v1248_v38 = vmax.f32 %v1246_v18, %v1247_v29  ;;  %v774_v39 = vadd.f32 %v7242_v27, %v7960_v46 }
  0xfa   : > { %v1208_v17 = vmax.f32 %v1206_v6, %v1207_v10  ;;  %v1214_v19 = vrot.slane %v1213_v14, 2  ;;  %v1220_v20 = vmax.f32 %v1218_v9, %v1219_v15  ;;  %v1202_v24 = vrot.slane %v1201_v13, 1  ;;  %v768_v22 = vpop.f32.mrf.mxu0 }
  0xfb   : > { %v1074_v50 = vcombine.high %v774_v39, %v774_v39  ;;  %v766_v51 = vadd.f32 %v7960_v46, %v765_v36  ;;  %v1237_v52 = vrot.slane %v1236_v33, 1  ;;  %v1242_v54 = vrot.slane %v1241_v35, 2 }
  0xfc   : > { %v1209_v21 = vrot.slane %v1208_v17, 1  ;;  %v1215_v25 = vmax.f32 %v1213_v14, %v1214_v19  ;;  %v1221_v26 = vrot.slane %v1220_v20, 2  ;;  %v1203_v34 = vmax.f32 %v1201_v13, %v1202_v24 }
  0xfd   : > { %v1281_v55 = vsel %vm1196_vm0, %v774_v39, -inf  ;;  %v1231_v57 = vmax.f32 %v1229_v28, %v1230_v37  ;;  %v1249_v58 = vrot.slane %v1248_v38, 2  ;;  %v1072_v59 = vcombine.high %v766_v51, %v766_v51 }
  0xfe   : > { %v1210_v30 = vmax.f32 %v1208_v17, %v1209_v21  ;;  %v1216_v31 = vrot.slane %v1215_v25, 1  ;;  %v1222_v32 = vmax.f32 %v1220_v20, %v1221_v26  ;;  %v2093_v53 = vmax.f32 %v1203_v34, 0.0 }
  0xff   : > { %v1288_v63 = vsel %vm1196_vm0, %v1074_v50, -inf  ;;  %v1282_v0 = vrot.slane %v1281_v55, 4  ;;  %v1253_v1 = vsel %vm1196_vm0, %v766_v51, -inf  ;;  %v1260_v2 = vsel %vm1196_vm0, %v1072_v59, -inf }
 0x100   : > { %v2094_v47 = vmax.f32 %v1210_v30, 0.0  ;;  %v1217_v48 = vmax.f32 %v1215_v25, %v1216_v31  ;;  %v1223_v49 = vrot.slane %v1222_v32, 1  ;;  %v777_v3 = vadd.f32 %v7243_v56, %v7960_v46 }
 0x101   : > { %v1238_v4 = vmax.f32 %v1236_v33, %v1237_v52  ;;  %v2221_v5 = vpack.c.bf16 %v2093_v53, %v2093_v53  ;;  %v1243_v6 = vmax.f32 %v1241_v35, %v1242_v54  ;;  %v1289_v7 = vrot.slane %v1288_v63, 4 }
 0x102   : > { %v2222_v60 = vpack.c.bf16 %v2094_v47, %v2094_v47  ;;  %v1224_v61 = vmax.f32 %v1222_v32, %v1223_v49  ;;  %v2095_v62 = vmax.f32 %v1217_v48, 0.0  ;;  %v1254_v8 = vrot.slane %v1253_v1, 4 }
 0x103   : > { %v1261_v9 = vrot.slane %v1260_v2, 4  ;;  %v1295_v10 = vsel %vm1196_vm0, %v777_v3, -inf  ;;  %v1250_v11 = vmax.f32 %v1248_v38, %v1249_v58  ;;  %v3012_v14 = vrot.slane %v7789_v40, 4  ;;  %v7246_v38 = vpop.f32.mrf.mxu0 }
 0x104   : > { %v2096_v12 = vmax.f32 %v1224_v61, 0.0  ;;  %v2223_v13 = vpack.c.bf16 %v2095_v62, %v2095_v62  ;;  %v2097_v15 = vmax.f32 %v1231_v57, 0.0  ;;  %v2478_v16 = vunpack.c.l.b16 %v2222_v60 }
 0x105   : > { %v1283_v17 = vmax.f32 %v1281_v55, %v1282_v0  ;;  %v1244_v18 = vrot.slane %v1243_v6, 1  ;;  %v1262_v19 = vmax.f32 %v1260_v2, %v1261_v9  ;;  %v1075_v20 = vcombine.high %v777_v3, %v777_v3 }
 0x106   : > { %v1296_v21 = vrot.slane %v1295_v10, 4  ;;  %v2098_v23 = vmax.f32 %v1238_v4, 0.0  ;;  %v2477_v24 = vunpack.c.l.b16 %v2221_v5  ;;  %v1290_v25 = vmax.f32 %v1288_v63, %v1289_v7 }
 0x107   : > { %v1255_v26 = vmax.f32 %v1253_v1, %v1254_v8  ;;  %v1251_v27 = vrot.slane %v1250_v11, 1  ;;  %v2224_v28 = vpack.c.bf16 %v2096_v12, %v2096_v12  ;;  %v2479_v29 = vunpack.c.l.b16 %v2223_v13 }
 0x108   : > { %v7984_v30 = vor.u32 %v3012_v14, %v7947_v44  ;;  %v2225_v40 = vpack.c.bf16 %v2097_v15, %v2097_v15  ;;  %v2606_v31 = vsel %vm10545_vm1, %v2478_v16, %v2477_v24  ;;  %v1284_v32 = vrot.slane %v1283_v17, 2 }
 0x109   : > { %v769_v33 = vadd.f32 %v7960_v46, %v768_v22  ;;  %v1245_v34 = vmax.f32 %v1243_v6, %v1244_v18  ;;  %v1263_v35 = vrot.slane %v1262_v19, 2  ;;  %v1297_v36 = vmax.f32 %v1295_v10, %v1296_v21  ;;  %v781_v10 = vpop.f32.mrf.mxu0 }
 0x10a   : > { %v1302_v37 = vsel %vm1196_vm0, %v1075_v20, -inf  ;;  %v7989_v39 = vpack.c.bf16 %v2098_v23, %v2098_v23  ;;  %v1291_v47 = vrot.slane %v1290_v25, 2  ;;  %v1256_v48 = vrot.slane %v1255_v26, 2 }
 0x10b   : > { %v1073_v49 = vcombine.high %v769_v33, %v769_v33  ;;  %v1252_v50 = vmax.f32 %v1250_v11, %v1251_v27  ;;  %v2480_v51 = vunpack.c.l.b16 %v2224_v28  ;;  %v2608_v52 = vsel %vm10547_vm2, %v2479_v29, %v2606_v31  ;;  %v7247_v27 = vpop.f32.mrf.mxu0 }
 0x10c   : > { %v1267_v53 = vsel %vm1196_vm0, %v769_v33, -inf  ;;  %v1285_v54 = vmax.f32 %v1283_v17, %v1284_v32  ;;  %v1303_v55 = vrot.slane %v1302_v37, 4  ;;  %v790_v57 = vadd.f32 %v7246_v38, %v7960_v46 }
 0x10d   : > { %v1268_v56 = vrot.slane %v1267_v53, 4  ;;  %v2481_v58 = vunpack.c.l.b16 %v2225_v40  ;;  %v1264_v59 = vmax.f32 %v1262_v19, %v1263_v35  ;;  %v1298_v60 = vrot.slane %v1297_v36, 2 }
 0x10e   : > { %v1274_v61 = vsel %vm1196_vm0, %v1073_v49, -inf  ;;  %v2099_v62 = vmax.f32 %v1245_v34, 0.0  ;;  %v1292_v63 = vmax.f32 %v1290_v25, %v1291_v47  ;;  %v1257_v0 = vmax.f32 %v1255_v26, %v1256_v48 }
 0x10f   : > { %v1269_v1 = vmax.f32 %v1267_v53, %v1268_v56  ;;  %v2482_v2 = vunpack.c.l.b16 %v7989_v39  ;;  %v2100_v3 = vmax.f32 %v1252_v50, 0.0  ;;  %v2610_v4 = vsel %vm10549_vm3, %v2480_v51, %v2608_v52 }
 0x110   : > { %v1275_v5 = vrot.slane %v1274_v61, 4  ;;  %v1286_v6 = vrot.slane %v1285_v54, 1  ;;  %v1304_v7 = vmax.f32 %v1302_v37, %v1303_v55  ;;  %v1078_v9 = vcombine.high %v790_v57, %v790_v57 }
 0x111   : > { %v1270_v8 = vrot.slane %v1269_v1, 2  ;;  %v1265_v11 = vrot.slane %v1264_v59, 1  ;;  %v1299_v12 = vmax.f32 %v1297_v36, %v1298_v60  ;;  %v1337_v14 = vsel %vm1196_vm0, %v790_v57, -inf }
 0x112   : > { %v1276_v13 = vmax.f32 %v1274_v61, %v1275_v5  ;;  %v1293_v15 = vrot.slane %v1292_v63, 1  ;;  %v1258_v16 = vrot.slane %v1257_v0, 1  ;;  %v1338_v18 = vrot.slane %v1337_v14, 4 }
 0x113   : > { %v1271_v17 = vmax.f32 %v1269_v1, %v1270_v8  ;;  %v2227_v19 = vpack.c.bf16 %v2099_v62, %v2099_v62  ;;  %v7998_v20 = vpack.c.bf16 %v2100_v3, %v2100_v3  ;;  %v782_v22 = vadd.f32 %v7960_v46, %v781_v10 }
 0x114   : > { %v1277_v21 = vrot.slane %v1276_v13, 2  ;;  %v2612_v23 = vsel %vm2611_vm4, %v2481_v58, %v2610_v4  ;;  %v1305_v24 = vrot.slane %v1304_v7, 2  ;;  %v1344_v26 = vsel %vm1196_vm0, %v1078_v9, -inf  ;;  %v784_v4 = vpop.f32.mrf.mxu0 }
 0x115   : > { %v1272_v25 = vrot.slane %v1271_v17, 1  ;;  %v1266_v28 = vmax.f32 %v1264_v59, %v1265_v11  ;;  %v1300_v29 = vrot.slane %v1299_v12, 1  ;;  %v1076_v31 = vcombine.high %v782_v22, %v782_v22 }
 0x116   : > { %v1278_v40 = vmax.f32 %v1276_v13, %v1277_v21  ;;  %v1287_v32 = vmax.f32 %v1285_v54, %v1286_v6  ;;  %v1294_v33 = vmax.f32 %v1292_v63, %v1293_v15  ;;  %v1259_v34 = vmax.f32 %v1257_v0, %v1258_v16 }
 0x117   : > { %v1339_v35 = vmax.f32 %v1337_v14, %v1338_v18  ;;  %v1345_v36 = vrot.slane %v1344_v26, 4  ;;  %v1309_v37 = vsel %vm1196_vm0, %v782_v22, -inf  ;;  %v1316_v38 = vsel %vm1196_vm0, %v1076_v31, -inf }
 0x118   : > { %v793_v39 = vadd.f32 %v7247_v27, %v7960_v46  ;;  %v2483_v47 = vunpack.c.l.b16 %v2227_v19  ;;  %v1306_v48 = vmax.f32 %v1304_v7, %v1305_v24  ;;  %v1273_v49 = vmax.f32 %v1271_v17, %v1272_v25 }
 0x119   : > { %v1317_v50 = vrot.slane %v1316_v38, 4  ;;  %v2614_v51 = vsel %vm2613_vm5, %v2482_v2, %v2612_v23  ;;  %v2102_v52 = vmax.f32 %v1266_v28, 0.0  ;;  %v1301_v53 = vmax.f32 %v1299_v12, %v1300_v29 }
 0x11a   : > { %v1279_v54 = vrot.slane %v1278_v40, 1  ;;  %v2105_v55 = vmax.f32 %v1287_v32, 0.0  ;;  %v2106_v56 = vmax.f32 %v1294_v33, 0.0  ;;  %v1310_v57 = vrot.slane %v1309_v37, 4 }
 0x11b   : > { %v1079_v58 = vcombine.high %v793_v39, %v793_v39  ;;  %v2101_v59 = vmax.f32 %v1259_v34, 0.0  ;;  %v1340_v60 = vrot.slane %v1339_v35, 2  ;;  %v1346_v61 = vmax.f32 %v1344_v26, %v1345_v36 }
 0x11c   : > { %v1351_v62 = vsel %vm1196_vm0, %v793_v39, -inf  ;;  %v2484_v63 = vunpack.c.l.b16 %v7998_v20  ;;  %v1307_v0 = vrot.slane %v1306_v48, 1  ;;  %v2103_v1 = vmax.f32 %v1273_v49, 0.0  ;;  %v7250_v20 = vpop.f32.mrf.mxu0 }
 0x11d   : > { %v1318_v3 = vmax.f32 %v1316_v38, %v1317_v50  ;;  %v2616_v2 = vsel %vm10551_vm6, %v2483_v47, %v2614_v51  ;;  %v2230_v5 = vpack.c.bf16 %v2102_v52, %v2102_v52  ;;  %v2107_v6 = vmax.f32 %v1301_v53, 0.0 }
 0x11e   : > { %v1280_v7 = vmax.f32 %v1278_v40, %v1279_v54  ;;  %v8010_v8 = vpack.c.bf16 %v2105_v55, %v2105_v55  ;;  %v1311_v9 = vmax.f32 %v1309_v37, %v1310_v57  ;;  %v1352_v10 = vrot.slane %v1351_v62, 4  ;;  %v797_v37 = vpop.f32.mrf.mxu0 }
 0x11f   : > { %v1358_v11 = vsel %vm1196_vm0, %v1079_v58, -inf  ;;  %v8013_v12 = vpack.c.bf16 %v2106_v56, %v2106_v56  ;;  %v2229_v13 = vpack.c.bf16 %v2101_v59, %v2101_v59  ;;  %v1341_v14 = vmax.f32 %v1339_v35, %v1340_v60 }
 0x120   : > { %v1347_v15 = vrot.slane %v1346_v61, 2  ;;  %v8015_v16 = vmax.f32 %v1306_v48, %v1307_v0  ;;  %v2231_v17 = vpack.c.bf16 %v2103_v1, %v2103_v1  ;;  %v1319_v18 = vrot.slane %v1318_v3, 2 }
 0x121   : > { %v785_v19 = vadd.f32 %v7960_v46, %v784_v4  ;;  %v2486_v21 = vunpack.c.l.b16 %v2230_v5  ;;  %v8018_v22 = vpack.c.bf16 %v2107_v6, %v2107_v6  ;;  %v2104_v23 = vmax.f32 %v1280_v7, 0.0 }
 0x122   : > { %v1359_v24 = vrot.slane %v1358_v11, 4  ;;  %v8021_v25 = vsel %vm10550_vm7, %v2484_v63, %v2616_v2  ;;  %v2489_v26 = vunpack.c.l.b16 %v8010_v8  ;;  %v1312_v27 = vrot.slane %v1311_v9, 2 }
 0x123   : > { %v1353_v28 = vmax.f32 %v1351_v62, %v1352_v10  ;;  %v2490_v29 = vunpack.c.l.b16 %v8013_v12  ;;  %v2485_v40 = vunpack.c.l.b16 %v2229_v13  ;;  %v1342_v31 = vrot.slane %v1341_v14, 1 }
 0x124   : > { %v1348_v32 = vmax.f32 %v1346_v61, %v1347_v15  ;;  %v2108_v33 = vmax.f32 %v8015_v16, 0.0  ;;  %v2487_v34 = vunpack.c.l.b16 %v2231_v17  ;;  %v1320_v35 = vmax.f32 %v1318_v3, %v1319_v18  ;;  %v7251_v61 = vpop.f32.mrf.mxu0 }
 0x125   : > { %v1077_v36 = vcombine.high %v785_v19, %v785_v19  ;;  %v2619_v38 = vsel %vm10545_vm1, %v2486_v21, %v2485_v40  ;;  %v2491_v39 = vunpack.c.l.b16 %v8018_v22  ;;  %v2232_v47 = vpack.c.bf16 %v2104_v23, %v2104_v23 }
 0x126   : > { %v1360_v48 = vmax.f32 %v1358_v11, %v1359_v24  ;;  %v1313_v49 = vmax.f32 %v1311_v9, %v1312_v27  ;;  %v1354_v50 = vrot.slane %v1353_v28, 2  ;;  %v1323_v51 = vsel %vm1196_vm0, %v785_v19, -inf }
 0x127   : > { %v1330_v52 = vsel %vm1196_vm0, %v1077_v36, -inf  ;;  %v8030_v53 = vmax.f32 %v1341_v14, %v1342_v31  ;;  %v1349_v54 = vrot.slane %v1348_v32, 1  ;;  %v1324_v55 = vrot.slane %v1323_v51, 4 }
 0x128   : > { %v1331_v56 = vrot.slane %v1330_v52, 4  ;;  %v2620_v57 = vsel %vm10547_vm2, %v2487_v34, %v2619_v38  ;;  %v1321_v58 = vrot.slane %v1320_v35, 1  ;;  %v806_v59 = vadd.f32 %v7250_v20, %v7960_v46 }
 0x129   : > { %v798_v60 = vadd.f32 %v7960_v46, %v797_v37  ;;  %v2488_v62 = vunpack.c.l.b16 %v2232_v47  ;;  %v1361_v63 = vrot.slane %v1360_v48, 2  ;;  %v1325_v0 = vmax.f32 %v1323_v51, %v1324_v55 }
 0x12a   : > { %v1332_v1 = vmax.f32 %v1330_v52, %v1331_v56  ;;  %v1314_v3 = vrot.slane %v1313_v49, 1  ;;  %v1355_v4 = vmax.f32 %v1353_v28, %v1354_v50  ;;  %v1082_v2 = vcombine.high %v806_v59, %v806_v59 }
 0x12b   : > { %v1080_v5 = vcombine.high %v798_v60, %v798_v60  ;;  %v1326_v6 = vrot.slane %v1325_v0, 2  ;;  %v1393_v8 = vsel %vm1196_vm0, %v806_v59, -inf  ;;  %v809_v9 = vadd.f32 %v7251_v61, %v7960_v46 }
 0x12c   : > { %v1333_v7 = vrot.slane %v1332_v1, 2  ;;  %v1322_v10 = vmax.f32 %v1320_v35, %v1321_v58  ;;  %v1400_v11 = vsel %vm1196_vm0, %v1082_v2, -inf  ;;  %v1365_v13 = vsel %vm1196_vm0, %v798_v60, -inf }
 0x12d   : > { %v1372_v14 = vsel %vm1196_vm0, %v1080_v5, -inf  ;;  %v2621_v15 = vsel %vm10549_vm3, %v2488_v62, %v2620_v57  ;;  %v1362_v16 = vmax.f32 %v1360_v48, %v1361_v63  ;;  %v1327_v17 = vmax.f32 %v1325_v0, %v1326_v6  ;;  %v800_v63 = vpop.f32.mrf.mxu0 }
 0x12e   : > { %v1334_v18 = vmax.f32 %v1332_v1, %v1333_v7  ;;  %v1315_v19 = vmax.f32 %v1313_v49, %v1314_v3  ;;  %v1394_v20 = vrot.slane %v1393_v8, 4  ;;  %v1401_v21 = vrot.slane %v1400_v11, 4 }
 0x12f   : > { %v1373_v23 = vrot.slane %v1372_v14, 4  ;;  %v1328_v24 = vrot.slane %v1327_v17, 1  ;;  %v1366_v28 = vrot.slane %v1365_v13, 4  ;;  %v1407_v40 = vsel %vm1196_vm0, %v809_v9, -inf }
 0x130   : > { %v1335_v27 = vrot.slane %v1334_v18, 1  ;;  %v2622_v31 = vsel %vm2611_vm4, %v2489_v26, %v2621_v15  ;;  %v1350_v34 = vmax.f32 %v1348_v32, %v1349_v54  ;;  %v2110_v35 = vmax.f32 %v1322_v10, 0.0 }
 0x131   : > { %v1356_v36 = vrot.slane %v1355_v4, 1  ;;  %v1363_v37 = vrot.slane %v1362_v16, 1  ;;  %v1374_v38 = vmax.f32 %v1372_v14, %v1373_v23  ;;  %v1083_v47 = vcombine.high %v809_v9, %v809_v9  ;;  %v7254_v14 = vpop.f32.mrf.mxu0 }
 0x132   : > { %v1408_v48 = vrot.slane %v1407_v40, 4  ;;  %v2236_v50 = vpack.c.bf16 %v2108_v33, %v2108_v33  ;;  %v1329_v51 = vmax.f32 %v1327_v17, %v1328_v24  ;;  %v1395_v49 = vmax.f32 %v1393_v8, %v1394_v20 }
 0x133   : > { %v1402_v52 = vmax.f32 %v1400_v11, %v1401_v21  ;;  %v2113_v55 = vmax.f32 %v8030_v53, 0.0  ;;  %v2109_v56 = vmax.f32 %v1315_v19, 0.0  ;;  %v1336_v57 = vmax.f32 %v1334_v18, %v1335_v27 }
 0x134   : > { %v1367_v58 = vmax.f32 %v1365_v13, %v1366_v28  ;;  %v2623_v26 = vsel %vm2613_vm5, %v2490_v29, %v2622_v31  ;;  %v2114_v32 = vmax.f32 %v1350_v34, 0.0  ;;  %v2238_v54 = vpack.c.bf16 %v2110_v35, %v2110_v35  ;;  %v813_v35 = vpop.f32.mrf.mxu0 }
 0x135   : > { %v1357_v59 = vmax.f32 %v1355_v4, %v1356_v36  ;;  %v1364_v60 = vmax.f32 %v1362_v16, %v1363_v37  ;;  %v1375_v61 = vrot.slane %v1374_v38, 2  ;;  %v1409_v62 = vmax.f32 %v1407_v40, %v1408_v48 }
 0x136   : > { %v1414_v33 = vsel %vm1196_vm0, %v1083_v47, -inf  ;;  %v2492_v0 = vunpack.c.l.b16 %v2236_v50  ;;  %v2111_v1 = vmax.f32 %v1329_v51, 0.0  ;;  %v1396_v3 = vrot.slane %v1395_v49, 2 }
 0x137   : > { %v1403_v53 = vrot.slane %v1402_v52, 2  ;;  %v8048_v2 = vpack.c.bf16 %v2113_v55, %v2113_v55  ;;  %v2237_v5 = vpack.c.bf16 %v2109_v56, %v2109_v56  ;;  %v2112_v6 = vmax.f32 %v1336_v57, 0.0 }
 0x138   : > { %v1368_v12 = vrot.slane %v1367_v58, 2  ;;  %v2624_v29 = vsel %vm10551_vm6, %v2491_v39, %v2623_v26  ;;  %v8053_v4 = vpack.c.bf16 %v2114_v32, %v2114_v32  ;;  %v2115_v7 = vmax.f32 %v1357_v59, 0.0 }
 0x139   : > { %v1415_v8 = vrot.slane %v1414_v33, 4  ;;  %v2494_v9 = vunpack.c.l.b16 %v2238_v54  ;;  %v2116_v10 = vmax.f32 %v1364_v60, 0.0  ;;  %v1376_v11 = vmax.f32 %v1374_v38, %v1375_v61 }
 0x13a   : > { %v1410_v13 = vrot.slane %v1409_v62, 2  ;;  %v2239_v15 = vpack.c.bf16 %v2111_v1, %v2111_v1  ;;  %v1397_v16 = vmax.f32 %v1395_v49, %v1396_v3  ;;  %v1404_v17 = vmax.f32 %v1402_v52, %v1403_v53 }
 0x13b   : > { %v801_v18 = vadd.f32 %v7960_v46, %v800_v63  ;;  %v2497_v19 = vunpack.c.l.b16 %v8048_v2  ;;  %v2493_v20 = vunpack.c.l.b16 %v2237_v5  ;;  %v2240_v22 = vpack.c.bf16 %v2112_v6, %v2112_v6 }
 0x13c   : > { %v1369_v21 = vmax.f32 %v1367_v58, %v1368_v12  ;;  %v8058_v39 = vsel %vm10550_vm7, %v2492_v0, %v2624_v29  ;;  %v2498_v23 = vunpack.c.l.b16 %v8053_v4  ;;  %v8061_v24 = vpack.c.bf16 %v2115_v7, %v2115_v7 }
 0x13d   : > { %v1416_v27 = vmax.f32 %v1414_v33, %v1415_v8  ;;  %v2626_v28 = vsel %vm10545_vm1, %v2494_v9, %v2493_v20  ;;  %v8064_v40 = vpack.c.bf16 %v2116_v10, %v2116_v10  ;;  %v1377_v31 = vrot.slane %v1376_v11, 1  ;;  %v7255_v9 = vpop.f32.mrf.mxu0 }
 0x13e   : > { %v1411_v34 = vmax.f32 %v1409_v62, %v1410_v13  ;;  %v2495_v36 = vunpack.c.l.b16 %v2239_v15  ;;  %v1398_v37 = vrot.slane %v1397_v16, 1  ;;  %v1405_v38 = vrot.slane %v1404_v17, 1 }
 0x13f   : > { %v1081_v47 = vcombine.high %v801_v18, %v801_v18  ;;  %v2496_v48 = vunpack.c.l.b16 %v2240_v22  ;;  %v1370_v50 = vrot.slane %v1369_v21, 1  ;;  %v1379_v51 = vsel %vm1196_vm0, %v801_v18, -inf }
 0x140   : > { %v822_v49 = vadd.f32 %v7254_v14, %v7960_v46  ;;  %v1417_v52 = vrot.slane %v1416_v27, 2  ;;  %v1380_v55 = vrot.slane %v1379_v51, 4  ;;  %v814_v57 = vadd.f32 %v7960_v46, %v813_v35 }
 0x141   : > { %v1386_v56 = vsel %vm1196_vm0, %v1081_v47, -inf  ;;  %v1378_v58 = vmax.f32 %v1376_v11, %v1377_v31  ;;  %v1412_v26 = vrot.slane %v1411_v34, 1  ;;  %v2627_v59 = vsel %vm10547_vm2, %v2495_v36, %v2626_v28 }
 0x142   : > { %v1387_v32 = vrot.slane %v1386_v56, 4  ;;  %v1086_v54 = vcombine.high %v822_v49, %v822_v49  ;;  %v1381_v60 = vmax.f32 %v1379_v51, %v1380_v55  ;;  %v1449_v61 = vsel %vm1196_vm0, %v822_v49, -inf }
 0x143   : > { %v1084_v62 = vcombine.high %v814_v57, %v814_v57  ;;  %v1450_v63 = vrot.slane %v1449_v61, 4  ;;  %v1421_v1 = vsel %vm1196_vm0, %v814_v57, -inf  ;;  %v1418_v3 = vmax.f32 %v1416_v27, %v1417_v52  ;;  %v816_v52 = vpop.f32.mrf.mxu0 }
 0x144   : > { %v1388_v33 = vmax.f32 %v1386_v56, %v1387_v32  ;;  %v1456_v0 = vsel %vm1196_vm0, %v1086_v54, -inf  ;;  %v1382_v53 = vrot.slane %v1381_v60, 2  ;;  %v1399_v12 = vmax.f32 %v1397_v16, %v1398_v37 }
 0x145   : > { %v1457_v5 = vrot.slane %v1456_v0, 4  ;;  %v1428_v6 = vsel %vm1196_vm0, %v1084_v62, -inf  ;;  %v1406_v29 = vmax.f32 %v1404_v17, %v1405_v38  ;;  %v1371_v10 = vmax.f32 %v1369_v21, %v1370_v50 }
 0x146   : > { %v1389_v7 = vrot.slane %v1388_v33, 2  ;;  %v1429_v8 = vrot.slane %v1428_v6, 4  ;;  %v1383_v11 = vmax.f32 %v1381_v60, %v1382_v53  ;;  %v1451_v13 = vmax.f32 %v1449_v61, %v1450_v63  ;;  %v7258_v63 = vpop.f32.mrf.mxu0 }
 0x147   : > { %v1422_v14 = vrot.slane %v1421_v1, 4  ;;  %v2628_v15 = vsel %vm10549_vm3, %v2496_v48, %v2627_v59  ;;  %v2118_v18 = vmax.f32 %v1378_v58, 0.0  ;;  %v1458_v22 = vmax.f32 %v1456_v0, %v1457_v5 }
 0x148   : > { %v1390_v20 = vmax.f32 %v1388_v33, %v1389_v7  ;;  %v1413_v28 = vmax.f32 %v1411_v34, %v1412_v26  ;;  %v1419_v27 = vrot.slane %v1418_v3, 1  ;;  %v1384_v31 = vrot.slane %v1383_v11, 1 }
 0x149   : > { %v825_v35 = vadd.f32 %v7255_v9, %v7960_v46  ;;  %v2499_v16 = vunpack.c.l.b16 %v8061_v24  ;;  %v2121_v17 = vmax.f32 %v1399_v12, 0.0  ;;  %v1430_v37 = vmax.f32 %v1428_v6, %v1429_v8 }
 0x14a   : > { %v1391_v36 = vrot.slane %v1390_v20, 1  ;;  %v2629_v21 = vsel %vm2611_vm4, %v2497_v19, %v2628_v15  ;;  %v2117_v38 = vmax.f32 %v1371_v10, 0.0  ;;  %v1452_v47 = vrot.slane %v1451_v13, 2 }
 0x14b   : > { %v1423_v48 = vmax.f32 %v1421_v1, %v1422_v14  ;;  %v2500_v50 = vunpack.c.l.b16 %v8064_v40  ;;  %v2122_v51 = vmax.f32 %v1406_v29, 0.0  ;;  %v1385_v34 = vmax.f32 %v1383_v11, %v1384_v31  ;;  %v829_v14 = vpop.f32.mrf.mxu0 }
 0x14c   : > { %v1459_v49 = vrot.slane %v1458_v22, 2  ;;  %v2246_v55 = vpack.c.bf16 %v2118_v18, %v2118_v18  ;;  %v1420_v56 = vmax.f32 %v1418_v3, %v1419_v27  ;;  %v2123_v57 = vmax.f32 %v1413_v28, 0.0 }
 0x14d   : > { %v1463_v24 = vsel %vm1196_vm0, %v825_v35, -inf  ;;  %v2630_v2 = vsel %vm2613_vm5, %v2498_v23, %v2629_v21  ;;  %v1392_v58 = vmax.f32 %v1390_v20, %v1391_v36  ;;  %v1431_v19 = vrot.slane %v1430_v37, 2 }
 0x14e   : > { %v1087_v26 = vcombine.high %v825_v35, %v825_v35  ;;  %v8086_v32 = vpack.c.bf16 %v2121_v17, %v2121_v17  ;;  %v2245_v54 = vpack.c.bf16 %v2117_v38, %v2117_v38  ;;  %v1453_v40 = vmax.f32 %v1451_v13, %v1452_v47 }
 0x14f   : > { %v1424_v59 = vrot.slane %v1423_v48, 2  ;;  %v8088_v60 = vpack.c.bf16 %v2122_v51, %v2122_v51  ;;  %v2119_v61 = vmax.f32 %v1385_v34, 0.0  ;;  %v1460_v62 = vmax.f32 %v1458_v22, %v1459_v49 }
 0x150   : > { %v1464_v33 = vrot.slane %v1463_v24, 4  ;;  %v2631_v0 = vsel %vm10551_vm6, %v2499_v16, %v2630_v2  ;;  %v2502_v1 = vunpack.c.l.b16 %v2246_v55  ;;  %v2124_v4 = vmax.f32 %v1420_v56, 0.0 }
 0x151   : > { %v8091_v3 = vpack.c.bf16 %v2123_v57, %v2123_v57  ;;  %v2120_v23 = vmax.f32 %v1392_v58, 0.0  ;;  %v1432_v53 = vmax.f32 %v1430_v37, %v1431_v19  ;;  %v1470_v5 = vsel %vm1196_vm0, %v1087_v26, -inf }
 0x152   : > { %v817_v6 = vadd.f32 %v7960_v46, %v816_v52  ;;  %v2505_v12 = vunpack.c.l.b16 %v8086_v32  ;;  %v2501_v29 = vunpack.c.l.b16 %v2245_v54  ;;  %v1454_v7 = vrot.slane %v1453_v40, 1 }
 0x153   : > { %v1425_v8 = vmax.f32 %v1423_v48, %v1424_v59  ;;  %v2506_v9 = vunpack.c.l.b16 %v8088_v60  ;;  %v2247_v10 = vpack.c.bf16 %v2119_v61, %v2119_v61  ;;  %v1461_v11 = vrot.slane %v1460_v62, 1 }
 0x154   : > { %v1465_v13 = vmax.f32 %v1463_v24, %v1464_v33  ;;  %v8098_v15 = vsel %vm10550_vm7, %v2500_v50, %v2631_v0  ;;  %v2633_v18 = vsel %vm10545_vm1, %v2502_v1, %v2501_v29  ;;  %v8101_v20 = vpack.c.bf16 %v2124_v4, %v2124_v4  ;;  %v7259_v50 = vpop.f32.mrf.mxu0 }
 0x155   : > { %v1471_v22 = vrot.slane %v1470_v5, 4  ;;  %v2507_v28 = vunpack.c.l.b16 %v8091_v3  ;;  %v2248_v27 = vpack.c.bf16 %v2120_v23, %v2120_v23  ;;  %v1433_v31 = vrot.slane %v1432_v53, 1 }
 0x156   : > { %v1085_v35 = vcombine.high %v817_v6, %v817_v6  ;;  %v1455_v16 = vmax.f32 %v1453_v40, %v1454_v7  ;;  %v1426_v17 = vrot.slane %v1425_v8, 1  ;;  %v1435_v36 = vsel %vm1196_vm0, %v817_v6, -inf }
 0x157   : > { %v838_v37 = vadd.f32 %v7258_v63, %v7960_v46  ;;  %v2503_v21 = vunpack.c.l.b16 %v2247_v10  ;;  %v1462_v38 = vmax.f32 %v1460_v62, %v1461_v11  ;;  %v1466_v47 = vrot.slane %v1465_v13, 2 }
 0x158   : > { %v1436_v48 = vrot.slane %v1435_v36, 4  ;;  %v1472_v51 = vmax.f32 %v1470_v5, %v1471_v22  ;;  %v1442_v34 = vsel %vm1196_vm0, %v1085_v35, -inf  ;;  %v2504_v55 = vunpack.c.l.b16 %v2248_v27 }
 0x159   : > { %v1090_v49 = vcombine.high %v838_v37, %v838_v37  ;;  %v1505_v52 = vsel %vm1196_vm0, %v838_v37, -inf  ;;  %v1434_v56 = vmax.f32 %v1432_v53, %v1433_v31  ;;  %v1443_v24 = vrot.slane %v1442_v34, 4 }
 0x15a   : > { %v1437_v57 = vmax.f32 %v1435_v36, %v1436_v48  ;;  %v1506_v2 = vrot.slane %v1505_v52, 4  ;;  %v830_v19 = vadd.f32 %v7960_v46, %v829_v14  ;;  %v841_v26 = vadd.f32 %v7259_v50, %v7960_v46 }
 0x15b   : > { %v1512_v58 = vsel %vm1196_vm0, %v1090_v49, -inf  ;;  %v2634_v54 = vsel %vm10547_vm2, %v2503_v21, %v2633_v18  ;;  %v1444_v59 = vmax.f32 %v1442_v34, %v1443_v24  ;;  %v1427_v62 = vmax.f32 %v1425_v8, %v1426_v17 }
 0x15c   : > { %v1438_v40 = vrot.slane %v1437_v57, 2  ;;  %v1513_v61 = vrot.slane %v1512_v58, 4  ;;  %v1467_v33 = vmax.f32 %v1465_v13, %v1466_v47  ;;  %v1088_v63 = vcombine.high %v830_v19, %v830_v19 }
 0x15d   : > { %v1477_v0 = vsel %vm1196_vm0, %v830_v19, -inf  ;;  %v2126_v1 = vmax.f32 %v1434_v56, 0.0  ;;  %v1473_v4 = vrot.slane %v1472_v51, 2  ;;  %v1445_v53 = vrot.slane %v1444_v59, 2 }
 0x15e   : > { %v1439_v23 = vmax.f32 %v1437_v57, %v1438_v40  ;;  %v2635_v5 = vsel %vm10549_vm3, %v2504_v55, %v2634_v54  ;;  %v1507_v6 = vmax.f32 %v1505_v52, %v1506_v2  ;;  %v1484_v29 = vsel %vm1196_vm0, %v1088_v63, -inf }
 0x15f   : > { %v1091_v46 = vcombine.high %v841_v26, %v841_v26  ;;  %v1446_v10 = vmax.f32 %v1444_v59, %v1445_v53  ;;  %v1514_v11 = vmax.f32 %v1512_v58, %v1513_v61  ;;  %v1478_v14 = vrot.slane %v1477_v0, 4  ;;  %v832_v59 = vpop.f32.mrf.mxu0 }
 0x160   : > { %v1440_v7 = vrot.slane %v1439_v23, 1  ;;  %v2129_v18 = vmax.f32 %v1455_v16, 0.0  ;;  %v2130_v8 = vmax.f32 %v1462_v38, 0.0  ;;  %v1468_v13 = vrot.slane %v1467_v33, 1 }
 0x161   : > { %v1485_v22 = vrot.slane %v1484_v29, 4  ;;  %v2125_v27 = vmax.f32 %v1427_v62, 0.0  ;;  %v1447_v35 = vrot.slane %v1446_v10, 1  ;;  %v1519_v17 = vsel %vm1196_vm0, %v841_v26, -inf }
 0x162   : > { %v1441_v31 = vmax.f32 %v1439_v23, %v1440_v7  ;;  %v2636_v36 = vsel %vm2611_vm4, %v2505_v12, %v2635_v5  ;;  %v1474_v37 = vmax.f32 %v1472_v51, %v1473_v4  ;;  %v1508_v21 = vrot.slane %v1507_v6, 2 }
 0x163   : > { %v1486_v47 = vmax.f32 %v1484_v29, %v1485_v22  ;;  %v2254_v48 = vpack.c.bf16 %v2126_v1, %v2126_v1  ;;  %v1515_v50 = vrot.slane %v1514_v11, 2  ;;  %v1479_v34 = vmax.f32 %v1477_v0, %v1478_v14 }
 0x164   : > { %v1526_v16 = vsel %vm1196_vm0, %v1091_v46, -inf  ;;  %v8120_v38 = vpack.c.bf16 %v2129_v18, %v2129_v18  ;;  %v1469_v49 = vmax.f32 %v1467_v33, %v1468_v13  ;;  %v1448_v52 = vmax.f32 %v1446_v10, %v1447_v35  ;;  %v7262_v46 = vpop.f32.mrf.mxu0 }
 0x165   : > { %v1520_v55 = vrot.slane %v1519_v17, 4  ;;  %v2637_v56 = vsel %vm2613_vm5, %v2506_v9, %v2636_v36  ;;  %v8125_v32 = vpack.c.bf16 %v2130_v8, %v2130_v8  ;;  %v2253_v12 = vpack.c.bf16 %v2125_v27, %v2125_v27 }
 0x166   : > { %v2127_v51 = vmax.f32 %v1441_v31, 0.0  ;;  %v1475_v57 = vrot.slane %v1474_v37, 1  ;;  %v1509_v24 = vmax.f32 %v1507_v6, %v1508_v21  ;;  %v1487_v2 = vrot.slane %v1486_v47, 2  ;;  %v8143_v6 = vld [vmem:[%s10503_s2] ss:$0 sm:$0xff] }
 0x167   : > { %v1527_v58 = vrot.slane %v1526_v16, 4  ;;  %v2508_v19 = vunpack.c.l.b16 %v8101_v20  ;;  %v2510_v26 = vunpack.c.l.b16 %v2254_v48  ;;  %v1516_v54 = vmax.f32 %v1514_v11, %v1515_v50 }
 0x168   : > { %v1480_v40 = vrot.slane %v1479_v34, 2  ;;  %v2638_v60 = vsel %vm10551_vm6, %v2507_v28, %v2637_v56  ;;  %v2131_v61 = vmax.f32 %v1469_v49, 0.0  ;;  %v2128_v9 = vmax.f32 %v1448_v52, 0.0 }
 0x169   : > { %v1521_v62 = vmax.f32 %v1519_v17, %v1520_v55  ;;  %v2513_v33 = vunpack.c.l.b16 %v8120_v38  ;;  %v2514_v63 = vunpack.c.l.b16 %v8125_v32  ;;  %v2509_v0 = vunpack.c.l.b16 %v2253_v12 }
 0x16a   : > { %v2255_v1 = vpack.c.bf16 %v2127_v51, %v2127_v51  ;;  %v8133_v4 = vmax.f32 %v1474_v37, %v1475_v57  ;;  %v1510_v20 = vrot.slane %v1509_v24, 1  ;;  %v1488_v23 = vmax.f32 %v1486_v47, %v1487_v2  ;;  %v845_v47 = vpop.f32.mrf.mxu0 }
 0x16b   : > { %v8135_v53 = vmax.f32 %v1526_v16, %v1527_v58  ;;  %v8138_v5 = vsel %vm10550_vm7, %v2508_v19, %v2638_v60  ;;  %v1517_v3 = vrot.slane %v1516_v54, 1  ;;  %v1481_v28 = vmax.f32 %v1479_v34, %v1480_v40 }
 0x16c   : > { %v833_v29 = vadd.f32 %v8143_v6, %v832_v59  ;;  %v2640_v7 = vsel %vm10545_vm1, %v2510_v26, %v2509_v0  ;;  %v8147_v10 = vpack.c.bf16 %v2131_v61, %v2131_v61  ;;  %v2256_v11 = vpack.c.bf16 %v2128_v9, %v2128_v9  ;;  %v7263_v60 = vpop.f32.mrf.mxu0 }
 0x16d   : > { %v1522_v14 = vrot.slane %v1521_v62, 2  ;;  %v2511_v18 = vunpack.c.l.b16 %v2255_v1  ;;  %v2132_v22 = vmax.f32 %v8133_v4, 0.0  ;;  %v8151_v27 = vmax.f32 %v1509_v24, %v1510_v20 }
 0x16e   : > { %v1089_v8 = vcombine.high %v833_v29, %v833_v29  ;;  %v1491_v13 = vsel %vm1196_vm0, %v833_v29, -inf  ;;  %v1489_v31 = vrot.slane %v1488_v23, 1  ;;  %v1529_v35 = vrot.slane %v8135_v53, 2 }
 0x16f   : > { %v8154_v17 = vmax.f32 %v1516_v54, %v1517_v3  ;;  %v1482_v36 = vrot.slane %v1481_v28, 1  ;;  %v1492_v37 = vrot.slane %v1491_v13, 4  ;;  %v2512_v48 = vunpack.c.l.b16 %v2256_v11 }
 0x170   : > { %v1498_v21 = vsel %vm1196_vm0, %v1089_v8, -inf  ;;  %v1523_v50 = vmax.f32 %v1521_v62, %v1522_v14  ;;  %v3215_v16 = vsel %vm3010_vm8, %v7947_v44, %v7984_v30  ;;  %v2641_v49 = vsel %vm10547_vm2, %v2511_v18, %v2640_v7 }
 0x171   : > { %v1499_v34 = vrot.slane %v1498_v21, 4  ;;  %v1493_v52 = vmax.f32 %v1491_v13, %v1492_v37  ;;  %3216 = vrot.lane.b32.xlu0 %v3215_v16, %s7795_s12  ;;  %v854_v55 = vadd.f32 %v8143_v6, %v7262_v46  ;;  %v8165_v56 = vpack.c.b16 %v8058_v39, %v8021_v25 }
 0x172   : > { %v1490_v12 = vmax.f32 %v1488_v23, %v1489_v31  ;;  %v846_v57 = vadd.f32 %v8143_v6, %v845_v47  ;;  %v2515_v20 = vunpack.c.l.b16 %v8147_v10  ;;  %v857_v29 = vadd.f32 %v8143_v6, %v7263_v60 }
 0x173   : > { %v1500_v51 = vmax.f32 %v1498_v21, %v1499_v34  ;;  %v1494_v24 = vrot.slane %v1493_v52, 2  ;;  %v1094_v2 = vcombine.high %v854_v55, %v854_v55  ;;  %v1561_v58 = vsel %vm1196_vm0, %v854_v55, -inf }
 0x174   : > { %v2814_v19 = vrot.slane %v8165_v56, 1  ;;  %v1562_v54 = vrot.slane %v1561_v58, 4  ;;  %v1092_v40 = vcombine.high %v846_v57, %v846_v57  ;;  %v1533_v59 = vsel %vm1196_vm0, %v846_v57, -inf }
 0x175   : > { %v1501_v26 = vrot.slane %v1500_v51, 2  ;;  %v1495_v61 = vmax.f32 %v1493_v52, %v1494_v24  ;;  %v1568_v25 = vsel %vm1196_vm0, %v1094_v2, -inf  ;;  %v1534_v9 = vrot.slane %v1533_v59, 4 }
 0x176   : > { %v2815_v39 = vsel %vm2811_vm9, %v7931_v41, %v2814_v19  ;;  %v1563_v0 = vmax.f32 %v1561_v58, %v1562_v54  ;;  %v1569_v1 = vrot.slane %v1568_v25, 4  ;;  %v1540_v4 = vsel %vm1196_vm0, %v1092_v40, -inf }
 0x177   : > { %v1502_v62 = vmax.f32 %v1500_v51, %v1501_v26  ;;  %2830 = vrot.lane.b32.xlu1 %v2815_v39, %s7790_s22  ;;  %v1496_v23 = vrot.slane %v1495_v61, 1  ;;  %v1535_v3 = vmax.f32 %v1533_v59, %v1534_v9  ;;  %v2642_v46 = vsel %vm10549_vm3, %v2512_v48, %v2641_v49 }
 0x178   : > { %v1483_v7 = vmax.f32 %v1481_v28, %v1482_v36  ;;  %v1524_v11 = vrot.slane %v1523_v50, 1  ;;  %v1530_v14 = vmax.f32 %v8135_v53, %v1529_v35  ;;  %v2137_v18 = vmax.f32 %v8151_v27, 0.0 }
 0x179   : > { %v1503_v8 = vrot.slane %v1502_v62, 1  ;;  %v1570_v13 = vmax.f32 %v1568_v25, %v1569_v1  ;;  %v1541_v31 = vrot.slane %v1540_v4, 4  ;;  %v2260_v37 = vpack.c.bf16 %v2132_v22, %v2132_v22 }
 0x17a   : > { %v2138_v21 = vmax.f32 %v8154_v17, 0.0  ;;  %v2134_v47 = vmax.f32 %v1490_v12, 0.0  ;;  %v1564_v10 = vrot.slane %v1563_v0, 2  ;;  %v2643_v34 = vsel %vm2611_vm4, %v2513_v33, %v2642_v46 }
 0x17b   : > { %v1497_v16 = vmax.f32 %v1495_v61, %v1496_v23  ;;  %v1536_v48 = vrot.slane %v1535_v3, 2  ;;  %v1575_v28 = vsel %vm1196_vm0, %v857_v29, -inf  ;;  %v2133_v36 = vmax.f32 %v1483_v7, 0.0 }
 0x17c   : > { %v1525_v53 = vmax.f32 %v1523_v50, %v1524_v11  ;;  %v1531_v35 = vrot.slane %v1530_v14, 1  ;;  %v1095_v27 = vcombine.high %v857_v29, %v857_v29  ;;  %v8188_v49 = vpack.c.bf16 %v2137_v18, %v2137_v18 }
 0x17d   : > { %v1504_v52 = vmax.f32 %v1502_v62, %v1503_v8  ;;  %v1571_v22 = vrot.slane %v1570_v13, 2  ;;  %v1542_v55 = vmax.f32 %v1540_v4, %v1541_v31  ;;  %v2644_v17 = vsel %vm2613_vm5, %v2514_v63, %v2643_v34  ;;  %v848_v63 = vpop.f32.mrf.mxu0 }
 0x17e   : > { %v2262_v38 = vpack.c.bf16 %v2134_v47, %v2134_v47  ;;  %v1565_v12 = vmax.f32 %v1563_v0, %v1564_v10  ;;  %v1576_v33 = vrot.slane %v1575_v28, 4  ;;  %v2516_v51 = vunpack.c.l.b16 %v2260_v37 }
 0x17f   : > { %v8193_v57 = vpack.c.bf16 %v2138_v21, %v2138_v21  ;;  %v2135_v24 = vmax.f32 %v1497_v16, 0.0  ;;  %v1537_v2 = vmax.f32 %v1535_v3, %v1536_v48  ;;  %v2261_v50 = vpack.c.bf16 %v2133_v36, %v2133_v36 }
 0x180   : > { %v8195_v58 = vmax.f32 %v1530_v14, %v1531_v35  ;;  %v2139_v26 = vmax.f32 %v1525_v53, 0.0  ;;  %v1582_v54 = vsel %vm1196_vm0, %v1095_v27, -inf  ;;  %v2645_v40 = vsel %vm10551_vm6, %v2515_v20, %v2644_v17  ;;  %v7266_v14 = vpop.f32.mrf.mxu0 }
 0x181   : > { %v2136_v59 = vmax.f32 %v1504_v52, 0.0  ;;  %v1572_v32 = vmax.f32 %v1570_v13, %v1571_v22  ;;  %v1543_v60 = vrot.slane %v1542_v55, 2  ;;  %v2521_v61 = vunpack.c.l.b16 %v8188_v49 }
 0x182   : > { %v2518_v25 = vunpack.c.l.b16 %v2262_v38  ;;  %v1566_v39 = vrot.slane %v1565_v12, 1  ;;  %v1577_v9 = vmax.f32 %v1575_v28, %v1576_v33  ;;  %v2522_v62 = vunpack.c.l.b16 %v8193_v57 }
 0x183   : > { %v2263_v0 = vpack.c.bf16 %v2135_v24, %v2135_v24  ;;  %v1538_v1 = vrot.slane %v1537_v2, 1  ;;  %v1583_v4 = vrot.slane %v1582_v54, 4  ;;  %v8202_v23 = vsel %vm10550_vm7, %v2516_v51, %v2645_v40 }
 0x184   : > { %v2517_v3 = vunpack.c.l.b16 %v2261_v50  ;;  %v2140_v20 = vmax.f32 %v8195_v58, 0.0  ;;  %v8205_v29 = vpack.c.bf16 %v2139_v26, %v2139_v26  ;;  %v2264_v46 = vpack.c.bf16 %v2136_v59, %v2136_v59 }
 0x185   : > { %v1573_v7 = vrot.slane %v1572_v32, 1  ;;  %v1544_v11 = vmax.f32 %v1542_v55, %v1543_v60  ;;  %v8208_v8 = vmax.f32 %v1565_v12, %v1566_v39  ;;  %v1578_v13 = vrot.slane %v1577_v9, 2 }
 0x186   : > { %v2647_v18 = vsel %vm10545_vm1, %v2518_v25, %v2517_v3  ;;  %v2898_v31 = vrot.slane %v8165_v56, 2  ;;  %v2519_v37 = vunpack.c.l.b16 %v2263_v0  ;;  %v8211_v21 = vmax.f32 %v1537_v2, %v1538_v1  ;;  %v861_v25 = vpop.f32.mrf.mxu0 }
 0x187   : > { %v1584_v47 = vmax.f32 %v1582_v54, %v1583_v4  ;;  %v8214_v10 = vshll.u32 %v8165_v56, 16  ;;  %v849_v16 = vadd.f32 %v8143_v6, %v848_v63  ;;  %v870_v48 = vadd.f32 %v8143_v6, %v7266_v14 }
 0x188   : > { %v2899_v34 = vsel %vm2895_vm10, %v7936_v42, %v2898_v31  ;;  %v2520_v28 = vunpack.c.l.b16 %v2264_v46  ;;  %v8222_v36 = vmax.f32 %v1572_v32, %v1573_v7  ;;  %v1545_v53 = vrot.slane %v1544_v11, 1 }
 0x189   : > { %2914 = vrot.lane.b32.xlu1 %v2899_v34, %s7791_s23  ;;  %v2744_v35 = vrot.slane %v8214_v10, 1  ;;  %v1579_v27 = vmax.f32 %v1577_v9, %v1578_v13  ;;  %v1093_v52 = vcombine.high %v849_v16, %v849_v16  ;;  %v1547_v22 = vsel %vm1196_vm0, %v849_v16, -inf }
 0x18a   : > { %v1098_v55 = vcombine.high %v870_v48, %v870_v48  ;;  %v1585_v17 = vrot.slane %v1584_v47, 2  ;;  %v1548_v12 = vrot.slane %v1547_v22, 4  ;;  %v1617_v33 = vsel %vm1196_vm0, %v870_v48, -inf }
 0x18b   : > { %v2745_v38 = vsel %vm10548_vm11, %v7931_v41, %v2744_v35  ;;  %v1554_v24 = vsel %vm1196_vm0, %v1093_v52, -inf  ;;  %v1618_v2 = vrot.slane %v1617_v33, 4  ;;  %v2980_v40 = vrot.slane %v8165_v56, 3 }
 0x18c   : > { %v7573_v51 = vpack.i.bf16 %v2745_v38, %v7931_v41  ;;  %v1549_v50 = vmax.f32 %v1547_v22, %v1548_v12  ;;  %v1555_v26 = vrot.slane %v1554_v24, 4  ;;  %v1624_v54 = vsel %vm1196_vm0, %v1098_v55, -inf  ;;  %v7267_v22 = vpop.f32.mrf.mxu0 }
 0x18d   : > { %v2648_v59 = vsel %vm10547_vm2, %v2519_v37, %v2647_v18  ;;  %v1546_v32 = vmax.f32 %v1544_v11, %v1545_v53  ;;  %v1625_v60 = vrot.slane %v1624_v54, 4  ;;  %v8239_v63 = vshrl.u32 %v8165_v56, 16 }
 0x18e   : > { %7574 = vrot.lane.b32.xlu0 %v7573_v51, %s7796_s13  ;;  %v1550_v39 = vrot.slane %v1549_v50, 2  ;;  %v1556_v9 = vmax.f32 %v1554_v24, %v1555_v26  ;;  %v1619_v0 = vmax.f32 %v1617_v33, %v1618_v2  ;;  %v2981_v1 = vsel %vm2977_vm12, %v7947_v44, %v2980_v40 }
 0x18f   : > { %10556 = vst [vmem:[#allocation6_spill] sm:$0xff] %v8239_v63  ;;  %v1580_v4 = vrot.slane %v1579_v27, 1  ;;  %v1586_v3 = vmax.f32 %v1584_v47, %v1585_v17  ;;  %2996 = vrot.lane.b32.xlu1 %v2981_v1, %s7793_s25  ;;  %v2849_v46 = vrot.slane %v8239_v63, 1  ;;  %v2850_v7 = vrot.slane %v8214_v10, 2 }
 0x190   : > { %v1551_v11 = vmax.f32 %v1549_v50, %v1550_v39  ;;  %v1557_v14 = vrot.slane %v1556_v9, 2  ;;  %v862_v18 = vadd.f32 %v8143_v6, %v861_v25  ;;  %v2649_v13 = vsel %vm10549_vm3, %v2520_v28, %v2648_v59 }
 0x191   : > { %v2145_v37 = vmax.f32 %v8208_v8, 0.0  ;;  %v1626_v34 = vmax.f32 %v1624_v54, %v1625_v60  ;;  %v8251_v16 = vor.u32 %v2850_v7, %v2849_v46  ;;  %v1620_v53 = vrot.slane %v1619_v0, 2 }
 0x192   : > { %v1552_v48 = vrot.slane %v1551_v11, 1  ;;  %v1558_v47 = vmax.f32 %v1556_v9, %v1557_v14  ;;  %v1096_v52 = vcombine.high %v862_v18, %v862_v18  ;;  %v2268_v55 = vpack.c.bf16 %v2140_v20, %v2140_v20 }
 0x193   : > { %v2141_v17 = vmax.f32 %v8211_v21, 0.0  ;;  %v2142_v38 = vmax.f32 %v1546_v32, 0.0  ;;  %v2852_v28 = vsel %vm10544_vm13, %v7940_v43, %v8251_v16  ;;  %v2650_v8 = vsel %vm2611_vm4, %v2521_v61, %v2649_v13 }
 0x194   : > { %v2146_v12 = vmax.f32 %v8222_v36, 0.0  ;;  %v1581_v33 = vmax.f32 %v1579_v27, %v1580_v4  ;;  %v1587_v51 = vrot.slane %v1586_v3, 1  ;;  %2881 = vrot.lane.b32.xlu0 %v2852_v28, %s7792_s24  ;;  %v1627_v58 = vrot.slane %v1626_v34, 2 }
 0x195   : > { %v1589_v20 = vsel %vm1196_vm0, %v862_v18, -inf  ;;  %v1596_v21 = vsel %vm1196_vm0, %v1096_v52, -inf  ;;  %v873_v24 = vadd.f32 %v8143_v6, %v7267_v22  ;;  %v8268_v2 = vpack.c.bf16 %v2145_v37, %v2145_v37 }
 0x196   : > { %v1553_v50 = vmax.f32 %v1551_v11, %v1552_v48  ;;  %v1559_v26 = vrot.slane %v1558_v47, 1  ;;  %v1621_v49 = vmax.f32 %v1619_v0, %v1620_v53  ;;  %v2523_v61 = vunpack.c.l.b16 %v8205_v29 }
 0x197   : > { %v2524_v54 = vunpack.c.l.b16 %v2268_v55  ;;  %v2269_v36 = vpack.c.bf16 %v2141_v17, %v2141_v17  ;;  %v2270_v27 = vpack.c.bf16 %v2142_v38, %v2142_v38  ;;  %v2651_v59 = vsel %vm2613_vm5, %v2522_v62, %v2650_v8 }
 0x198   : > { %v2147_v32 = vmax.f32 %v1581_v33, 0.0  ;;  %v1590_v60 = vrot.slane %v1589_v20, 4  ;;  %v1597_v25 = vrot.slane %v1596_v21, 4  ;;  %v8274_v39 = vpack.c.bf16 %v2146_v12, %v2146_v12 }
 0x199   : > { %v1588_v9 = vmax.f32 %v1586_v3, %v1587_v51  ;;  %v1628_v1 = vmax.f32 %v1626_v34, %v1627_v58  ;;  %v1099_v4 = vcombine.high %v873_v24, %v873_v24  ;;  %v2529_v46 = vunpack.c.l.b16 %v8268_v2  ;;  %v864_v3 = vpop.f32.mrf.mxu0 }
 0x19a   : > { %v1560_v0 = vmax.f32 %v1558_v47, %v1559_v26  ;;  %v2143_v7 = vmax.f32 %v1553_v50, 0.0  ;;  %v1622_v29 = vrot.slane %v1621_v49, 1  ;;  %v2652_v11 = vsel %vm10551_vm6, %v2523_v61, %v2651_v59 }
 0x19b   : > { %v2525_v14 = vunpack.c.l.b16 %v2269_v36  ;;  %v2526_v18 = vunpack.c.l.b16 %v2270_v27  ;;  %v10514_v57 = vrot.slane %v8239_v63, 3  ;;  %v8279_v62 = vpack.c.bf16 %v2147_v32, %v2147_v32 }
 0x19c   : > { %v1591_v13 = vmax.f32 %v1589_v20, %v1590_v60  ;;  %v1598_v37 = vmax.f32 %v1596_v21, %v1597_v25  ;;  %v1631_v48 = vsel %vm1196_vm0, %v873_v24, -inf  ;;  %v2148_v34 = vmax.f32 %v1588_v9, 0.0  ;;  %v7270_v24 = vpop.f32.mrf.mxu0 }
 0x19d   : > { %v1629_v53 = vrot.slane %v1628_v1, 1  ;;  %v1638_v52 = vsel %vm1196_vm0, %v1099_v4, -inf  ;;  %v3016_v47 = vrot.slane %v8214_v10, 4  ;;  %v8285_v22 = vsel %vm10550_vm7, %v2524_v54, %v2652_v11 }
 0x19e   : > { %v2144_v55 = vmax.f32 %v1560_v0, 0.0  ;;  %v2271_v17 = vpack.c.bf16 %v2143_v7, %v2143_v7  ;;  %v8287_v38 = vmax.f32 %v1621_v49, %v1622_v29  ;;  %v2530_v28 = vunpack.c.l.b16 %v8274_v39  ;;  %v877_v7 = vpop.f32.mrf.mxu0 }
 0x19f   : > { %v2654_v8 = vsel %vm10545_vm1, %v2526_v18, %v2525_v14  ;;  %v1632_v12 = vrot.slane %v1631_v48, 4  ;;  %v8293_v33 = vor.u32 %v3016_v47, %v10514_v57  ;;  %v1592_v51 = vrot.slane %v1591_v13, 2 }
 0x1a0   : > { %v1599_v58 = vrot.slane %v1598_v37, 2  ;;  %v1639_v20 = vrot.slane %v1638_v52, 4  ;;  %v2933_v21 = vrot.slane %v8239_v63, 2  ;;  %v8296_v50 = vpack.c.bf16 %v2148_v34, %v2148_v34 }
 0x1a1   : > { %v2531_v26 = vunpack.c.l.b16 %v8279_v62  ;;  %v8299_v49 = vmax.f32 %v1628_v1, %v1629_v53  ;;  %v3018_v61 = vsel %vm3010_vm8, %v7984_v30, %v8293_v33  ;;  %v2272_v54 = vpack.c.bf16 %v2144_v55, %v2144_v55 }
 0x1a2   : > { %v2527_v36 = vunpack.c.l.b16 %v2271_v17  ;;  %v2153_v27 = vmax.f32 %v8287_v38, 0.0  ;;  %3045 = vrot.lane.b32.xlu1 %v3018_v61, %s7795_s12  ;;  %v2934_v59 = vrot.slane %v8214_v10, 3  ;;  %v1633_v32 = vmax.f32 %v1631_v48, %v1632_v12  ;;  %v7271_v38 = vpop.f32.mrf.mxu0 }
 0x1a3   : > { %v865_v60 = vadd.f32 %v8143_v6, %v864_v3  ;;  %v886_v25 = vadd.f32 %v8143_v6, %v7270_v24  ;;  %v1593_v9 = vmax.f32 %v1591_v13, %v1592_v51  ;;  %v1600_v1 = vmax.f32 %v1598_v37, %v1599_v58 }
 0x1a4   : > { %v1640_v4 = vmax.f32 %v1638_v52, %v1639_v20  ;;  %v8309_v0 = vor.u32 %v2934_v59, %v2933_v21  ;;  %v8314_v18 = vpack.c.b16 %v8138_v5, %v8098_v15  ;;  %v2528_v48 = vunpack.c.l.b16 %v2272_v54 }
 0x1a5   : > { %v1097_v29 = vcombine.high %v865_v60, %v865_v60  ;;  %v1603_v11 = vsel %vm1196_vm0, %v865_v60, -inf  ;;  %v1102_v14 = vcombine.high %v886_v25, %v886_v25  ;;  %v2655_v34 = vsel %vm10547_vm2, %v2527_v36, %v2654_v8 }
 0x1a6   : > { %v2936_v13 = vsel %vm10546_vm14, %v7951_v45, %v8309_v0  ;;  %v1604_v37 = vrot.slane %v1603_v11, 4  ;;  %v1634_v3 = vrot.slane %v1633_v32, 2  ;;  %v1673_v52 = vsel %vm1196_vm0, %v886_v25, -inf }
 0x1a7   : > { %2963 = vrot.lane.b32.xlu0 %v2936_v13, %s7794_s26  ;;  %v1610_v53 = vsel %vm1196_vm0, %v1097_v29, -inf  ;;  %v1680_v47 = vsel %vm1196_vm0, %v1102_v14, -inf  ;;  %v1601_v55 = vrot.slane %v1600_v1, 1  ;;  %v1641_v15 = vrot.slane %v1640_v4, 2 }
 0x1a8   : > { %v1605_v5 = vmax.f32 %v1603_v11, %v1604_v37  ;;  %v1611_v17 = vrot.slane %v1610_v53, 4  ;;  %v1674_v8 = vrot.slane %v1673_v52, 4  ;;  %v1681_v12 = vrot.slane %v1680_v47, 4 }
 0x1a9   : > { %v2816_v51 = vrot.slane %v8314_v18, 1  ;;  %v878_v58 = vadd.f32 %v8143_v6, %v877_v7  ;;  %v2656_v20 = vsel %vm10549_vm3, %v2528_v48, %v2655_v34  ;;  %v1594_v21 = vrot.slane %v1593_v9, 1 }
 0x1aa   : > { %v1606_v24 = vrot.slane %v1605_v5, 2  ;;  %v1612_v61 = vmax.f32 %v1610_v53, %v1611_v17  ;;  %v1635_v54 = vmax.f32 %v1633_v32, %v1634_v3  ;;  %v889_v60 = vadd.f32 %v8143_v6, %v7271_v38 }
 0x1ab   : > { %v2817_v36 = vsel %vm2811_vm9, %v2814_v19, %v2816_v51  ;;  %v1100_v59 = vcombine.high %v878_v58, %v878_v58  ;;  %v1642_v25 = vmax.f32 %v1640_v4, %v1641_v15  ;;  %v1645_v7 = vsel %vm1196_vm0, %v878_v58, -inf }
 0x1ac   : > { %v1607_v29 = vmax.f32 %v1605_v5, %v1606_v24  ;;  %v1613_v11 = vrot.slane %v1612_v61, 2  ;;  %2832 = vrot.lane.b32.xlu0 %v2817_v36, %s7790_s22  ;;  %v1602_v14 = vmax.f32 %v1600_v1, %v1601_v55  ;;  %v1675_v48 = vmax.f32 %v1673_v52, %v1674_v8 }
 0x1ad   : > { %v1682_v34 = vmax.f32 %v1680_v47, %v1681_v12  ;;  %v1652_v32 = vsel %vm1196_vm0, %v1100_v59, -inf  ;;  %v2154_v13 = vmax.f32 %v8299_v49, 0.0  ;;  %v1646_v19 = vrot.slane %v1645_v7, 4 }
 0x1ae   : > { %v1608_v37 = vrot.slane %v1607_v29, 1  ;;  %v1614_v3 = vmax.f32 %v1612_v61, %v1613_v11  ;;  %v1595_v53 = vmax.f32 %v1593_v9, %v1594_v21  ;;  %v1636_v17 = vrot.slane %v1635_v54, 1 }
 0x1af   : > { %v1653_v38 = vrot.slane %v1652_v32, 4  ;;  %v1687_v4 = vsel %vm1196_vm0, %v889_v60, -inf  ;;  %v2657_v15 = vsel %vm2611_vm4, %v2529_v46, %v2656_v20  ;;  %v8341_v5 = vpack.c.bf16 %v2153_v27, %v2153_v27 }
 0x1b0   : > { %v1643_v1 = vrot.slane %v1642_v25, 1  ;;  %v1615_v52 = vrot.slane %v1614_v3, 1  ;;  %v2150_v47 = vmax.f32 %v1602_v14, 0.0  ;;  %v1676_v55 = vrot.slane %v1675_v48, 2 }
 0x1b1   : > { %v1683_v8 = vrot.slane %v1682_v34, 2  ;;  %v1103_v49 = vcombine.high %v889_v60, %v889_v60  ;;  %v2532_v12 = vunpack.c.l.b16 %v8296_v50  ;;  %v1609_v58 = vmax.f32 %v1607_v29, %v1608_v37 }
 0x1b2   : > { %v1647_v9 = vmax.f32 %v1645_v7, %v1646_v19  ;;  %v1688_v21 = vrot.slane %v1687_v4, 4  ;;  %v2658_v24 = vsel %vm2613_vm5, %v2530_v28, %v2657_v15  ;;  %v2149_v2 = vmax.f32 %v1595_v53, 0.0  ;;  %v880_v19 = vpop.f32.mrf.mxu0 }
 0x1b3   : > { %v1637_v61 = vmax.f32 %v1635_v54, %v1636_v17  ;;  %v1654_v46 = vmax.f32 %v1652_v32, %v1653_v38  ;;  %v8347_v27 = vpack.c.bf16 %v2154_v13, %v2154_v13  ;;  %v2537_v20 = vunpack.c.l.b16 %v8341_v5 }
 0x1b4   : > { %v1644_v36 = vmax.f32 %v1642_v25, %v1643_v1  ;;  %v1616_v59 = vmax.f32 %v1614_v3, %v1615_v52  ;;  %v2278_v11 = vpack.c.bf16 %v2150_v47, %v2150_v47  ;;  %v1677_v60 = vmax.f32 %v1675_v48, %v1676_v55 }
 0x1b5   : > { %v1684_v14 = vmax.f32 %v1682_v34, %v1683_v8  ;;  %v1694_v50 = vsel %vm1196_vm0, %v1103_v49, -inf  ;;  %v2659_v39 = vsel %vm10551_vm6, %v2531_v26, %v2658_v24  ;;  %v2151_v29 = vmax.f32 %v1609_v58, 0.0  ;;  %v7274_v24 = vpop.f32.mrf.mxu0 }
 0x1b6   : > { %v1648_v28 = vrot.slane %v1647_v9, 2  ;;  %v1689_v7 = vmax.f32 %v1687_v4, %v1688_v21  ;;  %v2277_v54 = vpack.c.bf16 %v2149_v2, %v2149_v2  ;;  %v2155_v32 = vmax.f32 %v1637_v61, 0.0 }
 0x1b7   : > { %v1655_v13 = vrot.slane %v1654_v46, 2  ;;  %v8355_v37 = vshll.u32 %v8314_v18, 16  ;;  %v2538_v25 = vunpack.c.l.b16 %v8347_v27  ;;  %v2156_v3 = vmax.f32 %v1644_v36, 0.0 }
 0x1b8   : > { %v2152_v48 = vmax.f32 %v1616_v59, 0.0  ;;  %v1695_v34 = vrot.slane %v1694_v50, 4  ;;  %v8359_v53 = vsel %vm10550_vm7, %v2532_v12, %v2659_v39  ;;  %v2534_v62 = vunpack.c.l.b16 %v2278_v11 }
 0x1b9   : > { %v1678_v26 = vrot.slane %v1677_v60, 1  ;;  %v1685_v17 = vrot.slane %v1684_v14, 1  ;;  %v2279_v38 = vpack.c.bf16 %v2151_v29, %v2151_v29  ;;  %v1649_v4 = vmax.f32 %v1647_v9, %v1648_v28 }
 0x1ba   : > { %v1690_v15 = vrot.slane %v1689_v7, 2  ;;  %v8362_v1 = vshrl.u32 %v8314_v18, 16  ;;  %v2533_v52 = vunpack.c.l.b16 %v2277_v54  ;;  %v8364_v47 = vpack.c.bf16 %v2155_v32, %v2155_v32 }
 0x1bb   : > { %v1656_v55 = vmax.f32 %v1654_v46, %v1655_v13  ;;  %v2854_v8 = vrot.slane %v8355_v37, 2  ;;  %v8367_v49 = vpack.c.bf16 %v2156_v3, %v2156_v3  ;;  %v2280_v58 = vpack.c.bf16 %v2152_v48, %v2152_v48  ;;  %v893_v13 = vpop.f32.mrf.mxu0 }
 0x1bc   : > { %10557 = vst [vmem:[#allocation7_spill] sm:$0xff] %v8362_v1  ;;  %v8369_v12 = vmax.f32 %v1694_v50, %v1695_v34  ;;  %v2853_v21 = vrot.slane %v8362_v1, 1  ;;  %v2661_v9 = vsel %vm10545_vm1, %v2534_v62, %v2533_v52  ;;  %v8373_v2 = vmax.f32 %v1677_v60, %v1678_v26 }
 0x1bd   : > { %v8375_v61 = vmax.f32 %v1684_v14, %v1685_v17  ;;  %v10518_v36 = vrot.slane %v8314_v18, 2  ;;  %v2535_v59 = vunpack.c.l.b16 %v2279_v38  ;;  %v1650_v46 = vrot.slane %v1649_v4, 1 }
 0x1be   : > { %v1691_v11 = vmax.f32 %v1689_v7, %v1690_v15  ;;  %v8378_v39 = vor.u32 %v2854_v8, %v2853_v21  ;;  %v1657_v29 = vrot.slane %v1656_v55, 1  ;;  %v881_v28 = vadd.f32 %v8143_v6, %v880_v19 }
 0x1bf   : > { %v2901_v50 = vsel %vm2895_vm10, %v2898_v31, %v10518_v36  ;;  %v902_v60 = vadd.f32 %v8143_v6, %v7274_v24  ;;  %v2536_v14 = vunpack.c.l.b16 %v2280_v58  ;;  %v1697_v54 = vrot.slane %v8369_v12, 2 }
 0x1c0   : > { %v2856_v7 = vsel %vm10544_vm13, %v8251_v16, %v8378_v39  ;;  %2916 = vrot.lane.b32.xlu0 %v2901_v50, %s7791_s23  ;;  %v2937_v32 = vrot.slane %v8362_v1, 2  ;;  %v1101_v3 = vcombine.high %v881_v28, %v881_v28  ;;  %v1659_v31 = vsel %vm1196_vm0, %v881_v28, -inf }
 0x1c1   : > { %2883 = vrot.lane.b32.xlu1 %v2856_v7, %s7792_s24  ;;  %v1106_v48 = vcombine.high %v902_v60, %v902_v60  ;;  %v1729_v34 = vsel %vm1196_vm0, %v902_v60, -inf  ;;  %v2662_v19 = vsel %vm10547_vm2, %v2535_v59, %v2661_v9  ;;  %v1660_v62 = vrot.slane %v1659_v31, 4  ;;  %v7275_v60 = vpop.f32.mrf.mxu0 }
 0x1c2   : > { %v1730_v26 = vrot.slane %v1729_v34, 4  ;;  %v2938_v17 = vrot.slane %v8355_v37, 3  ;;  %v1666_v16 = vsel %vm1196_vm0, %v1101_v3, -inf  ;;  %v10517_v15 = vrot.slane %v8314_v18, 3 }
 0x1c3   : > { %v1736_v38 = vsel %vm1196_vm0, %v1106_v48, -inf  ;;  %v894_v52 = vadd.f32 %v8143_v6, %v893_v13  ;;  %v1661_v8 = vmax.f32 %v1659_v31, %v1660_v62  ;;  %v1667_v58 = vrot.slane %v1666_v16, 4 }
 0x1c4   : > { %v1731_v21 = vmax.f32 %v1729_v34, %v1730_v26  ;;  %v1737_v24 = vrot.slane %v1736_v38, 4  ;;  %v8402_v50 = vor.u32 %v2938_v17, %v2937_v32  ;;  %v2983_v9 = vsel %vm2977_vm12, %v2980_v40, %v10517_v15 }
 0x1c5   : > { %v1104_v59 = vcombine.high %v894_v52, %v894_v52  ;;  %v1701_v28 = vsel %vm1196_vm0, %v894_v52, -inf  ;;  %v2663_v7 = vsel %vm10549_vm3, %v2536_v14, %v2662_v19  ;;  %v1662_v3 = vrot.slane %v1661_v8, 2  ;;  %2998 = vrot.lane.b32.xlu0 %v2983_v9, %s7793_s25 }
 0x1c6   : > { %v1668_v13 = vmax.f32 %v1666_v16, %v1667_v58  ;;  %v1738_v31 = vmax.f32 %v1736_v38, %v1737_v24  ;;  %v1651_v48 = vmax.f32 %v1649_v4, %v1650_v46  ;;  %v1692_v32 = vrot.slane %v1691_v11, 1 }
 0x1c7   : > { %v2940_v34 = vsel %vm10546_vm14, %v8309_v0, %v8402_v50  ;;  %v1702_v62 = vrot.slane %v1701_v28, 4  ;;  %v1658_v26 = vmax.f32 %v1656_v55, %v1657_v29  ;;  %v1732_v40 = vrot.slane %v1731_v21, 2 }
 0x1c8   : > { %2965 = vrot.lane.b32.xlu1 %v2940_v34, %s7794_s26  ;;  %v1708_v17 = vsel %vm1196_vm0, %v1104_v59, -inf  ;;  %v905_v14 = vadd.f32 %v8143_v6, %v7275_v60  ;;  %v2664_v19 = vsel %vm2611_vm4, %v2537_v20, %v2663_v7  ;;  %v1663_v16 = vmax.f32 %v1661_v8, %v1662_v3 }
 0x1c9   : > { %v1669_v4 = vrot.slane %v1668_v13, 2  ;;  %v1739_v46 = vrot.slane %v1738_v31, 2  ;;  %v2161_v38 = vmax.f32 %v8373_v2, 0.0  ;;  %v2162_v0 = vmax.f32 %v8375_v61, 0.0 }
 0x1ca   : > { %v1698_v55 = vmax.f32 %v8369_v12, %v1697_v54  ;;  %v1703_v29 = vmax.f32 %v1701_v28, %v1702_v62  ;;  %v2539_v52 = vunpack.c.l.b16 %v8364_v47  ;;  %v2157_v58 = vmax.f32 %v1651_v48, 0.0 }
 0x1cb   : > { %v1693_v24 = vmax.f32 %v1691_v11, %v1692_v32  ;;  %v1709_v9 = vrot.slane %v1708_v17, 4  ;;  %v2665_v5 = vsel %vm2613_vm5, %v2538_v25, %v2664_v19  ;;  %v2158_v20 = vmax.f32 %v1658_v26, 0.0 }
 0x1cc   : > { %v1733_v8 = vmax.f32 %v1731_v21, %v1732_v40  ;;  %v1743_v59 = vsel %vm1196_vm0, %v905_v14, -inf  ;;  %v1664_v60 = vrot.slane %v1663_v16, 1  ;;  %v1670_v2 = vmax.f32 %v1668_v13, %v1669_v4 }
 0x1cd   : > { %v1740_v7 = vmax.f32 %v1738_v31, %v1739_v46  ;;  %v1107_v61 = vcombine.high %v905_v14, %v905_v14  ;;  %v8429_v3 = vpack.c.bf16 %v2161_v38, %v2161_v38  ;;  %v8431_v12 = vpack.c.bf16 %v2162_v0, %v2162_v0 }
 0x1ce   : > { %v1699_v47 = vrot.slane %v1698_v55, 1  ;;  %v1704_v54 = vrot.slane %v1703_v29, 2  ;;  %v2285_v11 = vpack.c.bf16 %v2157_v58, %v2157_v58  ;;  %v2163_v28 = vmax.f32 %v1693_v24, 0.0 }
 0x1cf   : > { %v1710_v48 = vmax.f32 %v1708_v17, %v1709_v9  ;;  %v1744_v27 = vrot.slane %v1743_v59, 4  ;;  %v2540_v25 = vunpack.c.l.b16 %v8367_v49  ;;  %v2666_v21 = vsel %vm10551_vm6, %v2539_v52, %v2665_v5  ;;  %v896_v17 = vpop.f32.mrf.mxu0 }
 0x1d0   : > { %v2286_v32 = vpack.c.bf16 %v2158_v20, %v2158_v20  ;;  %v1734_v34 = vrot.slane %v1733_v8, 1  ;;  %v1665_v62 = vmax.f32 %v1663_v16, %v1664_v60  ;;  %v1671_v13 = vrot.slane %v1670_v2, 1 }
 0x1d1   : > { %v1741_v31 = vrot.slane %v1740_v7, 1  ;;  %v1750_v26 = vsel %vm1196_vm0, %v1107_v61, -inf  ;;  %v2545_v40 = vunpack.c.l.b16 %v8429_v3  ;;  %v2546_v14 = vunpack.c.l.b16 %v8431_v12 }
 0x1d2   : > { %v8438_v19 = vmax.f32 %v1698_v55, %v1699_v47  ;;  %v1705_v4 = vmax.f32 %v1703_v29, %v1704_v54  ;;  %v2541_v46 = vunpack.c.l.b16 %v2285_v11  ;;  %v8440_v38 = vpack.c.bf16 %v2163_v28, %v2163_v28  ;;  %v7278_v47 = vpop.f32.mrf.mxu0 }
 0x1d3   : > { %v1711_v49 = vrot.slane %v1710_v48, 2  ;;  %v1745_v0 = vmax.f32 %v1743_v59, %v1744_v27  ;;  %v8443_v52 = vsel %vm10550_vm7, %v2540_v25, %v2666_v21  ;;  %v2542_v16 = vunpack.c.l.b16 %v2286_v32 }
 0x1d4   : > { %v1751_v58 = vrot.slane %v1750_v26, 4  ;;  %v10513_v24 = vrot.slane %v8362_v1, 3  ;;  %v1672_v9 = vmax.f32 %v1670_v2, %v1671_v13  ;;  %v2159_v5 = vmax.f32 %v1665_v62, 0.0 }
 0x1d5   : > { %v8446_v20 = vmax.f32 %v1733_v8, %v1734_v34  ;;  %v8448_v55 = vmax.f32 %v1740_v7, %v1741_v31  ;;  %v1706_v29 = vrot.slane %v1705_v4, 1  ;;  %v3020_v60 = vrot.slane %v8355_v37, 4  ;;  %v909_v31 = vpop.f32.mrf.mxu0 }
 0x1d6   : > { %v2748_v59 = vor.u32 %v8239_v63, %v2744_v35  ;;  %v10516_v61 = vrot.slane %v8355_v37, 1  ;;  %v2164_v54 = vmax.f32 %v8438_v19, 0.0  ;;  %v1712_v2 = vmax.f32 %v1710_v48, %v1711_v49 }
 0x1d7   : > { %v1746_v28 = vrot.slane %v1745_v0, 2  ;;  %v2668_v8 = vsel %vm10545_vm1, %v2542_v16, %v2541_v46  ;;  %v1752_v7 = vmax.f32 %v1750_v26, %v1751_v58  ;;  %v8460_v27 = vor.u32 %v3020_v60, %v10513_v24 }
 0x1d8   : > { %v2753_v10 = vsel %vm10548_vm11, %v2748_v59, %v10516_v61  ;;  %v2160_v35 = vmax.f32 %v1672_v9, 0.0  ;;  %v2287_v25 = vpack.c.bf16 %v2159_v5, %v2159_v5  ;;  %v2169_v21 = vmax.f32 %v8446_v20, 0.0 }
 0x1d9   : > { %2798 = vrot.lane.b32.xlu0 %v2753_v10, %s7796_s13  ;;  %v897_v48 = vadd.f32 %v8143_v6, %v896_v17  ;;  %v2170_v32 = vmax.f32 %v8448_v55, 0.0  ;;  %v8469_v34 = vmax.f32 %v1705_v4, %v1706_v29  ;;  %v3022_v62 = vsel %vm3010_vm8, %v8293_v33, %v8460_v27 }
 0x1da   : > { %v918_v13 = vadd.f32 %v8143_v6, %v7278_v47  ;;  %v1713_v26 = vrot.slane %v1712_v2, 1  ;;  %v1747_v19 = vmax.f32 %v1745_v0, %v1746_v28  ;;  %3047 = vrot.lane.b32.xlu1 %v3022_v62, %s7795_s12  ;;  %v1753_v16 = vrot.slane %v1752_v7, 2  ;;  %v7279_v28 = vpop.f32.mrf.mxu0 }
 0x1db   : > { %v1105_v46 = vcombine.high %v897_v48, %v897_v48  ;;  %v1715_v49 = vsel %vm1196_vm0, %v897_v48, -inf  ;;  %v2288_v9 = vpack.c.bf16 %v2160_v35, %v2160_v35  ;;  %v2543_v5 = vunpack.c.l.b16 %v2287_v25 }
 0x1dc   : > { %v1716_v17 = vrot.slane %v1715_v49, 4  ;;  %v1110_v58 = vcombine.high %v918_v13, %v918_v13  ;;  %v1785_v4 = vsel %vm1196_vm0, %v918_v13, -inf  ;;  %v8481_v29 = vpack.c.b16 %v8285_v22, %v8202_v23 }
 0x1dd   : > { %v1722_v20 = vsel %vm1196_vm0, %v1105_v46, -inf  ;;  %v910_v47 = vadd.f32 %v8143_v6, %v909_v31  ;;  %v1714_v10 = vmax.f32 %v1712_v2, %v1713_v26  ;;  %v1786_v48 = vrot.slane %v1785_v4, 4  ;;  %v8495_v6 = vld [vmem:[%s10503_s2] ss:$0 sm:$0xff] }
 0x1de   : > { %10558 = vst [vmem:[#allocation8_spill] sm:$0xff] %v8481_v29  ;;  %v1717_v60 = vmax.f32 %v1715_v49, %v1716_v17  ;;  %v1723_v0 = vrot.slane %v1722_v20, 4  ;;  %v1792_v59 = vsel %vm1196_vm0, %v1110_v58, -inf  ;;  %v10515_v13 = vrot.slane %v8481_v29, 1 }
 0x1df   : > { %v1793_v62 = vrot.slane %v1792_v59, 4  ;;  %v1108_v24 = vcombine.high %v910_v47, %v910_v47  ;;  %v1757_v46 = vsel %vm1196_vm0, %v910_v47, -inf  ;;  %v2544_v57 = vunpack.c.l.b16 %v2288_v9 }
 0x1e0   : > { %v1718_v35 = vrot.slane %v1717_v60, 2  ;;  %v1724_v25 = vmax.f32 %v1722_v20, %v1723_v0  ;;  %v2819_v23 = vsel %vm2811_vm9, %v2816_v51, %v10515_v13  ;;  %v1758_v22 = vrot.slane %v1757_v46, 4 }
 0x1e1   : > { %v921_v2 = vadd.f32 %v8495_v6, %v7279_v28  ;;  %v2669_v31 = vsel %vm10547_vm2, %v2543_v5, %v2668_v8  ;;  %2834 = vrot.lane.b32.xlu0 %v2819_v23, %s7790_s22  ;;  %v1764_v17 = vsel %vm1196_vm0, %v1108_v24, -inf  ;;  %v1754_v58 = vmax.f32 %v1752_v7, %v1753_v16 }
 0x1e2   : > { %v1719_v26 = vmax.f32 %v1717_v60, %v1718_v35  ;;  %v1725_v49 = vrot.slane %v1724_v25, 2  ;;  %v1787_v9 = vmax.f32 %v1785_v4, %v1786_v48  ;;  %v1794_v20 = vmax.f32 %v1792_v59, %v1793_v62  ;;  %v912_v62 = vpop.f32.mrf.mxu0 }
 0x1e3   : > { %v1765_v51 = vrot.slane %v1764_v17, 4  ;;  %v2165_v0 = vmax.f32 %v8469_v34, 0.0  ;;  %v1759_v61 = vmax.f32 %v1757_v46, %v1758_v22  ;;  %v2292_v15 = vpack.c.bf16 %v2164_v54, %v2164_v54 }
 0x1e4   : > { %v1720_v47 = vrot.slane %v1719_v26, 1  ;;  %v1726_v13 = vmax.f32 %v1724_v25, %v1725_v49  ;;  %v2670_v28 = vsel %vm10549_vm3, %v2544_v57, %v2669_v31  ;;  %v1748_v36 = vrot.slane %v1747_v19, 1 }
 0x1e5   : > { %v1111_v8 = vcombine.high %v921_v2, %v921_v2  ;;  %v2166_v5 = vmax.f32 %v1714_v10, 0.0  ;;  %v1766_v23 = vmax.f32 %v1764_v17, %v1765_v51  ;;  %v8503_v11 = vpack.c.bf16 %v2169_v21, %v2169_v21  ;;  %v7282_v51 = vpop.f32.mrf.mxu0 }
 0x1e6   : > { %v1721_v60 = vmax.f32 %v1719_v26, %v1720_v47  ;;  %v1727_v35 = vrot.slane %v1726_v13, 1  ;;  %v1755_v24 = vrot.slane %v1754_v58, 1  ;;  %v1788_v7 = vrot.slane %v1787_v9, 2 }
 0x1e7   : > { %v1795_v16 = vrot.slane %v1794_v20, 2  ;;  %v2671_v34 = vsel %vm2611_vm4, %v2545_v40, %v2670_v28  ;;  %v8511_v54 = vpack.c.bf16 %v2170_v32, %v2170_v32  ;;  %v2293_v57 = vpack.c.bf16 %v2165_v0, %v2165_v0 }
 0x1e8   : > { %v1760_v4 = vrot.slane %v1759_v61, 2  ;;  %v1749_v59 = vmax.f32 %v1747_v19, %v1748_v36  ;;  %v1728_v10 = vmax.f32 %v1726_v13, %v1727_v35  ;;  %v1799_v48 = vsel %vm1196_vm0, %v921_v2, -inf }
 0x1e9   : > { %v1806_v21 = vsel %vm1196_vm0, %v1111_v8, -inf  ;;  %v2548_v25 = vunpack.c.l.b16 %v2292_v15  ;;  %v2294_v46 = vpack.c.bf16 %v2166_v5, %v2166_v5  ;;  %v2167_v22 = vmax.f32 %v1721_v60, 0.0 }
 0x1ea   : > { %v1767_v3 = vrot.slane %v1766_v23, 2  ;;  %v2672_v40 = vsel %vm2613_vm5, %v2546_v14, %v2671_v34  ;;  %v8518_v55 = vmax.f32 %v1754_v58, %v1755_v24  ;;  %v1789_v32 = vmax.f32 %v1787_v9, %v1788_v7  ;;  %v925_v34 = vpop.f32.mrf.mxu0 }
 0x1eb   : > { %v1796_v31 = vmax.f32 %v1794_v20, %v1795_v16  ;;  %v2553_v36 = vunpack.c.l.b16 %v8503_v11  ;;  %v1761_v19 = vmax.f32 %v1759_v61, %v1760_v4  ;;  %v1800_v13 = vrot.slane %v1799_v48, 4 }
 0x1ec   : > { %v1807_v2 = vrot.slane %v1806_v21, 4  ;;  %v2554_v26 = vunpack.c.l.b16 %v8511_v54  ;;  %v2549_v49 = vunpack.c.l.b16 %v2293_v57  ;;  %v2171_v15 = vmax.f32 %v1749_v59, 0.0 }
 0x1ed   : > { %v2168_v17 = vmax.f32 %v1728_v10, 0.0  ;;  %v10559_v0 = vunpack.c.l.b16 %v8440_v38  ;;  %v2550_v14 = vunpack.c.l.b16 %v2294_v46  ;;  %v2295_v58 = vpack.c.bf16 %v2167_v22, %v2167_v22 }
 0x1ee   : > { %v1768_v47 = vmax.f32 %v1766_v23, %v1767_v3  ;;  %v2172_v9 = vmax.f32 %v8518_v55, 0.0  ;;  %v1790_v20 = vrot.slane %v1789_v32, 1  ;;  %v1797_v28 = vrot.slane %v1796_v31, 1 }
 0x1ef   : > { %v2673_v12 = vsel %vm10551_vm6, %v10559_v0, %v2672_v40  ;;  %v2902_v61 = vrot.slane %v8481_v29, 2  ;;  %v1762_v8 = vrot.slane %v1761_v19, 1  ;;  %v1801_v5 = vmax.f32 %v1799_v48, %v1800_v13 }
 0x1f0   : > { %v1808_v60 = vmax.f32 %v1806_v21, %v1807_v2  ;;  %v913_v35 = vadd.f32 %v8495_v6, %v912_v62  ;;  %v8529_v24 = vsel %vm10550_vm7, %v2548_v25, %v2673_v12  ;;  %v8531_v38 = vpack.c.bf16 %v2171_v15, %v2171_v15  ;;  %v7283_v15 = vpop.f32.mrf.mxu0 }
 0x1f1   : > { %v2296_v7 = vpack.c.bf16 %v2168_v17, %v2168_v17  ;;  %v10560_v23 = vrot.slane %v8314_v18, 2  ;;  %v2675_v57 = vsel %vm10545_vm1, %v2550_v14, %v2549_v49  ;;  %v2551_v4 = vunpack.c.l.b16 %v2295_v58 }
 0x1f2   : > { %v1769_v59 = vrot.slane %v1768_v47, 1  ;;  %v1109_v10 = vcombine.high %v913_v35, %v913_v35  ;;  %v8540_v48 = vmax.f32 %v1789_v32, %v1790_v20  ;;  %v8542_v21 = vmax.f32 %v1796_v31, %v1797_v28 }
 0x1f3   : > { %v2903_v16 = vsel %vm2895_vm10, %v10560_v23, %v2902_v61  ;;  %v1771_v62 = vsel %vm1196_vm0, %v913_v35, -inf  ;;  %v934_v25 = vadd.f32 %v8495_v6, %v7282_v51  ;;  %v8546_v46 = vmax.f32 %v1761_v19, %v1762_v8 }
 0x1f4   : > { %2918 = vrot.lane.b32.xlu0 %v2903_v16, %s7791_s23  ;;  %v1802_v22 = vrot.slane %v1801_v5, 2  ;;  %v1809_v3 = vrot.slane %v1808_v60, 2  ;;  %v1772_v40 = vrot.slane %v1771_v62, 4  ;;  %v2552_v55 = vunpack.c.l.b16 %v2296_v7 }
 0x1f5   : > { %v1778_v13 = vsel %vm1196_vm0, %v1109_v10, -inf  ;;  %v1114_v2 = vcombine.high %v934_v25, %v934_v25  ;;  %v1841_v49 = vsel %vm1196_vm0, %v934_v25, -inf  ;;  %v2676_v32 = vsel %vm10547_vm2, %v2551_v4, %v2675_v57 }
 0x1f6   : > { %v1770_v31 = vmax.f32 %v1768_v47, %v1769_v59  ;;  %v1773_v17 = vmax.f32 %v1771_v62, %v1772_v40  ;;  %v1779_v0 = vrot.slane %v1778_v13, 4  ;;  %v1842_v12 = vrot.slane %v1841_v49, 4 }
 0x1f7   : > { %v1848_v51 = vsel %vm1196_vm0, %v1114_v2, -inf  ;;  %v10521_v19 = vrot.slane %v8481_v29, 3  ;;  %v926_v14 = vadd.f32 %v8495_v6, %v925_v34  ;;  %v937_v8 = vadd.f32 %v8495_v6, %v7283_v15 }
 0x1f8   : > { %v1774_v58 = vrot.slane %v1773_v17, 2  ;;  %v1780_v20 = vmax.f32 %v1778_v13, %v1779_v0  ;;  %v1849_v28 = vrot.slane %v1848_v51, 4  ;;  %v2677_v35 = vsel %vm10549_vm3, %v2552_v55, %v2676_v32 }
 0x1f9   : > { %v10561_v47 = vrot.slane %v8314_v18, 3  ;;  %v1112_v23 = vcombine.high %v926_v14, %v926_v14  ;;  %v1813_v16 = vsel %vm1196_vm0, %v926_v14, -inf  ;;  %v1843_v59 = vmax.f32 %v1841_v49, %v1842_v12 }
 0x1fa   : > { %v1775_v57 = vmax.f32 %v1773_v17, %v1774_v58  ;;  %v1781_v4 = vrot.slane %v1780_v20, 2  ;;  %v1850_v34 = vmax.f32 %v1848_v51, %v1849_v28  ;;  %v1814_v10 = vrot.slane %v1813_v16, 4 }
 0x1fb   : > { %v2985_v7 = vsel %vm2977_vm12, %v10561_v47, %v10521_v19  ;;  %v1820_v62 = vsel %vm1196_vm0, %v1112_v23, -inf  ;;  %v1115_v25 = vcombine.high %v937_v8, %v937_v8  ;;  %v1855_v40 = vsel %vm1196_vm0, %v937_v8, -inf }
 0x1fc   : > { %3000 = vrot.lane.b32.xlu0 %v2985_v7, %s7793_s25  ;;  %v1803_v55 = vmax.f32 %v1801_v5, %v1802_v22  ;;  %v1810_v13 = vmax.f32 %v1808_v60, %v1809_v3  ;;  %v1776_v2 = vrot.slane %v1775_v57, 1  ;;  %v1782_v15 = vmax.f32 %v1780_v20, %v1781_v4 }
 0x1fd   : > { %v2300_v32 = vpack.c.bf16 %v2172_v9, %v2172_v9  ;;  %v2177_v0 = vmax.f32 %v8540_v48, 0.0  ;;  %v1821_v14 = vrot.slane %v1820_v62, 4  ;;  %v1856_v17 = vrot.slane %v1855_v40, 4 }
 0x1fe   : > { %v2678_v49 = vsel %vm2611_vm4, %v2553_v36, %v2677_v35  ;;  %v2174_v12 = vmax.f32 %v1770_v31, 0.0  ;;  %v1844_v51 = vrot.slane %v1843_v59, 2  ;;  %v1862_v58 = vsel %vm1196_vm0, %v1115_v25, -inf }
 0x1ff   : > { %v1777_v28 = vmax.f32 %v1775_v57, %v1776_v2  ;;  %v1783_v47 = vrot.slane %v1782_v15, 1  ;;  %v1851_v8 = vrot.slane %v1850_v34, 2  ;;  %v1815_v5 = vmax.f32 %v1813_v16, %v1814_v10 }
 0x200   : > { %v2178_v60 = vmax.f32 %v8542_v21, 0.0  ;;  %v2173_v9 = vmax.f32 %v8546_v46, 0.0  ;;  %v1804_v22 = vrot.slane %v1803_v55, 1  ;;  %v1811_v48 = vrot.slane %v1810_v13, 1 }
 0x201   : > { %v2555_v3 = vunpack.c.l.b16 %v8531_v38  ;;  %v1822_v20 = vmax.f32 %v1820_v62, %v1821_v14  ;;  %v1857_v11 = vmax.f32 %v1855_v40, %v1856_v17  ;;  %v1863_v7 = vrot.slane %v1862_v58, 4 }
 0x202   : > { %v2679_v36 = vsel %vm2613_vm5, %v2554_v26, %v2678_v49  ;;  %v8576_v31 = vpack.c.bf16 %v2177_v0, %v2177_v0  ;;  %v2302_v35 = vpack.c.bf16 %v2174_v12, %v2174_v12  ;;  %v1845_v23 = vmax.f32 %v1843_v59, %v1844_v51  ;;  %v928_v12 = vpop.f32.mrf.mxu0 }
 0x203   : > { %v1784_v16 = vmax.f32 %v1782_v15, %v1783_v47  ;;  %v2175_v57 = vmax.f32 %v1777_v28, 0.0  ;;  %v1852_v21 = vmax.f32 %v1850_v34, %v1851_v8  ;;  %v1816_v4 = vrot.slane %v1815_v5, 2 }
 0x204   : > { %v8578_v46 = vpack.c.bf16 %v2178_v60, %v2178_v60  ;;  %v2301_v10 = vpack.c.bf16 %v2173_v9, %v2173_v9  ;;  %v8580_v25 = vmax.f32 %v1803_v55, %v1804_v22  ;;  %v8582_v38 = vmax.f32 %v1810_v13, %v1811_v48 }
 0x205   : > { %v2556_v62 = vunpack.c.l.b16 %v2300_v32  ;;  %v1823_v40 = vrot.slane %v1822_v20, 2  ;;  %v1858_v54 = vrot.slane %v1857_v11, 2  ;;  %v1864_v2 = vmax.f32 %v1862_v58, %v1863_v7 }
 0x206   : > { %v2680_v26 = vsel %vm10551_vm6, %v2555_v3, %v2679_v36  ;;  %v2561_v0 = vunpack.c.l.b16 %v8576_v31  ;;  %v2558_v59 = vunpack.c.l.b16 %v2302_v35  ;;  %v1846_v15 = vrot.slane %v1845_v23, 1  ;;  %v7286_v35 = vpop.f32.mrf.mxu0 }
 0x207   : > { %v2176_v14 = vmax.f32 %v1784_v16, 0.0  ;;  %v2303_v34 = vpack.c.bf16 %v2175_v57, %v2175_v57  ;;  %v1853_v17 = vrot.slane %v1852_v21, 1  ;;  %v1817_v49 = vmax.f32 %v1815_v5, %v1816_v4 }
 0x208   : > { %v2562_v55 = vunpack.c.l.b16 %v8578_v46  ;;  %v2557_v51 = vunpack.c.l.b16 %v2301_v10  ;;  %v2179_v13 = vmax.f32 %v8580_v25, 0.0  ;;  %v2180_v32 = vmax.f32 %v8582_v38, 0.0 }
 0x209   : > { %v8590_v58 = vsel %vm10550_vm7, %v2556_v62, %v2680_v26  ;;  %v1824_v28 = vmax.f32 %v1822_v20, %v1823_v40  ;;  %v8592_v47 = vmax.f32 %v1857_v11, %v1858_v54  ;;  %v1865_v8 = vrot.slane %v1864_v2, 2 }
 0x20a   : > { %v2682_v60 = vsel %vm10545_vm1, %v2558_v59, %v2557_v51  ;;  %v8595_v9 = vmax.f32 %v1845_v23, %v1846_v15  ;;  %v8598_v5 = vshll.u32 %v8481_v29, 16  ;;  %v929_v22 = vadd.f32 %v8495_v6, %v928_v12 }
 0x20b   : > { %v2304_v48 = vpack.c.bf16 %v2176_v14, %v2176_v14  ;;  %v2559_v3 = vunpack.c.l.b16 %v2303_v34  ;;  %v8601_v7 = vmax.f32 %v1852_v21, %v1853_v17  ;;  %v1818_v36 = vrot.slane %v1817_v49, 1  ;;  %v941_v14 = vpop.f32.mrf.mxu0 }
 0x20c   : > { %v10562_v20 = vrot.slane %v8355_v37, 1  ;;  %v10519_v16 = vrot.slane %v8598_v5, 1  ;;  %v1113_v57 = vcombine.high %v929_v22, %v929_v22  ;;  %v1827_v23 = vsel %vm1196_vm0, %v929_v22, -inf }
 0x20d   : > { %v1825_v4 = vrot.slane %v1824_v28, 1  ;;  %v1860_v10 = vrot.slane %v8592_v47, 1  ;;  %v8609_v25 = vmax.f32 %v1864_v2, %v1865_v8  ;;  %v1828_v62 = vrot.slane %v1827_v23, 4 }
 0x20e   : > { %v2756_v11 = vor.u32 %v8362_v1, %v10562_v20  ;;  %v1834_v40 = vsel %vm1196_vm0, %v1113_v57, -inf  ;;  %v950_v37 = vadd.f32 %v8495_v6, %v7286_v35  ;;  %v8618_v54 = vpack.c.b16 %v8443_v52, %v8359_v53 }
 0x20f   : > { %v2560_v26 = vunpack.c.l.b16 %v2304_v48  ;;  %v2683_v59 = vsel %vm10547_vm2, %v2559_v3, %v2682_v60  ;;  %v1829_v2 = vmax.f32 %v1827_v23, %v1828_v62  ;;  %v1835_v15 = vrot.slane %v1834_v40, 4 }
 0x210   : > { %v2761_v21 = vsel %vm10548_vm11, %v2756_v11, %v10519_v16  ;;  %10563 = vst [vmem:[#allocation9_spill] sm:$0xff] %v8618_v54  ;;  %v1118_v34 = vcombine.high %v950_v37, %v950_v37  ;;  %v1897_v17 = vsel %vm1196_vm0, %v950_v37, -inf  ;;  %v10520_v12 = vrot.slane %v8618_v54, 1 }
 0x211   : > { %2800 = vrot.lane.b32.xlu0 %v2761_v21, %s7796_s13  ;;  %v8625_v51 = vshrl.u32 %v8481_v29, 16  ;;  %v1830_v8 = vrot.slane %v1829_v2, 2  ;;  %v1836_v22 = vmax.f32 %v1834_v40, %v1835_v15  ;;  %v1898_v53 = vrot.slane %v1897_v17, 4 }
 0x212   : > { %v2858_v52 = vrot.slane %v8598_v5, 2  ;;  %v1904_v60 = vsel %vm1196_vm0, %v1118_v34, -inf  ;;  %v10564_v48 = vrot.slane %v8481_v29, 1  ;;  %v942_v20 = vadd.f32 %v8495_v6, %v941_v14 }
 0x213   : > { %v2857_v35 = vrot.slane %v8625_v51, 1  ;;  %v1831_v11 = vmax.f32 %v1829_v2, %v1830_v8  ;;  %v1837_v57 = vrot.slane %v1836_v22, 2  ;;  %v1899_v23 = vmax.f32 %v1897_v17, %v1898_v53  ;;  %v7287_v8 = vpop.f32.mrf.mxu0 }
 0x214   : > { %v2821_v3 = vsel %vm2811_vm9, %v10564_v48, %v10520_v12  ;;  %v1905_v62 = vrot.slane %v1904_v60, 4  ;;  %v1826_v21 = vmax.f32 %v1824_v28, %v1825_v4  ;;  %v1116_v37 = vcombine.high %v942_v20, %v942_v20 }
 0x215   : > { %2836 = vrot.lane.b32.xlu1 %v2821_v3, %s7790_s22  ;;  %v8637_v40 = vor.u32 %v2858_v52, %v2857_v35  ;;  %v1869_v15 = vsel %vm1196_vm0, %v942_v20, -inf  ;;  %v2307_v34 = vpack.c.bf16 %v2179_v13, %v2179_v13  ;;  %v2185_v16 = vmax.f32 %v8595_v9, 0.0 }
 0x216   : > { %v1819_v48 = vmax.f32 %v1817_v49, %v1818_v36  ;;  %v1838_v12 = vmax.f32 %v1836_v22, %v1837_v57  ;;  %v2186_v19 = vmax.f32 %v8601_v7, 0.0  ;;  %v1832_v14 = vrot.slane %v1831_v11, 1 }
 0x217   : > { %v1906_v2 = vmax.f32 %v1904_v60, %v1905_v62  ;;  %v2860_v17 = vsel %vm10544_vm13, %v8378_v39, %v8637_v40  ;;  %v2684_v28 = vsel %vm10549_vm3, %v2560_v26, %v2683_v59  ;;  %v1900_v4 = vrot.slane %v1899_v23, 2 }
 0x218   : > { %2885 = vrot.lane.b32.xlu0 %v2860_v17, %s7792_s24  ;;  %v1870_v53 = vrot.slane %v1869_v15, 4  ;;  %v953_v13 = vadd.f32 %v8495_v6, %v7287_v8  ;;  %v2182_v9 = vmax.f32 %v1826_v21, 0.0  ;;  %v1861_v49 = vmax.f32 %v8592_v47, %v1860_v10 }
 0x219   : > { %v1867_v7 = vrot.slane %v8609_v25, 1  ;;  %v1876_v36 = vsel %vm1196_vm0, %v1116_v37, -inf  ;;  %v2308_v39 = vpack.c.bf16 %v2180_v32, %v2180_v32  ;;  %v8654_v22 = vpack.c.bf16 %v2185_v16, %v2185_v16 }
 0x21a   : > { %v2181_v26 = vmax.f32 %v1819_v48, 0.0  ;;  %v1839_v59 = vrot.slane %v1838_v12, 1  ;;  %v2563_v52 = vunpack.c.l.b16 %v2307_v34  ;;  %v2685_v60 = vsel %vm2611_vm4, %v2561_v0, %v2684_v28 }
 0x21b   : > { %v1833_v3 = vmax.f32 %v1831_v11, %v1832_v14  ;;  %v1907_v35 = vrot.slane %v1906_v2, 2  ;;  %v1901_v47 = vmax.f32 %v1899_v23, %v1900_v4  ;;  %v1871_v10 = vmax.f32 %v1869_v15, %v1870_v53 }
 0x21c   : > { %v1877_v20 = vrot.slane %v1876_v36, 4  ;;  %v1119_v57 = vcombine.high %v953_v13, %v953_v13  ;;  %v8659_v62 = vpack.c.bf16 %v2186_v19, %v2186_v19  ;;  %v2310_v38 = vpack.c.bf16 %v2182_v9, %v2182_v9 }
 0x21d   : > { %v1868_v32 = vmax.f32 %v8609_v25, %v1867_v7  ;;  %v2187_v16 = vmax.f32 %v1861_v49, 0.0  ;;  %v2564_v21 = vunpack.c.l.b16 %v2308_v39  ;;  %v2569_v37 = vunpack.c.l.b16 %v8654_v22 }
 0x21e   : > { %v2309_v34 = vpack.c.bf16 %v2181_v26, %v2181_v26  ;;  %v1840_v48 = vmax.f32 %v1838_v12, %v1839_v59  ;;  %v2686_v31 = vsel %vm2613_vm5, %v2562_v55, %v2685_v60  ;;  %v2183_v0 = vmax.f32 %v1833_v3, 0.0 }
 0x21f   : > { %v1908_v11 = vmax.f32 %v1906_v2, %v1907_v35  ;;  %v1911_v23 = vsel %vm1196_vm0, %v953_v13, -inf  ;;  %v1902_v15 = vrot.slane %v1901_v47, 1  ;;  %v1872_v19 = vrot.slane %v1871_v10, 2  ;;  %v944_v2 = vpop.f32.mrf.mxu0 }
 0x220   : > { %v1878_v14 = vmax.f32 %v1876_v36, %v1877_v20  ;;  %v1918_v17 = vsel %vm1196_vm0, %v1119_v57, -inf  ;;  %v2570_v25 = vunpack.c.l.b16 %v8659_v62  ;;  %v2566_v8 = vunpack.c.l.b16 %v2310_v38 }
 0x221   : > { %v2188_v28 = vmax.f32 %v1868_v32, 0.0  ;;  %v8669_v4 = vpack.c.bf16 %v2187_v16, %v2187_v16  ;;  %v2687_v12 = vsel %vm10551_vm6, %v2563_v52, %v2686_v31  ;;  %v2184_v46 = vmax.f32 %v1840_v48, 0.0  ;;  %v7290_v38 = vpop.f32.mrf.mxu0 }
 0x222   : > { %v1912_v53 = vrot.slane %v1911_v23, 4  ;;  %v10523_v55 = vrot.slane %v8618_v54, 2  ;;  %v2565_v9 = vunpack.c.l.b16 %v2309_v34  ;;  %v2311_v13 = vpack.c.bf16 %v2183_v0, %v2183_v0 }
 0x223   : > { %v1909_v49 = vrot.slane %v1908_v11, 1  ;;  %v1919_v7 = vrot.slane %v1918_v17, 4  ;;  %v8673_v36 = vmax.f32 %v1901_v47, %v1902_v15  ;;  %v1873_v39 = vmax.f32 %v1871_v10, %v1872_v19  ;;  %v7618_v47 = vld [vmem:[%s10504_s3 + $0x78] sm:$0xff]  }
 0x224   : > { %v1879_v26 = vrot.slane %v1878_v14, 2  ;;  %v2905_v59 = vsel %vm2895_vm10, %v2902_v61, %v10523_v55  ;;  %v8681_v52 = vsel %vm10550_vm7, %v2564_v21, %v2687_v12  ;;  %v2689_v60 = vsel %vm10545_vm1, %v2566_v8, %v2565_v9  ;;  %7300 = vmatprep.subr.bf16.mxu1 %v7618_v47 }
 0x225   : > { %v8684_v3 = vpack.c.bf16 %v2188_v28, %v2188_v28  ;;  %v2571_v35 = vunpack.c.l.b16 %v8669_v4  ;;  %2920 = vrot.lane.b32.xlu1 %v2905_v59, %s7791_s23  ;;  %v2312_v10 = vpack.c.bf16 %v2184_v46, %v2184_v46  ;;  %v1913_v20 = vmax.f32 %v1911_v23, %v1912_v53  ;;  %7301 = vmatpush3.bf16.msra.mxu1 %v7618_v47  ;;  %v957_v53 = vpop.f32.mrf.mxu0  ;;  %v7624_v4 = vld [vmem:[%s10504_s3 + $0x50] sm:$0xff]  }
 0x226   : > { %v2941_v57 = vrot.slane %v8625_v51, 2  ;;  %v2942_v61 = vrot.slane %v8598_v5, 3  ;;  %v2567_v32 = vunpack.c.l.b16 %v2311_v13  ;;  %v8693_v16 = vmax.f32 %v1908_v11, %v1909_v49  ;;  %v7619_v11 = vld [vmem:[%s10504_s3 + $0x70] sm:$0xff]  }
 0x227   : > { %v1920_v21 = vmax.f32 %v1918_v17, %v1919_v7  ;;  %v945_v34 = vadd.f32 %v8495_v6, %v944_v2  ;;  %v2193_v48 = vmax.f32 %v8673_v36, 0.0  ;;  %v1874_v31 = vrot.slane %v1873_v39, 1  ;;  %7302 = vmatprep.subr.bf16.mxu1 %v7619_v11 }
 0x228   : > { %v1880_v0 = vmax.f32 %v1878_v14, %v1879_v26  ;;  %v8697_v15 = vor.u32 %v2942_v61, %v2941_v57  ;;  %v966_v8 = vadd.f32 %v8495_v6, %v7290_v38  ;;  %v10522_v28 = vrot.slane %v8618_v54, 3 }
 0x229   : > { %v1117_v23 = vcombine.high %v945_v34, %v945_v34  ;;  %v1883_v19 = vsel %vm1196_vm0, %v945_v34, -inf  ;;  %v2568_v17 = vunpack.c.l.b16 %v2312_v10  ;;  %v1914_v12 = vrot.slane %v1913_v20, 2  ;;  %7303 = vmatpush3.bf16.msra.mxu1 %v7619_v11 }
 0x22a   : > { %v2944_v14 = vsel %vm10546_vm14, %v8402_v50, %v8697_v15  ;;  %v1884_v46 = vrot.slane %v1883_v19, 4  ;;  %v2690_v2 = vsel %vm10547_vm2, %v2567_v32, %v2689_v60  ;;  %v1921_v13 = vrot.slane %v1920_v21, 2 }
 0x22b   : > { %2967 = vrot.lane.b32.xlu0 %v2944_v14, %s7794_s26  ;;  %v1890_v49 = vsel %vm1196_vm0, %v1117_v23, -inf  ;;  %v8712_v7 = vmax.f32 %v1873_v39, %v1874_v31  ;;  %v1881_v26 = vrot.slane %v1880_v0, 1  ;;  %v1953_v50 = vsel %vm1196_vm0, %v966_v8, -inf  ;;  %v7620_v39 = vld [vmem:[%s10504_s3 + $0x68] sm:$0xff]   ;;  %v7291_v23 = vpop.f32.mrf.mxu0 }
 0x22c   : > { %v1885_v59 = vmax.f32 %v1883_v19, %v1884_v46  ;;  %v1891_v47 = vrot.slane %v1890_v49, 4  ;;  %v10565_v60 = vrot.slane %v8481_v29, 3  ;;  %v3023_v57 = vrot.slane %v8625_v51, 3  ;;  %7304 = vmatprep.subr.bf16.mxu1 %v7620_v39 }
 0x22d   : > { %v3024_v61 = vrot.slane %v8598_v5, 4  ;;  %v2691_v38 = vsel %vm10549_vm3, %v2568_v17, %v2690_v2  ;;  %v1122_v31 = vcombine.high %v966_v8, %v966_v8  ;;  %v1915_v19 = vmax.f32 %v1913_v20, %v1914_v12  ;;  %7305 = vmatpush3.bf16.msra.mxu1 %v7620_v39 }
 0x22e   : > { %v2987_v10 = vsel %vm2977_vm12, %v10565_v60, %v10522_v28  ;;  %v1886_v32 = vrot.slane %v1885_v59, 2  ;;  %v1892_v34 = vmax.f32 %v1890_v49, %v1891_v47  ;;  %v958_v14 = vadd.f32 %v8495_v6, %v957_v53  ;;  %v7621_v53 = vld [vmem:[%s10504_s3 + $0x60] sm:$0xff]  }
 0x22f   : > { %3002 = vrot.lane.b32.xlu1 %v2987_v10, %s7793_s25  ;;  %v8727_v11 = vor.u32 %v3024_v61, %v3023_v57  ;;  %v969_v46 = vadd.f32 %v8495_v6, %v7291_v23  ;;  %v1922_v60 = vmax.f32 %v1920_v21, %v1921_v13  ;;  %v1954_v9 = vrot.slane %v1953_v50, 4  ;;  %7306 = vmatprep.subr.bf16.mxu1 %v7621_v53 }
 0x230   : > { %v1887_v28 = vmax.f32 %v1885_v59, %v1886_v32  ;;  %v1893_v55 = vrot.slane %v1892_v34, 2  ;;  %v2692_v8 = vsel %vm2611_vm4, %v2569_v37, %v2691_v38  ;;  %v1120_v17 = vcombine.high %v958_v14, %v958_v14 }
 0x231   : > { %10566 = vst [vmem:[#allocation10_spill] sm:$0xff] %v8727_v11  ;;  %v3026_v20 = vsel %vm3010_vm8, %v8460_v27, %v8727_v11  ;;  %v1925_v12 = vsel %vm1196_vm0, %v958_v14, -inf  ;;  %v1960_v13 = vsel %vm1196_vm0, %v1122_v31, -inf  ;;  %v1123_v22 = vcombine.high %v969_v46, %v969_v46  ;;  %7307 = vmatpush3.bf16.msra.mxu1 %v7621_v53 }
 0x232   : > { %v1888_v21 = vrot.slane %v1887_v28, 1  ;;  %v1894_v2 = vmax.f32 %v1892_v34, %v1893_v55  ;;  %3049 = vrot.lane.b32.xlu0 %v3026_v20, %s7795_s12  ;;  %v1882_v49 = vmax.f32 %v1880_v0, %v1881_v26  ;;  %v1916_v37 = vrot.slane %v1915_v19, 1  ;;  %v7622_v0 = vld [vmem:[%s10504_s3 + $0x58] sm:$0xff]  }
 0x233   : > { %v1926_v59 = vrot.slane %v1925_v12, 4  ;;  %v1932_v47 = vsel %vm1196_vm0, %v1120_v17, -inf  ;;  %v2693_v10 = vsel %vm2613_vm5, %v2570_v25, %v2692_v8  ;;  %v2189_v57 = vmax.f32 %v8712_v7, 0.0  ;;  %7308 = vmatprep.subr.bf16.mxu1 %v7622_v0 }
 0x234   : > { %v1955_v61 = vmax.f32 %v1953_v50, %v1954_v9  ;;  %v1967_v55 = vsel %vm1196_vm0, %v969_v46, -inf  ;;  %v1923_v39 = vrot.slane %v1922_v60, 1  ;;  %v1961_v38 = vrot.slane %v1960_v13, 4 }
 0x235   : > { %v1927_v32 = vmax.f32 %v1925_v12, %v1926_v59  ;;  %v1933_v34 = vrot.slane %v1932_v47, 4  ;;  %v8755_v62 = vpack.c.bf16 %v2193_v48, %v2193_v48  ;;  %v1889_v25 = vmax.f32 %v1887_v28, %v1888_v21  ;;  %7309 = vmatpush3.bf16.msra.mxu1 %v7622_v0 }
 0x236   : > { %v1895_v26 = vrot.slane %v1894_v2, 1  ;;  %v1974_v9 = vsel %vm1196_vm0, %v1123_v22, -inf  ;;  %v2190_v7 = vmax.f32 %v1882_v49, 0.0  ;;  %v1917_v50 = vmax.f32 %v1915_v19, %v1916_v37  ;;  %v7623_v19 = vld [vmem:[%s10504_s3 + $0x138] sm:$0xff]   ;;  %v960_v37 = vpop.f32.mrf.mxu0  ;;  %7310 = vmatprep.subr.bf16.mxu1 %v7624_v4 }
 0x237   : > { %v1934_v31 = vmax.f32 %v1932_v47, %v1933_v34  ;;  %v1968_v23 = vrot.slane %v1967_v55, 4  ;;  %v2694_v14 = vsel %vm10551_vm6, %v2571_v35, %v2693_v10  ;;  %v10567_v46 = vmax.f32 %v8693_v16, 0.0  ;;  %7428 = vmatprep.subr.bf16.mxu0 %v7623_v19  ;;  %v7626_v34 = vld [vmem:[%s10504_s3 + $0x48] sm:$0xff]  }
 0x238   : > { %v2317_v48 = vpack.c.bf16 %v2189_v57, %v2189_v57  ;;  %v1956_v8 = vrot.slane %v1955_v61, 2  ;;  %v1924_v28 = vmax.f32 %v1922_v60, %v1923_v39  ;;  %v1962_v20 = vmax.f32 %v1960_v13, %v1961_v38  ;;  %7429 = vmatpush3.bf16.msra.mxu0 %v7623_v19 }
 0x239   : > { %v8764_v36 = vpack.c.bf16 %v10567_v46, %v10567_v46  ;;  %v1928_v17 = vrot.slane %v1927_v32, 2  ;;  %v1975_v12 = vrot.slane %v1974_v9, 4  ;;  %v2572_v35 = vunpack.c.l.b16 %v8684_v3  ;;  %7311 = vmatpush3.bf16.msra.mxu1 %v7624_v4 }
 0x23a   : > { %v2577_v16 = vunpack.c.l.b16 %v8755_v62  ;;  %v1896_v53 = vmax.f32 %v1894_v2, %v1895_v26  ;;  %v2191_v21 = vmax.f32 %v1889_v25, 0.0  ;;  %v2318_v22 = vpack.c.bf16 %v2190_v7, %v2190_v7  ;;  %7312 = vmatprep.subr.bf16.mxu1 %v7626_v34 }
 0x23b   : > { %v2195_v49 = vmax.f32 %v1917_v50, 0.0  ;;  %v1935_v60 = vrot.slane %v1934_v31, 2  ;;  %v1969_v13 = vmax.f32 %v1967_v55, %v1968_v23  ;;  %v8775_v59 = vsel %vm10550_vm7, %v2572_v35, %v2694_v14  ;;  %v7625_v55 = vld [vmem:[%s10504_s3 + $0x130] sm:$0xff]  }
 0x23c   : > { %v2578_v47 = vunpack.c.l.b16 %v8764_v36  ;;  %v2573_v10 = vunpack.c.l.b16 %v2317_v48  ;;  %v1957_v57 = vmax.f32 %v1955_v61, %v1956_v8  ;;  %v2196_v3 = vmax.f32 %v1924_v28, 0.0  ;;  %7430 = vmatprep.subr.bf16.mxu0 %v7625_v55 }
 0x23d   : > { %v1963_v39 = vrot.slane %v1962_v20, 2  ;;  %v1929_v2 = vmax.f32 %v1927_v32, %v1928_v17  ;;  %v1976_v38 = vmax.f32 %v1974_v9, %v1975_v12  ;;  %v2192_v0 = vmax.f32 %v1896_v53, 0.0  ;;  %7431 = vmatpush3.bf16.msra.mxu0 %v7625_v55  ;;  %7313 = vmatpush3.bf16.msra.mxu1 %v7626_v34  ;;  %v8819_v34 = vpop.permute.xlu0 %2912 }
 0x23e   : > { %v2319_v25 = vpack.c.bf16 %v2191_v21, %v2191_v21  ;;  %v8785_v26 = vshll.u32 %v8618_v54, 16  ;;  %v961_v61 = vadd.f32 %v8495_v6, %v960_v37  ;;  %v2574_v7 = vunpack.c.l.b16 %v2318_v22 }
 0x23f   : > { %v8788_v50 = vpack.c.bf16 %v2195_v49, %v2195_v49  ;;  %v1936_v32 = vmax.f32 %v1934_v31, %v1935_v60  ;;  %v1970_v9 = vrot.slane %v1969_v13, 2  ;;  %v1958_v23 = vrot.slane %v1957_v57, 1  ;;  %v7627_v31 = vld [vmem:[%s10504_s3 + $0x128] sm:$0xff]   ;;  %v7294_v60 = vpop.f32.mrf.mxu0 }
 0x240   : > { %v10568_v14 = vrot.slane %v8598_v5, 1  ;;  %v10525_v48 = vrot.slane %v8785_v26, 1  ;;  %v1121_v8 = vcombine.high %v961_v61, %v961_v61  ;;  %v8794_v28 = vpack.c.bf16 %v2196_v3, %v2196_v3  ;;  %v7628_v5 = vld [vmem:[%s10504_s3 + $0x40] sm:$0xff]   ;;  %7432 = vmatprep.subr.bf16.mxu0 %v7627_v31 }
 0x241   : > { %v8796_v17 = vmax.f32 %v1962_v20, %v1963_v39  ;;  %v1930_v12 = vrot.slane %v1929_v2, 1  ;;  %v1977_v19 = vrot.slane %v1976_v38, 2  ;;  %v2575_v4 = vunpack.c.l.b16 %v2319_v25  ;;  %7314 = vmatprep.subr.bf16.mxu1 %v7628_v5  ;;  %7433 = vmatpush3.bf16.msra.mxu0 %v7627_v31 }
 0x242   : > { %v2764_v46 = vor.u32 %v8625_v51, %v10568_v14  ;;  %v8804_v51 = vpack.c.bf16 %v2192_v0, %v2192_v0  ;;  %v1939_v20 = vsel %vm1196_vm0, %v961_v61, -inf  ;;  %v2696_v53 = vsel %vm10545_vm1, %v2574_v7, %v2573_v10  ;;  %7315 = vmatpush3.bf16.msra.mxu1 %v7628_v5 }
 0x243   : > { %v1937_v21 = vrot.slane %v1936_v32, 1  ;;  %v1971_v22 = vmax.f32 %v1969_v13, %v1970_v9  ;;  %v1940_v49 = vrot.slane %v1939_v20, 4  ;;  %v8812_v37 = vmax.f32 %v1957_v57, %v1958_v23  ;;  %v7629_v57 = vld [vmem:[%s10504_s3 + $0x120] sm:$0xff]  }
 0x244   : > { %v2769_v35 = vsel %vm10548_vm11, %v2764_v46, %v10525_v48  ;;  %v1946_v3 = vsel %vm1196_vm0, %v1121_v8, -inf  ;;  %v982_v39 = vadd.f32 %v8495_v6, %v7294_v60  ;;  %v8817_v55 = vshrl.u32 %v8618_v54, 16  ;;  %7434 = vmatprep.subr.bf16.mxu0 %v7629_v57 }
 0x245   : > { %2802 = vrot.lane.b32.xlu1 %v2769_v35, %s7796_s13  ;;  %v1965_v13 = vrot.slane %v8796_v17, 1  ;;  %v1931_v10 = vmax.f32 %v1929_v2, %v1930_v12  ;;  %v1941_v0 = vmax.f32 %v1939_v20, %v1940_v49  ;;  %v1947_v25 = vrot.slane %v1946_v3, 4  ;;  %v973_v2 = vpop.f32.mrf.mxu0  ;;  %7435 = vmatpush3.bf16.msra.mxu0 %v7629_v57  ;;  %v7630_v20 = vld [vmem:[%s10504_s3 + $0x118] sm:$0xff]  }
 0x246   : > { %v2576_v61 = vunpack.c.l.b16 %v8804_v51  ;;  %v2697_v7 = vsel %vm10547_vm2, %v2575_v4, %v2696_v53  ;;  %v8827_v9 = vmax.f32 %v1976_v38, %v1977_v19  ;;  %v2861_v23 = vrot.slane %v8817_v55, 1  ;;  %7436 = vmatprep.subr.bf16.mxu0 %v7630_v20 }
 0x247   : > { %v1938_v14 = vmax.f32 %v1936_v32, %v1937_v21  ;;  %v1972_v46 = vrot.slane %v1971_v22, 1  ;;  %v1942_v8 = vrot.slane %v1941_v0, 2  ;;  %v1948_v31 = vmax.f32 %v1946_v3, %v1947_v25 }
 0x248   : > { %v2009_v12 = vsel %vm1196_vm0, %v982_v39, -inf  ;;  %v2862_v5 = vrot.slane %v8785_v26, 2  ;;  %v8834_v35 = vpack.c.b16 %v8590_v58, %v8529_v24  ;;  %v974_v51 = vadd.f32 %v8495_v6, %v973_v2  ;;  %v8844_v24 = vpop.permute.xlu0 %2994 }
 0x249   : > { %v2197_v38 = vmax.f32 %v1931_v10, 0.0  ;;  %v1943_v19 = vmax.f32 %v1941_v0, %v1942_v8  ;;  %v1949_v4 = vrot.slane %v1948_v31, 2  ;;  %v1126_v32 = vcombine.high %v982_v39, %v982_v39  ;;  %7437 = vmatpush3.bf16.msra.mxu0 %v7630_v20 }
 0x24a   : > { %10569 = vst [vmem:[#allocation11_spill] sm:$0xff] %v8834_v35  ;;  %v8840_v53 = vor.u32 %v2862_v5, %v2861_v23  ;;  %v10524_v21 = vrot.slane %v8834_v35, 1  ;;  %v1124_v49 = vcombine.high %v974_v51, %v974_v51  ;;  %v1981_v60 = vsel %vm1196_vm0, %v974_v51, -inf }
 0x24b   : > { %v2198_v58 = vmax.f32 %v1938_v14, 0.0  ;;  %v1944_v3 = vrot.slane %v1943_v19, 1  ;;  %v1950_v25 = vmax.f32 %v1948_v31, %v1949_v4  ;;  %v2010_v10 = vrot.slane %v2009_v12, 4 }
 0x24c   : > { %v2864_v39 = vsel %vm10544_vm13, %v8637_v40, %v8840_v53  ;;  %v10570_v0 = vrot.slane %v8618_v54, 1  ;;  %v1982_v23 = vrot.slane %v1981_v60, 4  ;;  %v1988_v8 = vsel %vm1196_vm0, %v1124_v49, -inf  ;;  %v7631_v40 = vld [vmem:[%s10504_s3 + $0x110] sm:$0xff]   ;;  %v8865_v48 = vpop.permute.xlu0 %3216 }
 0x24d   : > { %v1966_v14 = vmax.f32 %v8796_v17, %v1965_v13  ;;  %v1945_v2 = vmax.f32 %v1943_v19, %v1944_v3  ;;  %v1951_v31 = vrot.slane %v1950_v25, 1  ;;  %v2016_v5 = vsel %vm1196_vm0, %v1126_v32, -inf  ;;  %2887 = vrot.lane.b32.xlu1 %v2864_v39, %s7792_s24  ;;  %7438 = vmatprep.subr.bf16.mxu0 %v7631_v40 }
 0x24e   : > { %v2823_v57 = vsel %vm2811_vm9, %v10570_v0, %v10524_v21  ;;  %v2698_v51 = vsel %vm10549_vm3, %v2576_v61, %v2697_v7  ;;  %v1973_v4 = vmax.f32 %v1971_v22, %v1972_v46  ;;  %v1979_v49 = vrot.slane %v8827_v9, 1  ;;  %v7295_v0 = vpop.f32.mrf.mxu0  ;;  %7439 = vmatpush3.bf16.msra.mxu0 %v7631_v40  ;;  %v7633_v40 = vld [vmem:[%s10504_s3 + $0x100] sm:$0xff]  }
 0x24f   : > { %2838 = vrot.lane.b32.xlu0 %v2823_v57, %s7790_s22  ;;  %v1989_v20 = vrot.slane %v1988_v8, 4  ;;  %v2325_v17 = vpack.c.bf16 %v2197_v38, %v2197_v38  ;;  %v1952_v13 = vmax.f32 %v1950_v25, %v1951_v31  ;;  %v2199_v19 = vmax.f32 %v1945_v2, 0.0  ;;  %v7632_v38 = vld [vmem:[%s10504_s3 + $0x108] sm:$0xff]  }
 0x250   : > { %v985_v32 = vadd.f32 %v8495_v6, %v7295_v0  ;;  %v2326_v3 = vpack.c.bf16 %v2198_v58, %v2198_v58  ;;  %v2011_v39 = vmax.f32 %v2009_v12, %v2010_v10  ;;  %v2017_v57 = vrot.slane %v2016_v5, 4  ;;  %7440 = vmatprep.subr.bf16.mxu0 %v7632_v38 }
 0x251   : > { %v1983_v21 = vmax.f32 %v1981_v60, %v1982_v23  ;;  %v2579_v61 = vunpack.c.l.b16 %v8788_v50  ;;  %v2201_v7 = vmax.f32 %v8812_v37, 0.0  ;;  %v2202_v46 = vmax.f32 %v1966_v14, 0.0 }
 0x252   : > { %v2699_v6 = vsel %vm2611_vm4, %v2577_v16, %v2698_v51  ;;  %v1980_v12 = vmax.f32 %v8827_v9, %v1979_v49  ;;  %v2200_v60 = vmax.f32 %v1952_v13, 0.0  ;;  %v1990_v58 = vmax.f32 %v1988_v8, %v1989_v20  ;;  %7441 = vmatpush3.bf16.msra.mxu0 %v7632_v38  ;;  %v8889_v20 = vpop.permute.xlu0 %7574 }
 0x253   : > { %v2581_v25 = vunpack.c.l.b16 %v2325_v17  ;;  %v2203_v10 = vmax.f32 %v1973_v4, 0.0  ;;  %v2327_v50 = vpack.c.bf16 %v2199_v19, %v2199_v19  ;;  %v2023_v23 = vsel %vm1196_vm0, %v985_v32, -inf  ;;  %7442 = vmatprep.subr.bf16.mxu0 %v7633_v40 }
 0x254   : > { %v2582_v37 = vunpack.c.l.b16 %v2326_v3  ;;  %v2012_v14 = vrot.slane %v2011_v39, 2  ;;  %v2018_v2 = vmax.f32 %v2016_v5, %v2017_v57  ;;  %v1984_v31 = vrot.slane %v1983_v21, 2 }
 0x255   : > { %v2700_v62 = vsel %vm2613_vm5, %v2578_v47, %v2699_v6  ;;  %v8881_v16 = vpack.c.bf16 %v2201_v7, %v2201_v7  ;;  %v8883_v9 = vpack.c.bf16 %v2202_v46, %v2202_v46  ;;  %v2945_v8 = vrot.slane %v8817_v55, 2  ;;  %v976_v7 = vpop.f32.mrf.mxu0 }
 0x256   : > { %v2328_v51 = vpack.c.bf16 %v2200_v60, %v2200_v60  ;;  %v1991_v4 = vrot.slane %v1990_v58, 2  ;;  %v1127_v49 = vcombine.high %v985_v32, %v985_v32  ;;  %v2024_v5 = vrot.slane %v2023_v23, 4  ;;  %7443 = vmatpush3.bf16.msra.mxu0 %v7633_v40 }
 0x257   : > { %v2204_v0 = vmax.f32 %v1980_v12, 0.0  ;;  %v8891_v36 = vpack.c.bf16 %v2203_v10, %v2203_v10  ;;  %v2583_v47 = vunpack.c.l.b16 %v2327_v50  ;;  %v2946_v17 = vrot.slane %v8785_v26, 3 }
 0x258   : > { %v2703_v13 = vsel %vm10545_vm1, %v2582_v37, %v2581_v25  ;;  %v2013_v19 = vmax.f32 %v2011_v39, %v2012_v14  ;;  %v2019_v3 = vrot.slane %v2018_v2, 2  ;;  %v1985_v57 = vmax.f32 %v1983_v21, %v1984_v31 }
 0x259   : > { %v8896_v46 = vsel %vm10551_vm6, %v2579_v61, %v2700_v62  ;;  %v2585_v32 = vunpack.c.l.b16 %v8881_v16  ;;  %v8900_v6 = vor.u32 %v2946_v17, %v2945_v8  ;;  %v2584_v12 = vunpack.c.l.b16 %v2328_v51 }
 0x25a   : > { %v1992_v60 = vmax.f32 %v1990_v58, %v1991_v4  ;;  %v2025_v10 = vmax.f32 %v2023_v23, %v2024_v5  ;;  %v2030_v50 = vsel %vm1196_vm0, %v1127_v49, -inf  ;;  %v8903_v25 = vpack.c.bf16 %v2204_v0, %v2204_v0  ;;  %v7298_v58 = vpop.f32.mrf.mxu0  ;;  %v8912_v23 = vpop.permute.xlu0 %2881 }
 0x25b   : > { %v2704_v21 = vsel %vm10547_vm2, %v2583_v47, %v2703_v13  ;;  %v2948_v39 = vsel %vm10546_vm14, %v8697_v15, %v8900_v6  ;;  %v10526_v61 = vrot.slane %v8834_v35, 2  ;;  %v2014_v14 = vrot.slane %v2013_v19, 1  ;;  %v8922_v15 = vld [vmem:[%s10503_s2] ss:$0 sm:$0xff] }
 0x25c   : > { %v2020_v31 = vmax.f32 %v2018_v2, %v2019_v3  ;;  %v1986_v62 = vrot.slane %v1985_v57, 1  ;;  %2969 = vrot.lane.b32.xlu1 %v2948_v39, %s7794_s26  ;;  %v2031_v16 = vrot.slane %v2030_v50, 4  ;;  %v10571_v8 = vrot.slane %v8618_v54, 2 }
 0x25d   : > { %v977_v2 = vadd.f32 %v8922_v15, %v976_v7  ;;  %v998_v51 = vadd.f32 %v8922_v15, %v7298_v58  ;;  %v2705_v4 = vsel %vm10549_vm3, %v2584_v12, %v2704_v21  ;;  %v1993_v49 = vrot.slane %v1992_v60, 1 }
 0x25e   : > { %v2907_v40 = vsel %vm2895_vm10, %v10571_v8, %v10526_v61  ;;  %v2026_v5 = vrot.slane %v2025_v10, 2  ;;  %v3027_v0 = vrot.slane %v8817_v55, 3  ;;  %v3028_v3 = vrot.slane %v8785_v26, 4 }
 0x25f   : > { %2922 = vrot.lane.b32.xlu0 %v2907_v40, %s7791_s23  ;;  %v1125_v47 = vcombine.high %v977_v2, %v977_v2  ;;  %v1995_v17 = vsel %vm1196_vm0, %v977_v2, -inf  ;;  %v1130_v13 = vcombine.high %v998_v51, %v998_v51  ;;  %v2021_v39 = vrot.slane %v2020_v31, 1  ;;  %v8935_v2 = vpop.permute.xlu0 %2963 }
 0x260   : > { %v1987_v8 = vmax.f32 %v1985_v57, %v1986_v62  ;;  %v1996_v61 = vrot.slane %v1995_v17, 4  ;;  %v2065_v7 = vsel %vm1196_vm0, %v998_v51, -inf  ;;  %v2032_v58 = vmax.f32 %v2030_v50, %v2031_v16  ;;  %v989_v62 = vpop.f32.mrf.mxu0 }
 0x261   : > { %v2002_v12 = vsel %vm1196_vm0, %v1125_v47, -inf  ;;  %v2066_v21 = vrot.slane %v2065_v7, 4  ;;  %v2072_v22 = vsel %vm1196_vm0, %v1130_v13, -inf  ;;  %v2706_v40 = vsel %vm2611_vm4, %v2585_v32, %v2705_v4 }
 0x262   : > { %v2027_v37 = vmax.f32 %v2025_v10, %v2026_v5  ;;  %v1997_v38 = vmax.f32 %v1995_v17, %v1996_v61  ;;  %v2003_v1 = vrot.slane %v2002_v12, 4  ;;  %v1994_v45 = vmax.f32 %v1992_v60, %v1993_v49 }
 0x263   : > { %v2073_v43 = vrot.slane %v2072_v22, 4  ;;  %v8937_v42 = vor.u32 %v3028_v3, %v3027_v0  ;;  %v10535_v57 = vrot.slane %v8834_v35, 3  ;;  %v2067_v51 = vmax.f32 %v2065_v7, %v2066_v21  ;;  %v7299_v3 = vpop.f32.mrf.mxu0 }
 0x264   : > { %v1998_v50 = vrot.slane %v1997_v38, 2  ;;  %v2004_v16 = vmax.f32 %v2002_v12, %v2003_v1  ;;  %v990_v47 = vadd.f32 %v8922_v15, %v989_v62  ;;  %v2015_v13 = vmax.f32 %v2013_v19, %v2014_v14 }
 0x265   : > { %v2033_v29 = vrot.slane %v2032_v58, 2  ;;  %v3030_v32 = vsel %vm3010_vm8, %v8727_v11, %v8937_v42  ;;  %v10572_v60 = vrot.slane %v8618_v54, 3  ;;  %v2022_v61 = vmax.f32 %v2020_v31, %v2021_v39  ;;  %v8956_v39 = vpop.permute.xlu0 %2832 }
 0x266   : > { %v2205_v4 = vmax.f32 %v1987_v8, 0.0  ;;  %v2028_v49 = vrot.slane %v2027_v37, 1  ;;  %3051 = vrot.lane.b32.xlu1 %v3030_v32, %s7795_s12  ;;  %v1128_v1 = vcombine.high %v990_v47, %v990_v47  ;;  %v10573_v19 = vunpack.c.l.b16 %v8883_v9 }
 0x267   : > { %v2989_v10 = vsel %vm2977_vm12, %v10572_v60, %v10535_v57  ;;  %v1999_v5 = vmax.f32 %v1997_v38, %v1998_v50  ;;  %v2005_v0 = vrot.slane %v2004_v16, 2  ;;  %v2037_v17 = vsel %vm1196_vm0, %v990_v47, -inf }
 0x268   : > { %3004 = vrot.lane.b32.xlu0 %v2989_v10, %s7793_s25  ;;  %v2707_v14 = vsel %vm2613_vm5, %v10573_v19, %v2706_v40  ;;  %v2206_v7 = vmax.f32 %v1994_v45, 0.0  ;;  %v2068_v12 = vrot.slane %v2067_v51, 2  ;;  %v2074_v21 = vmax.f32 %v2072_v22, %v2073_v43  ;;  %v8963_v45 = vpop.permute.xlu1 %2828 }
 0x269   : > { %v1001_v31 = vadd.f32 %v8922_v15, %v7299_v3  ;;  %v2209_v8 = vmax.f32 %v2015_v13, 0.0  ;;  %v2034_v62 = vmax.f32 %v2032_v58, %v2033_v29  ;;  %v2038_v32 = vrot.slane %v2037_v17, 4 }
 0x26a   : > { %v2044_v60 = vsel %vm1196_vm0, %v1128_v1, -inf  ;;  %v2588_v9 = vunpack.c.l.b16 %v8903_v25  ;;  %v10574_v38 = vunpack.c.l.b16 %v8891_v36  ;;  %v2210_v50 = vmax.f32 %v2022_v61, 0.0 }
 0x26b   : > { %v2029_v47 = vmax.f32 %v2027_v37, %v2028_v49  ;;  %v2333_v43 = vpack.c.bf16 %v2205_v4, %v2205_v4  ;;  %v2000_v22 = vrot.slane %v1999_v5, 1  ;;  %v2006_v10 = vmax.f32 %v2004_v16, %v2005_v0 }
 0x26c   : > { %v2708_v40 = vsel %vm10551_vm6, %v10574_v38, %v2707_v14  ;;  %v2045_v19 = vrot.slane %v2044_v60, 4  ;;  %v2334_v3 = vpack.c.bf16 %v2206_v7, %v2206_v7  ;;  %v2069_v13 = vmax.f32 %v2067_v51, %v2068_v12  ;;  %v8974_v14 = vpop.permute.xlu0 %2916 }
 0x26d   : > { %v2075_v29 = vrot.slane %v2074_v21, 2  ;;  %v2079_v58 = vsel %vm1196_vm0, %v1001_v31, -inf  ;;  %v8966_v1 = vpack.c.bf16 %v2209_v8, %v2209_v8  ;;  %v2035_v25 = vrot.slane %v2034_v62, 1 }
 0x26e   : > { %v2039_v57 = vmax.f32 %v2037_v17, %v2038_v32  ;;  %v2046_v36 = vmax.f32 %v2044_v60, %v2045_v19  ;;  %v10575_v61 = vunpack.c.l.b16 %v8794_v28  ;;  %v8972_v49 = vpack.c.bf16 %v2210_v50, %v2210_v50  ;;  %v8977_v60 = vpop.permute.xlu1 %2879 }
 0x26f   : > { %v2211_v4 = vmax.f32 %v2029_v47, 0.0  ;;  %v1131_v16 = vcombine.high %v1001_v31, %v1001_v31  ;;  %v2709_v51 = vsel %vm10550_vm7, %v2588_v9, %v2708_v40  ;;  %v2001_v0 = vmax.f32 %v1999_v5, %v2000_v22  ;;  %v992_v31 = vpop.f32.mrf.mxu0 }
 0x270   : > { %v2702_v37 = vsel %vm10550_vm7, %v10575_v61, %v8896_v46  ;;  %v2007_v7 = vrot.slane %v2006_v10, 1  ;;  %v2080_v12 = vrot.slane %v2079_v58, 4  ;;  %v2589_v8 = vunpack.c.l.b16 %v2333_v43 }
 0x271   : > { %v2590_v38 = vunpack.c.l.b16 %v2334_v3  ;;  %v2070_v17 = vrot.slane %v2069_v13, 1  ;;  %v2076_v32 = vmax.f32 %v2074_v21, %v2075_v29  ;;  %v8980_v46 = vmax.f32 %v2034_v62, %v2035_v25 }
 0x272   : > { %v2040_v50 = vrot.slane %v2039_v57, 2  ;;  %v2047_v47 = vrot.slane %v2046_v36, 2  ;;  %v8982_v19 = vpack.c.b16 %v2709_v51, %v2702_v37  ;;  %v8985_v5 = vpack.c.bf16 %v2211_v4, %v2211_v4  ;;  %v8997_v37 = vpop.permute.xlu0 %2998 }
 0x273   : > { %v2086_v40 = vsel %vm1196_vm0, %v1131_v16, -inf  ;;  %v2008_v43 = vmax.f32 %v2006_v10, %v2007_v7  ;;  %v2207_v22 = vmax.f32 %v2001_v0, 0.0  ;;  %v2081_v21 = vmax.f32 %v2079_v58, %v2080_v12 }
 0x274   : > { %v8989_v3 = vshll.u32 %v8834_v35, 16  ;;  %v8992_v62 = vsel %vm10545_vm1, %v2590_v38, %v2589_v8  ;;  %v8994_v29 = vmax.f32 %v2069_v13, %v2070_v17  ;;  %v2077_v25 = vrot.slane %v2076_v32, 1  ;;  %v9008_v8 = vpop.permute.xlu1 %2961 }
 0x275   : > { %v993_v61 = vadd.f32 %v8922_v15, %v992_v31  ;;  %v2041_v51 = vmax.f32 %v2039_v57, %v2040_v50  ;;  %v2048_v16 = vmax.f32 %v2046_v36, %v2047_v47  ;;  %v2087_v10 = vrot.slane %v2086_v40, 4 }
 0x276   : > { %v10576_v58 = vrot.slane %v8785_v26, 1  ;;  %v10536_v7 = vrot.slane %v8989_v3, 1  ;;  %v9006_v13 = vpack.c.b16 %v8775_v59, %v8681_v52  ;;  %v2208_v38 = vmax.f32 %v2008_v43, 0.0 }
 0x277   : > { %v1129_v12 = vcombine.high %v993_v61, %v993_v61  ;;  %v9011_v17 = vpack.c.bf16 %v2207_v22, %v2207_v22  ;;  %v2082_v57 = vrot.slane %v2081_v21, 2  ;;  %v9013_v36 = vmax.f32 %v2076_v32, %v2077_v25  ;;  %v9025_v25 = vpop.permute.xlu0 %2798 }
 0x278   : > { %v2772_v0 = vor.u32 %v8817_v55, %v10576_v58  ;;  %v2217_v26 = vmax.f32 %v8994_v29, 0.0  ;;  %v2051_v50 = vsel %vm1196_vm0, %v993_v61, -inf  ;;  %v2042_v52 = vrot.slane %v2041_v51, 1  ;;  %v9036_v28 = vpop.permute.xlu1 %2830 }
 0x279   : > { %v2049_v59 = vrot.slane %v2048_v16, 1  ;;  %v2088_v47 = vmax.f32 %v2086_v40, %v2087_v10  ;;  %v2052_v31 = vrot.slane %v2051_v50, 4  ;;  %v2058_v43 = vsel %vm1196_vm0, %v1129_v12, -inf }
 0x27a   : > { %v2777_v55 = vsel %vm10548_vm11, %v2772_v0, %v10536_v7  ;;  %v10538_v22 = vrot.slane %v9006_v13, 1  ;;  %v2778_v32 = vshrl.u32 %v8834_v35, 16  ;;  %v2866_v29 = vrot.slane %v8989_v3, 2 }
 0x27b   : > { %2804 = vrot.lane.b32.xlu0 %v2777_v55, %s7796_s13  ;;  %v9027_v58 = vpack.c.bf16 %v2208_v38, %v2208_v38  ;;  %v2591_v61 = vunpack.c.l.b16 %v9011_v17  ;;  %v2083_v0 = vmax.f32 %v2081_v21, %v2082_v57  ;;  %v2053_v15 = vmax.f32 %v2051_v50, %v2052_v31 }
 0x27c   : > { %v2059_v40 = vrot.slane %v2058_v43, 4  ;;  %v10577_v10 = vrot.slane %v8834_v35, 1  ;;  %v2865_v55 = vrot.slane %v2778_v32, 1  ;;  %v2043_v4 = vmax.f32 %v2041_v51, %v2042_v52 }
 0x27d   : > { %v2089_v7 = vrot.slane %v2088_v47, 2  ;;  %v2054_v38 = vrot.slane %v2053_v15, 2  ;;  %v2949_v17 = vrot.slane %v2778_v32, 2  ;;  %v2050_v21 = vmax.f32 %v2048_v16, %v2049_v59 }
 0x27e   : > { %v2825_v12 = vsel %vm2811_vm9, %v10577_v10, %v10538_v22  ;;  %v2060_v57 = vmax.f32 %v2058_v43, %v2059_v40  ;;  %v9039_v50 = vor.u32 %v2866_v29, %v2865_v55  ;;  %v2950_v31 = vrot.slane %v8989_v3, 3  ;;  %v9054_v29 = vpop.permute.xlu0 %2834 }
 0x27f   : > { %2840 = vrot.lane.b32.xlu1 %v2825_v12, %s7790_s22  ;;  %v2055_v11 = vmax.f32 %v2053_v15, %v2054_v38  ;;  %v3031_v22 = vrot.slane %v2778_v32, 3  ;;  %v3032_v9 = vrot.slane %v8989_v3, 4  ;;  %v10578_v52 = vrot.slane %v9006_v13, 2 }
 0x280   : > { %v2061_v54 = vrot.slane %v2060_v57, 2  ;;  %v2868_v51 = vsel %vm10544_vm13, %v8840_v53, %v9039_v50  ;;  %v10579_v16 = vrot.slane %v8834_v35, 2  ;;  %v9052_v43 = vor.u32 %v2950_v31, %v2949_v17  ;;  %v9064_v17 = vpop.permute.xlu1 %2914 }
 0x281   : > { %v2213_v15 = vmax.f32 %v2043_v4, 0.0  ;;  %v2084_v40 = vrot.slane %v2083_v0, 1  ;;  %v2056_v12 = vrot.slane %v2055_v11, 1  ;;  %2889 = vrot.lane.b32.xlu0 %v2868_v51, %s7792_s24  ;;  %v9059_v55 = vshll.u32 %v9006_v13, 16 }
 0x282   : > { %v2909_v59 = vsel %vm2895_vm10, %v10579_v16, %v10578_v52  ;;  %v2214_v53 = vmax.f32 %v2050_v21, 0.0  ;;  %v2090_v38 = vmax.f32 %v2088_v47, %v2089_v7  ;;  %v2062_v10 = vmax.f32 %v2060_v57, %v2061_v54 }
 0x283   : > { %2924 = vrot.lane.b32.xlu1 %v2909_v59, %s7791_s23  ;;  %v9062_v41 = vshrl.u32 %v9006_v13, 16  ;;  %v2057_v31 = vmax.f32 %v2055_v11, %v2056_v12  ;;  %v2952_v4 = vsel %vm10546_vm14, %v8900_v6, %v9052_v43  ;;  %v10580_v51 = vrot.slane %v9006_v13, 3 }
 0x284   : > { %v10581_v52 = vrot.slane %v8834_v35, 3  ;;  %v9074_v59 = vor.u32 %v3032_v9, %v3031_v22  ;;  %v2063_v7 = vrot.slane %v2062_v10, 1  ;;  %v2870_v21 = vrot.slane %v9059_v55, 2  ;;  %v9087_v35 = vpop.permute.xlu0 %2918 }
 0x285   : > { %v2869_v47 = vrot.slane %v9062_v41, 1  ;;  %v2592_v11 = vunpack.c.l.b16 %v9027_v58  ;;  %v2218_v57 = vmax.f32 %v9013_v36, 0.0  ;;  %v9081_v6 = vpack.c.bf16 %v2217_v26, %v2217_v26  ;;  %2971 = vrot.lane.b32.xlu0 %v2952_v4, %s7794_s26 }
 0x286   : > { %v2991_v16 = vsel %vm2977_vm12, %v10581_v52, %v10580_v51  ;;  %v2341_v12 = vpack.c.bf16 %v2213_v15, %v2213_v15  ;;  %v2342_v9 = vpack.c.bf16 %v2214_v53, %v2214_v53  ;;  %v2064_v22 = vmax.f32 %v2062_v10, %v2063_v7 }
 0x287   : > { %3006 = vrot.lane.b32.xlu1 %v2991_v16, %s7793_s25  ;;  %v2215_v51 = vmax.f32 %v2057_v31, 0.0  ;;  %v10582_v52 = vrot.slane %v8989_v3, 1  ;;  %v2711_v58 = vsel %vm10547_vm2, %v2591_v61, %v8992_v62  ;;  %v2091_v63 = vrot.slane %v2090_v38, 1  ;;  %v9103_v31 = vpop.permute.xlu1 %2996 }
 0x288   : > { %v2953_v36 = vrot.slane %v9062_v41, 2  ;;  %v2954_v26 = vrot.slane %v9059_v55, 3  ;;  %v9093_v15 = vmax.f32 %v2083_v0, %v2084_v40  ;;  %v3034_v10 = vsel %vm3010_vm8, %v8937_v42, %v9074_v59 }
 0x289   : > { %v2780_v54 = vor.u32 %v2778_v32, %v10582_v52  ;;  %v10583_v53 = vrot.slane %v9059_v55, 1  ;;  %v9101_v32 = vor.u32 %v2870_v21, %v2869_v47  ;;  %v10584_v62 = vmax.f32 %v8980_v46, 0.0  ;;  %3053 = vrot.lane.b32.xlu0 %v3034_v10, %s7795_s12 }
 0x28a   : > { %v9110_v4 = vpack.c.bf16 %v2218_v57, %v2218_v57  ;;  %v2216_v0 = vmax.f32 %v2064_v22, 0.0  ;;  %v9115_v42 = vrot.slane %v8982_v19, 1  ;;  %v2601_v40 = vunpack.c.l.b16 %v9081_v6 }
 0x28b   : > { %v2785_v3 = vsel %vm10548_vm11, %v2780_v54, %v10583_v53  ;;  %v9108_v61 = vpack.c.bf16 %v10584_v62, %v10584_v62  ;;  %v2597_v16 = vunpack.c.l.b16 %v2341_v12  ;;  %v2598_v7 = vunpack.c.l.b16 %v2342_v9  ;;  %v9132_v9 = vpop.permute.xlu0 %3000 }
 0x28c   : > { %2806 = vrot.lane.b32.xlu1 %v2785_v3, %s7796_s13  ;;  %v2343_v54 = vpack.c.bf16 %v2215_v51, %v2215_v51  ;;  %v2712_v46 = vsel %vm10549_vm3, %v2592_v11, %v2711_v58  ;;  %v9119_v47 = vmax.f32 %v2090_v38, %v2091_v63  ;;  %v9121_v21 = vor.u32 %v2954_v26, %v2953_v36  ;;  %v3046_v58 = vpop.permute.xlu1 %3045 }
 0x28d   : > { %v9124_v57 = vshll.u32 %v8982_v19, 16  ;;  %v2219_v22 = vmax.f32 %v9093_v15, 0.0  ;;  %v2872_v52 = vsel %vm10544_vm13, %v9039_v50, %v9101_v32  ;;  %v3035_v10 = vrot.slane %v9062_v41, 3  ;;  %3205 = vrot.lane.b32.xlu0 %v9115_v42, %s7790_s22 }
 0x28e   : > { %v3036_v12 = vrot.slane %v9059_v55, 4  ;;  %v2344_v11 = vpack.c.bf16 %v2216_v0, %v2216_v0  ;;  %vm3076_vm0 = vcmask 261120   ;;  %v7577_v63 = vunpack.i.h.bf16 %v8889_v20 }
 0x28f   : > { %v2717_v38 = vsel %vm10545_vm1, %v2598_v7, %v2597_v16  ;;  %v2599_v51 = vunpack.c.l.b16 %v2343_v54  ;;  %vm3093_vm13 = vcmask 392192   ;;  %v7576_v50 = vunpack.i.l.bf16 %v8889_v20  ;;  %v9156_v20 = vld [vmem:[%s10504_s3 + $0x38] sm:$0xff]  }
 0x290   : > { %2891 = vrot.lane.b32.xlu1 %v2872_v52, %s7792_s24  ;;  %v9141_v36 = vrot.slane %v8982_v19, 2  ;;  %v2956_v26 = vsel %vm10546_vm14, %v9052_v43, %v9121_v21  ;;  %v2792_v15 = vrot.slane %v9124_v57, 1  ;;  %v3063_v53 = vsel %vm3059_vm15, 0, %v7577_v63  ;;  %v2884_v63 = vpop.permute.xlu1 %2883  ;;  %7332 = vmatprep.subr.bf16.mxu1 %v9156_v20 }
 0x291   : > { %v9148_v3 = vor.u32 %v3036_v12, %v3035_v10  ;;  %v3061_v62 = vsel %vm3059_vm15, 0, %v7576_v50  ;;  %v3080_v0 = vsel %vm3076_vm0, %v3063_v53, %v9036_v28  ;;  %vm3110_vm1 = vcmask 523264  }
 0x292   : > { %v2600_v16 = vunpack.c.l.b16 %v2344_v11  ;;  %3209 = vrot.lane.b32.xlu0 %v9141_v36, %s7791_s23  ;;  %v10585_v43 = vrot.slane %v9059_v55, 1  ;;  %v3078_v54 = vsel %vm3076_vm0, %v3061_v62, %v8963_v45  ;;  %v3097_v28 = vsel %vm3093_vm13, %v3080_v0, %v8912_v23 }
 0x293   : > { %v10586_v52 = vunpack.c.l.b16 %v8966_v1  ;;  %v2718_v12 = vsel %vm10547_vm2, %v2599_v51, %v2717_v38  ;;  %v9173_v11 = vshrl.u32 %v8982_v19, 16  ;;  %v3095_v55 = vsel %vm3093_vm13, %v3078_v54, %v8977_v60 }
 0x294   : > { %2973 = vrot.lane.b32.xlu1 %v2956_v26, %s7794_s26  ;;  %v2788_v7 = vor.u32 %v9062_v41, %v10585_v43  ;;  %v2801_v41 = vpop.permute.xlu0 %2800  ;;  %v2220_v45 = vmax.f32 %v9119_v47, 0.0  ;;  %vm3127_vm14 = vcmask 654336   ;;  %v3114_v1 = vsel %vm3110_vm1, %v3097_v28, %v9064_v17 }
 0x295   : > { %v2713_v10 = vsel %vm2611_vm4, %v10586_v52, %v2712_v46  ;;  %v3038_v46 = vsel %vm3010_vm8, %v9074_v59, %v9148_v3  ;;  %vm3144_vm2 = vcmask 785408   ;;  %v3131_v60 = vsel %vm3127_vm14, %v3114_v1, %v8935_v2 }
 0x296   : > { %v2793_v23 = vsel %vm10548_vm11, %v2788_v7, %v2792_v15  ;;  %v3112_v38 = vsel %vm3110_vm1, %v3095_v55, %v8819_v34  ;;  %v2347_v51 = vpack.c.bf16 %v2219_v22, %v2219_v22  ;;  %v2719_v47 = vsel %vm10549_vm3, %v2600_v16, %v2718_v12 }
 0x297   : > { %2808 = vrot.lane.b32.xlu0 %v2793_v23, %s7796_s13  ;;  %vm3161_vm11 = vcmask 916480   ;;  %v9194_v17 = vsel %vm3144_vm2, %v3131_v60, %v9103_v31  ;;  %v2875_v59 = vrot.slane %v9173_v11, 1  ;;  %v2876_v50 = vrot.slane %v9124_v57, 2 }
 0x298   : > { %3055 = vrot.lane.b32.xlu1 %v3038_v46, %s7795_s12  ;;  %v9200_v2 = vsel %vm3161_vm11, %v9194_v17, %v3046_v58  ;;  %v3129_v34 = vsel %vm3127_vm14, %v3112_v38, %v9008_v8  ;;  %v2602_v22 = vunpack.c.l.b16 %v9110_v4  ;;  %v9206_v26 = vor.u32 %v9173_v11, %v2792_v15  ;;  %v2966_v15 = vpop.permute.xlu1 %2965  ;;  %v2886_v0 = vpop.permute.xlu0 %2885 }
 0x299   : > { %v10587_v31 = vrot.slane %v9006_v13, 1  ;;  %v9214_v62 = vsel %vm3144_vm2, %v3129_v34, %v8844_v24  ;;  %v2720_v58 = vsel %vm2611_vm4, %v2601_v40, %v2719_v47  ;;  %vm3262_vm3 = vcmask 1043456  }
 0x29a   : > { %v3233_v8 = vsel %vm3161_vm11, %v9214_v62, %v8865_v48  ;;  %v3264_v4 = vrot.slane %v9200_v2, 4  ;;  %v10588_v16 = vunpack.c.l.b16 %v8972_v49  ;;  %v2348_v7 = vpack.c.bf16 %v2220_v45, %v2220_v45 }
 0x29b   : > { %v2827_v53 = vsel %vm2811_vm9, %v10587_v31, %v9115_v42  ;;  %3203 = vrot.lane.b32.xlu0 %v9206_v26, %s7796_s13  ;;  %v3263_v24 = vrot.slane %v3233_v8, 4  ;;  %v3065_v48 = vsel %vm3059_vm15, %v8165_v56, %v9025_v25  ;;  %v2603_v6 = vunpack.c.l.b16 %v2347_v51 }
 0x29c   : > { %v2714_v43 = vsel %vm2613_vm5, %v10588_v16, %v2713_v10  ;;  %2842 = vrot.lane.b32.xlu1 %v2827_v53, %s7790_s22  ;;  %v9232_v40 = vor.u32 %v2876_v50, %v2875_v59  ;;  %v2957_v54 = vrot.slane %v9173_v11, 2  ;;  %v3082_v49 = vsel %vm3076_vm0, %v3065_v48, %v8956_v39  ;;  %v3048_v38 = vpop.permute.xlu1 %3047 }
 0x29d   : > { %v2721_v28 = vsel %vm2613_vm5, %v2602_v22, %v2720_v58  ;;  %v2958_v52 = vrot.slane %v9124_v57, 3  ;;  %v3265_v10 = vsel %vm3262_vm3, %v3263_v24, %v3264_v4  ;;  %v3099_v12 = vsel %vm3093_vm13, %v3082_v49, %v2884_v63  ;;  %v2968_v51 = vpop.permute.xlu0 %2967  ;;  %v7635_v58 = vld [vmem:[%s10504_s3 + $0x30] sm:$0xff]  }
 0x29e   : > { %v10589_v55 = vrot.slane %v9006_v13, 2  ;;  %v9246_v25 = vrot.slane %v8982_v19, 3  ;;  %7316 = vmatprep.mubr.bf16.mxu1 %v3265_v10  ;;  %v3116_v39 = vsel %vm3110_vm1, %v3099_v12, %v8974_v14  ;;  %v2596_v45 = vunpack.c.l.b16 %v9108_v61 }
 0x29f   : > { %v2604_v23 = vunpack.c.l.b16 %v2348_v7  ;;  %3207 = vrot.lane.b32.xlu0 %v9232_v40, %s7792_s24  ;;  %v3133_v63 = vsel %vm3127_vm14, %v3116_v39, %v2966_v15  ;;  %v10590_v1 = vunpack.c.l.b16 %v8985_v5  ;;  %v2722_v60 = vsel %vm10551_vm6, %v2603_v6, %v2721_v28  ;;  %v7638_v28 = vld [vmem:[%s10504_s3 + $0x18] sm:$0xff]  }
 0x2a0   : > { %v2911_v56 = vsel %vm2895_vm10, %v10589_v55, %v9141_v36  ;;  %v9261_v14 = vsel %vm3144_vm2, %v3133_v63, %v8997_v37  ;;  %v3067_v61 = vsel %vm3059_vm15, %v8314_v18, %v2801_v41  ;;  %v9265_v47 = vor.u32 %v2958_v52, %v2957_v54  ;;  %v7639_v55 = vld [vmem:[%s10504_s3 + $0x10] sm:$0xff]   ;;  %v2837_v63 = vpop.permute.xlu1 %2836 }
 0x2a1   : > { %2926 = vrot.lane.b32.xlu1 %v2911_v56, %s7791_s23  ;;  %v2715_v46 = vsel %vm10551_vm6, %v10590_v1, %v2714_v43  ;;  %v9269_v59 = vsel %vm3161_vm11, %v9261_v14, %v3048_v38  ;;  %v3084_v5 = vsel %vm3076_vm0, %v3067_v61, %v9054_v29  ;;  %v10591_v50 = vrot.slane %v9006_v13, 3  ;;  %v7640_v1 = vld [vmem:[%s10504_s3 + $0x8] sm:$0xff]  }
 0x2a2   : > { %7444 = vmatprep.mubr.bf16.mxu0 %v9269_v59  ;;  %v9279_v37 = vrot.slane %v9269_v59, 4  ;;  %v3101_v18 = vsel %vm3093_vm13, %v3084_v5, %v2886_v0  ;;  %v2716_v41 = vsel %vm10550_vm7, %v2596_v45, %v2715_v46  ;;  %v2723_v22 = vsel %vm10550_vm7, %v2604_v23, %v2722_v60  ;;  %v9401_v5 = vld [vmem:[%s10504_s3 + $0xb8] sm:$0xff]  }
 0x2a3   : > { %v2993_v34 = vsel %vm2977_vm12, %v10591_v50, %v9246_v25  ;;  %3211 = vrot.lane.b32.xlu0 %v9265_v47, %s7794_s26  ;;  %v3118_v29 = vsel %vm3110_vm1, %v3101_v18, %v9087_v35  ;;  %vm10592_vm7 = vsmask.f32 6400  ;;  %v9298_v15 = vpack.c.b16 %v2723_v22, %v2716_v41  ;;  %v7648_v41 = vld [vmem:[%s10504_s3 + $0x1b8] sm:$0xff]   ;;  %v10597_v22 = vld [vmem:[#allocation6_spill] sm:$0xff] }
 0x2a4   : > { %v3267_v31 = vsel %vm3262_vm3, %v3264_v4, %v9279_v37  ;;  %v3135_v53 = vsel %vm3127_vm14, %v3118_v29, %v2968_v51  ;;  %v2878_v8 = vsel %vm10592_vm7, %v9101_v32, %v9232_v40  ;;  %v3039_v0 = vrot.slane %v9173_v11, 3  ;;  %v3050_v16 = vpop.permute.xlu0 %3049  ;;  %v2921_v61 = vpop.permute.xlu1 %2920  ;;  %v7641_v51 = vld [vmem:[%s10504_s3] sm:$0xff]   ;;  %7492 = vmatprep.subr.bf16.mxu0 %v7648_v41 }
 0x2a5   : > { %3008 = vrot.lane.b32.xlu1 %v2993_v34, %s7793_s25  ;;  %7317 = vmatmul.mubr.bf16.vlgmr.msra.gmra.mxu1 %v3267_v31  ;;  %v3040_v35 = vrot.slane %v9124_v57, 4  ;;  %v9304_v4 = vsel %vm3144_vm2, %v3135_v53, %v9132_v9  ;;  %v7636_v9 = vld [vmem:[%s10504_s3 + $0x28] sm:$0xff]   ;;  %vm10593_vm7 = vsmask.f32 5376  ;;  %v9325_v11 = vrot.slane %v9298_v15, 1  ;;  %v10599_v53 = vld [vmem:[#allocation2_spill] sm:$0xff] }
 0x2a6   : > { %7333 = vmatpush3.bf16.msra.mxu1 %v9156_v20  ;;  %v9312_v32 = vsel %vm3161_vm11, %v9304_v4, %v3050_v16  ;;  %v2960_v20 = vsel %vm10593_vm7, %v9121_v21, %v9265_v47  ;;  %v7637_v21 = vld [vmem:[%s10504_s3 + $0x20] sm:$0xff]   ;;  %v9340_v24 = vrot.slane %v9298_v15, 2  ;;  %v3579_v54 = vshll.u32 %v9298_v15, 16  ;;  %v10601_v16 = vld [vmem:[#allocation3_spill] sm:$0xff] }
 0x2a7   : > { %3213 = vrot.lane.b32.xlu0 %v9246_v25, %s7793_s25  ;;  %7445 = vmatmul.mubr.bf16.vlgmr.msra.gmra.mxu0 %v9312_v32  ;;  %v9316_v57 = vrot.slane %v9312_v32, 4  ;;  %v3041_v43 = vor.u32 %v3040_v35, %v3039_v0  ;;  %v3586_v48 = vsel %vm2811_vm9, %v9115_v42, %v9325_v11  ;;  %v3589_v49 = vshrl.u32 %v9298_v15, 16  ;;  %v7651_v0 = vld [vmem:[%s10504_s3 + $0x1b0] sm:$0xff]  }
 0x2a8   : > { %7334 = vmatprep.subr.bf16.mxu1 %v7635_v58  ;;  %v9355_v52 = vrot.slane %v9298_v15, 3  ;;  %v3598_v42 = vsel %vm2895_vm10, %v9141_v36, %v9340_v24  ;;  %v3592_v12 = vrot.slane %v3579_v54, 2  ;;  %vm10594_vm7 = vsmask.f32 7424  ;;  %v3003_v34 = vpop.permute.xlu1 %3002  ;;  %7493 = vmatpush3.bf16.msra.mxu0 %v7648_v41 }
 0x2a9   : > { %2893 = vrot.lane.b32.xlu1 %v2878_v8, %s7792_s24  ;;  %v9330_v7 = vsel %vm3262_vm3, %v9279_v37, %v9316_v57  ;;  %v3042_v6 = vsel %vm3010_vm8, %v9148_v3, %v3041_v43  ;;  %v3581_v3 = vrot.slane %v3579_v54, 1  ;;  %v3591_v10 = vrot.slane %v3589_v49, 1  ;;  %7494 = vmatprep.subr.bf16.mxu0 %v7651_v0 }
 0x2aa   : > { %7335 = vmatpush3.bf16.msra.mxu1 %v7635_v58  ;;  %7320 = vmatprep.mubr.bf16.mxu1 %v9330_v7  ;;  %v3608_v56 = vsel %vm2977_vm12, %v9246_v25, %v9355_v52  ;;  %v3601_v45 = vrot.slane %v3589_v49, 2  ;;  %v3602_v23 = vrot.slane %v3579_v54, 3  ;;  %v3823_v25 = vsel %vm3010_vm8, %v7947_v44, %v8293_v33 }
 0x2ab   : > { %3043 = vrot.lane.b32.xlu0 %v7984_v30, %s7795_s12  ;;  %7336 = vmatprep.subr.bf16.mxu1 %v7636_v9  ;;  %v3582_v36 = vsel %vm10594_vm7, %v9206_v26, %v3581_v3  ;;  %v9370_v39 = vor.u32 %v3592_v12, %v3591_v10  ;;  %vm10595_vm7 = vsmask.f32 6400  ;;  %v3611_v60 = vrot.slane %v3589_v49, 3  ;;  %v7657_v12 = vld [vmem:[%s10504_s3 + $0x198] sm:$0xff]  }
 0x2ac   : > { %v9383_v46 = vor.u32 %v3602_v23, %v3601_v45  ;;  %v3612_v38 = vrot.slane %v3579_v54, 4  ;;  %vm10596_vm6 = vsmask.f32 5376  ;;  %v10598_v29 = vrot.slane %v10597_v22, 3  ;;  %7495 = vmatpush3.bf16.msra.mxu0 %v7651_v0  ;;  %v7659_v45 = vld [vmem:[%s10504_s3 + $0x190] sm:$0xff]  }
 0x2ad   : > { %2975 = vrot.lane.b32.xlu1 %v2960_v20, %s7794_s26  ;;  %v3594_v26 = vsel %vm10595_vm7, %v9232_v40, %v9370_v39  ;;  %v4037_v58 = vsel %vm2811_vm9, %v9325_v11, %v10599_v53 }
 0x2ae   : > { %7337 = vmatpush3.bf16.msra.mxu1 %v7636_v9  ;;  %v3604_v33 = vsel %vm10596_vm6, %v9265_v47, %v9383_v46  ;;  %v9393_v40 = vor.u32 %v3612_v38, %v3611_v60  ;;  %v9408_v47 = vor.u32 %v3589_v49, %v3581_v3  ;;  %v4260_v31 = vsel %vm3010_vm8, %v10598_v29, %v8460_v27  ;;  %v10600_v27 = vld [vmem:[#allocation8_spill] sm:$0xff]  ;;  %vm10603_vm6 = vmmov %vm10595_vm7 }
 0x2af   : > { %3587 = vrot.lane.b32.xlu0 %v3586_v48, %s7790_s22  ;;  %7338 = vmatprep.subr.bf16.mxu1 %v7637_v21  ;;  %v4043_v9 = vsel %vm2895_vm10, %v9340_v24, %v10601_v16  ;;  %v10602_v49 = vld [vmem:[#allocation4_spill] sm:$0xff]  ;;  %vm10605_vm7 = vsmask.f32 5376 }
 0x2b0   : > { %v3614_v50 = vsel %vm3010_vm8, %v3041_v43, %v9393_v40  ;;  %v4052_v23 = vsel %vm3010_vm8, %v9393_v40, %v7984_v30 }
 0x2b1   : > { %3057 = vrot.lane.b32.xlu1 %v3042_v6, %s7795_s12  ;;  %v7655_v6 = vld [vmem:[%s10504_s3 + $0x1a0] sm:$0xff]  }
 0x2b2   : > { %7339 = vmatpush3.bf16.msra.mxu1 %v7637_v21 }
 0x2b3   : > { %3599 = vrot.lane.b32.xlu0 %v3598_v42, %s7791_s23  ;;  %7340 = vmatprep.subr.bf16.mxu1 %v7638_v28 }
 0x2b5   : > { %3218 = vrot.lane.b32.xlu1 %v3041_v43, %s7795_s12 }
 0x2b6   : > { %7341 = vmatpush3.bf16.msra.mxu1 %v7638_v28  ;;  %v4040_v28 = vsel %vm10603_vm6, %v9370_v39, %v10602_v49  ;;  %vm10606_vm6 = vsmask.f32 7424 }
 0x2b7   : > { %3609 = vrot.lane.b32.xlu0 %v3608_v56, %s7793_s25  ;;  %7342 = vmatprep.subr.bf16.mxu1 %v7639_v55  ;;  %v2803_v18 = vpop.permute.xlu1 %2802  ;;  %v10604_v56 = vld [vmem:[#allocation5_spill] sm:$0xff] }
 0x2b8   : > { %v3069_v35 = vsel %vm3059_vm15, %v10600_v27, %v2803_v18  ;;  %v10611_v27 = vld [vmem:[#allocation11_spill] sm:$0xff] }
 0x2b9   : > { %3583 = vrot.lane.b32.xlu1 %v3582_v36, %s7796_s13  ;;  %v3086_v20 = vsel %vm3076_vm0, %v3069_v35, %v2837_v63  ;;  %v4046_v36 = vsel %vm10605_vm7, %v9383_v46, %v10604_v56  ;;  %v7661_v63 = vld [vmem:[%s10504_s3 + $0x188] sm:$0xff]  }
 0x2ba   : > { %7343 = vmatpush3.bf16.msra.mxu1 %v7639_v55 }
 0x2bb   : > { %3824 = vrot.lane.b32.xlu0 %v3823_v25, %s7795_s12  ;;  %7344 = vmatprep.subr.bf16.mxu1 %v7640_v1  ;;  %v4034_v25 = vsel %vm10606_vm6, %v9408_v47, %v10599_v53 }
 0x2bd   : > { %3595 = vrot.lane.b32.xlu1 %v3594_v26, %s7792_s24  ;;  %v7663_v26 = vld [vmem:[%s10504_s3 + $0x180] sm:$0xff]  }
 0x2be   : > { %7345 = vmatpush3.bf16.msra.mxu1 %v7640_v1 }
 0x2bf   : > { %3813 = vrot.lane.b32.xlu0 %v9325_v11, %s7790_s22  ;;  %7346 = vmatprep.subr.bf16.mxu1 %v7641_v51  ;;  %v2888_v8 = vpop.permute.xlu1 %2887  ;;  %v7653_v11 = vld [vmem:[%s10504_s3 + $0x1a8] sm:$0xff]  }
 0x2c0   : > { %v3103_v43 = vsel %vm3093_vm13, %v3086_v20, %v2888_v8  ;;  %7496 = vmatprep.subr.bf16.mxu0 %v7653_v11 }
 0x2c1   : > { %3605 = vrot.lane.b32.xlu1 %v3604_v33, %s7794_s26  ;;  %7497 = vmatpush3.bf16.msra.mxu0 %v7653_v11  ;;  %v3120_v48 = vsel %vm3110_vm1, %v3103_v43, %v2921_v61  ;;  %v2839_v55 = vpop.permute.xlu0 %2838  ;;  %v10607_v61 = vld [vmem:[#allocation9_spill] sm:$0xff]  ;;  %v10609_v33 = vld [vmem:[#allocation7_spill] sm:$0xff] }
 0x2c2   : > { %7347 = vmatpush3.bf16.msra.mxu1 %v7641_v51  ;;  %7498 = vmatprep.subr.bf16.mxu0 %v7655_v6 }
 0x2c3   : > { %3817 = vrot.lane.b32.xlu0 %v9340_v24, %s7791_s23  ;;  %7364 = vmatprep.subr.bf16.mxu1 %v9401_v5  ;;  %v4049_v24 = vsel %vm2977_vm12, %v9355_v52, %v7947_v44 }
 0x2c5   : > { %3615 = vrot.lane.b32.xlu1 %v3614_v50, %s7795_s12  ;;  %7499 = vmatpush3.bf16.msra.mxu0 %v7655_v6 }
 0x2c6   : > { %7500 = vmatprep.subr.bf16.mxu0 %v7657_v12 }
 0x2c7   : > { %3821 = vrot.lane.b32.xlu0 %v9355_v52, %s7793_s25 }
 0x2c9   : > { %3811 = vrot.lane.b32.xlu1 %v9408_v47, %s7796_s13  ;;  %7501 = vmatpush3.bf16.msra.mxu0 %v7657_v12 }
 0x2ca   : > { %7502 = vmatprep.subr.bf16.mxu0 %v7659_v45 }
 0x2cb   : > { %4261 = vrot.lane.b32.xlu0 %v4260_v31, %s7795_s12 }
 0x2cd   : > { %3815 = vrot.lane.b32.xlu1 %v9370_v39, %s7792_s24  ;;  %7503 = vmatpush3.bf16.msra.mxu0 %v7659_v45 }
 0x2ce   : > { %v2970_v21 = vpop.permute.xlu1 %2969  ;;  %7504 = vmatprep.subr.bf16.mxu0 %v7661_v63 }
 0x2cf   : > { %4038 = vrot.lane.b32.xlu0 %v4037_v58, %s7790_s22  ;;  %v3137_v54 = vsel %vm3127_vm14, %v3120_v48, %v2970_v21 }
 0x2d0   : > { %v3154_v52 = vsel %vm3144_vm2, %v3137_v54, %v3003_v34 }
 0x2d1   : > { %3819 = vrot.lane.b32.xlu1 %v9383_v46, %s7794_s26  ;;  %v2923_v1 = vpop.permute.xlu0 %2922  ;;  %7505 = vmatpush3.bf16.msra.mxu0 %v7661_v63 }
 0x2d2   : > { %7506 = vmatprep.subr.bf16.mxu0 %v7663_v26 }
 0x2d3   : > { %4044 = vrot.lane.b32.xlu0 %v4043_v9, %s7791_s23 }
 0x2d5   : > { %3826 = vrot.lane.b32.xlu1 %v9393_v40, %s7795_s12  ;;  %7507 = vmatpush3.bf16.msra.mxu0 %v7663_v26  ;;  %v10610_v40 = vrot.slane %v10609_v33, 3 }
 0x2d7   : > { %4050 = vrot.lane.b32.xlu0 %v4049_v24, %s7793_s25 }
 0x2d8   : > { %v3052_v42 = vpop.permute.xlu1 %3051 }
 0x2d9   : > { %4248 = vrot.lane.b32.xlu1 %v10599_v53, %s7796_s13  ;;  %v9466_v3 = vsel %vm3161_vm11, %v3154_v52, %v3052_v42 }
 0x2da   : > { %7448 = vmatprep.mubr.bf16.mxu0 %v9466_v3  ;;  %v9470_v10 = vrot.slane %v9466_v3, 4  ;;  %v3005_v46 = vpop.permute.xlu0 %3004 }
 0x2db   : > { %4041 = vrot.lane.b32.xlu0 %v4040_v28, %s7792_s24 }
 0x2dc   : > { %v9481_v39 = vsel %vm3262_vm3, %v9316_v57, %v9470_v10 }
 0x2dd   : > { %4250 = vrot.lane.b32.xlu1 %v10599_v53, %s7790_s22  ;;  %7321 = vmatmul.mubr.bf16.gmra.mxu1 %v9481_v39 }
 0x2df   : > { %4047 = vrot.lane.b32.xlu0 %v4046_v36, %s7794_s26 }
 0x2e1   : > { %4252 = vrot.lane.b32.xlu1 %v10602_v49, %s7792_s24 }
 0x2e3   : > { %4053 = vrot.lane.b32.xlu0 %v4052_v23, %s7795_s12 }
 0x2e5   : > { %4254 = vrot.lane.b32.xlu1 %v10601_v16, %s7791_s23 }
 0x2e7   : > { %4263 = vrot.lane.b32.xlu0 %v7984_v30, %s7795_s12  ;;  %v10608_v30 = vld [vmem:[#allocation10_spill] sm:$0xff] }
 0x2e8   : > { %v4649_v50 = vsel %vm3010_vm8, %v10610_v40, %v10608_v30 }
 0x2e9   : > { %4035 = vrot.lane.b32.xlu1 %v4034_v25, %s7796_s13 }
 0x2ed   : > { %4256 = vrot.lane.b32.xlu1 %v10604_v56, %s7794_s26  ;;  %v2805_v60 = vpop.permute.xlu0 %2804 }
 0x2ee   : > { %v3071_v51 = vsel %vm3059_vm15, %v10607_v61, %v2805_v60 }
 0x2ef   : > { %v3088_v34 = vsel %vm3076_vm0, %v3071_v51, %v2839_v55 }
 0x2f1   : > { %4258 = vrot.lane.b32.xlu1 %v7947_v44, %s7793_s25  ;;  %v2841_v38 = vpop.permute.xlu1 %2840 }
 0x2f3   : > { %v2890_v47 = vpop.permute.xlu0 %2889 }
 0x2f4   : > { %v3105_v41 = vsel %vm3093_vm13, %v3088_v34, %v2890_v47 }
 0x2f5   : > { %4650 = vrot.lane.b32.xlu1 %v4649_v50, %s7795_s12  ;;  %v2925_v18 = vpop.permute.xlu1 %2924  ;;  %v3122_v22 = vsel %vm3110_vm1, %v3105_v41, %v2923_v1 }
 0x2f7   : > { %v2972_v44 = vpop.permute.xlu0 %2971 }
 0x2f8   : > { %v3139_v31 = vsel %vm3127_vm14, %v3122_v22, %v2972_v44 }
 0x2f9   : > { %v3007_v29 = vpop.permute.xlu1 %3006  ;;  %v3156_v53 = vsel %vm3144_vm2, %v3139_v31, %v3005_v46 }
 0x2fb   : > { %v3054_v58 = vpop.permute.xlu0 %3053 }
 0x2fc   : > { %v9525_v0 = vsel %vm3161_vm11, %v3156_v53, %v3054_v58 }
 0x2fd   : > { %7449 = vmatmul.mubr.bf16.gmra.mxu0 %v9525_v0  ;;  %v3272_v16 = vrot.slane %v9525_v0, 4 }
 0x2fe   : > { %v2807_v8 = vpop.permute.xlu1 %2806 }
 0x2ff   : > { %v3073_v35 = vsel %vm3059_vm15, %v10611_v27, %v2807_v8  ;;  %v9533_v9 = vsel %vm3262_vm3, %v9470_v10, %v3272_v16  ;;  %v3206_v20 = vpop.permute.xlu0 %3205 }
 0x300   : > { %v3090_v11 = vsel %vm3076_vm0, %v3073_v35, %v2841_v38  ;;  %7324 = vmatprep.mubr.bf16.mxu1 %v9533_v9 }
 0x302   : > { %v2892_v43 = vpop.permute.xlu1 %2891 }
 0x303   : > { %v3107_v21 = vsel %vm3093_vm13, %v3090_v11, %v2892_v43 }
 0x304   : > { %v3210_v24 = vpop.permute.xlu0 %3209  ;;  %v3124_v48 = vsel %vm3110_vm1, %v3107_v21, %v2925_v18 }
 0x306   : > { %v2974_v6 = vpop.permute.xlu1 %2973 }
 0x307   : > { %v3141_v54 = vsel %vm3127_vm14, %v3124_v48, %v2974_v6 }
 0x308   : > { %v3158_v28 = vsel %vm3144_vm2, %v3141_v54, %v3007_v29 }
 0x309   : > { %v2809_v49 = vpop.permute.xlu0 %2808 }
 0x30a   : > { %v3056_v52 = vpop.permute.xlu1 %3055  ;;  %v3075_v25 = vsel %vm3059_vm15, %v9006_v13, %v2809_v49  ;;  %v7643_v49 = vld [vmem:[%s10504_s3 + $0xb0] sm:$0xff]  }
 0x30b   : > { %v9542_v42 = vsel %vm3161_vm11, %v3158_v28, %v3056_v52 }
 0x30c   : > { %7452 = vmatprep.mubr.bf16.mxu0 %v9542_v42  ;;  %v3274_v12 = vrot.slane %v9542_v42, 4 }
 0x30d   : > { %v3204_v55 = vpop.permute.xlu0 %3203 }
 0x30e   : > { %v2843_v56 = vpop.permute.xlu1 %2842  ;;  %v9547_v36 = vsel %vm3262_vm3, %v3272_v16, %v3274_v12  ;;  %v3221_v61 = vsel %vm3059_vm15, %v8982_v19, %v3204_v55 }
 0x30f   : > { %7325 = vmatmul.mubr.bf16.gmra.mxu1 %v9547_v36  ;;  %v3092_v26 = vsel %vm3076_vm0, %v3075_v25, %v2843_v56  ;;  %v3223_v50 = vsel %vm3076_vm0, %v3221_v61, %v3206_v20 }
 0x311   : > { %v3208_v45 = vpop.permute.xlu0 %3207 }
 0x312   : > { %v3225_v34 = vsel %vm3093_vm13, %v3223_v50, %v3208_v45 }
 0x313   : > { %v2927_v23 = vpop.permute.xlu1 %2926  ;;  %v3227_v22 = vsel %vm3110_vm1, %v3225_v34, %v3210_v24 }
 0x315   : > { %v3212_v63 = vpop.permute.xlu0 %3211 }
 0x316   : > { %v3229_v29 = vsel %vm3127_vm14, %v3227_v22, %v3212_v63 }
 0x317   : > { %v3009_v1 = vpop.permute.xlu1 %3008 }
 0x319   : > { %v3214_v46 = vpop.permute.xlu0 %3213 }
 0x31a   : > { %v3231_v31 = vsel %vm3144_vm2, %v3229_v29, %v3214_v46  ;;  %v7646_v46 = vld [vmem:[%s10504_s3 + $0x98] sm:$0xff]   ;;  %v7650_v29 = vld [vmem:[%s10504_s3 + $0x80] sm:$0xff]  }
 0x31b   : > { %v2894_v60 = vpop.permute.xlu1 %2893 }
 0x31c   : > { %v3109_v38 = vsel %vm3093_vm13, %v3092_v26, %v2894_v60 }
 0x31d   : > { %v3044_v51 = vpop.permute.xlu0 %3043  ;;  %v3126_v33 = vsel %vm3110_vm1, %v3109_v38, %v2927_v23 }
 0x31e   : > { %v9583_v21 = vsel %vm3161_vm11, %v9214_v62, %v3044_v51 }
 0x31f   : > { %v2976_v30 = vpop.permute.xlu1 %2975 }
 0x320   : > { %v3143_v40 = vsel %vm3127_vm14, %v3126_v33, %v2976_v30  ;;  %v7647_v30 = vld [vmem:[%s10504_s3 + $0x90] sm:$0xff]  }
 0x321   : > { %v3588_v13 = vpop.permute.xlu0 %3587  ;;  %v3160_v18 = vsel %vm3144_vm2, %v3143_v40, %v3009_v1 }
 0x323   : > { %v3058_v47 = vpop.permute.xlu1 %3057 }
 0x324   : > { %v9562_v41 = vsel %vm3161_vm11, %v3160_v18, %v3058_v47 }
 0x325   : > { %7453 = vmatmul.mubr.bf16.gmra.mxu0 %v9562_v41  ;;  %v9567_v44 = vrot.slane %v9562_v41, 4  ;;  %v3600_v53 = vpop.permute.xlu0 %3599 }
 0x327   : > { %v3219_v58 = vpop.permute.xlu1 %3218  ;;  %v9573_v8 = vsel %vm3262_vm3, %v3274_v12, %v9567_v44  ;;  %v7644_v12 = vld [vmem:[%s10504_s3 + $0xa8] sm:$0xff]  }
 0x328   : > { %v3235_v27 = vsel %vm3161_vm11, %v3231_v31, %v3219_v58  ;;  %7328 = vmatprep.mubr.bf16.mxu1 %v9573_v8  ;;  %v7652_v58 = vld [vmem:[%s10504_s3 + $0xf8] sm:$0xff]  }
 0x329   : > { %v3278_v35 = vrot.slane %v3235_v27, 4  ;;  %v3610_v16 = vpop.permute.xlu0 %3609 }
 0x32b   : > { %v3584_v20 = vpop.permute.xlu1 %3583  ;;  %v3279_v11 = vsel %vm3262_vm3, %v9567_v44, %v3278_v35 }
 0x32c   : > { %v3618_v43 = vsel %vm3059_vm15, %v8982_v19, %v3584_v20  ;;  %7329 = vmatmul.mubr.bf16.gmra.mxu1 %v3279_v11  ;;  %v7654_v20 = vld [vmem:[%s10504_s3 + $0xf0] sm:$0xff]  }
 0x32d   : > { %7348 = vmatprep.mubr.bf16.mxu1 %v9583_v21  ;;  %v9586_v24 = vpop.permute.xlu0 %3824  ;;  %v3620_v6 = vsel %vm3076_vm0, %v3618_v43, %v3588_v13  ;;  %v7649_v13 = vld [vmem:[%s10504_s3 + $0x88] sm:$0xff]  }
 0x32f   : > { %v3596_v48 = vpop.permute.xlu1 %3595 }
 0x330   : > { %v3622_v54 = vsel %vm3093_vm13, %v3620_v6, %v3596_v48  ;;  %v7656_v48 = vld [vmem:[%s10504_s3 + $0xe8] sm:$0xff]  }
 0x331   : > { %v3814_v28 = vpop.permute.xlu0 %3813  ;;  %v3624_v52 = vsel %vm3110_vm1, %v3622_v54, %v3600_v53 }
 0x333   : > { %v3606_v19 = vpop.permute.xlu1 %3605 }
 0x334   : > { %v3626_v62 = vsel %vm3127_vm14, %v3624_v52, %v3606_v19  ;;  %7349 = vmatmul.mubr.bf16.vlgmr.msra.gmra.mxu1 %v9200_v2 }
 0x335   : > { %7365 = vmatpush3.bf16.msra.mxu1 %v9401_v5  ;;  %7352 = vmatprep.mubr.bf16.mxu1 %v9269_v59  ;;  %v3818_v55 = vpop.permute.xlu0 %3817  ;;  %v3628_v45 = vsel %vm3144_vm2, %v3626_v62, %v3610_v16  ;;  %v7645_v5 = vld [vmem:[%s10504_s3 + $0xa0] sm:$0xff]  }
 0x336   : > { %7366 = vmatprep.subr.bf16.mxu1 %v7643_v49 }
 0x337   : > { %v3616_v56 = vpop.permute.xlu1 %3615 }
 0x338   : > { %v9603_v23 = vsel %vm3161_vm11, %v3628_v45, %v3616_v56 }
 0x339   : > { %7367 = vmatpush3.bf16.msra.mxu1 %v7643_v49  ;;  %7456 = vmatprep.mubr.bf16.mxu0 %v9603_v23  ;;  %v3822_v63 = vpop.permute.xlu0 %3821  ;;  %v7658_v49 = vld [vmem:[%s10504_s3 + $0xe0] sm:$0xff]  }
 0x33a   : > { %7368 = vmatprep.subr.bf16.mxu1 %v7644_v12 }
 0x33b   : > { %v3812_v1 = vpop.permute.xlu1 %3811 }
 0x33c   : > { %v3829_v25 = vsel %vm3059_vm15, %v9298_v15, %v3812_v1  ;;  %7353 = vmatmul.mubr.bf16.gmra.mxu1 %v9312_v32  ;;  %v3841_v1 = vsel %vm3161_vm11, %v9194_v17, %v9586_v24  ;;  %v7666_v24 = vld [vmem:[%s10504_s3 + $0x178] sm:$0xff]  }
 0x33d   : > { %7369 = vmatpush3.bf16.msra.mxu1 %v7644_v12  ;;  %7356 = vmatprep.mubr.bf16.mxu1 %v9466_v3  ;;  %v3831_v26 = vsel %vm3076_vm0, %v3829_v25, %v3814_v28  ;;  %v9617_v60 = vpop.permute.xlu0 %4261  ;;  %v7660_v12 = vld [vmem:[%s10504_s3 + $0xd8] sm:$0xff]   ;;  %v7664_v25 = vld [vmem:[%s10504_s3 + $0xc8] sm:$0xff]  }
 0x33e   : > { %7370 = vmatprep.subr.bf16.mxu1 %v7645_v5 }
 0x33f   : > { %v3816_v38 = vpop.permute.xlu1 %3815 }
 0x340   : > { %v3833_v61 = vsel %vm3093_vm13, %v3831_v26, %v3816_v38  ;;  %v3864_v26 = vrot.slane %v3841_v1, 4  ;;  %v4278_v38 = vsel %vm3161_vm11, %v9261_v14, %v9617_v60  ;;  %v7674_v60 = vld [vmem:[%s10504_s3 + $0x1f8] sm:$0xff]  }
 0x341   : > { %7371 = vmatpush3.bf16.msra.mxu1 %v7645_v5  ;;  %v3835_v51 = vsel %vm3110_vm1, %v3833_v61, %v3818_v55  ;;  %v4039_v33 = vpop.permute.xlu0 %4038 }
 0x342   : > { %7372 = vmatprep.subr.bf16.mxu1 %v7646_v46  ;;  %v3865_v17 = vsel %vm3262_vm3, %v3864_v26, %v9279_v37  ;;  %v7668_v37 = vld [vmem:[%s10504_s3 + $0x168] sm:$0xff]  }
 0x343   : > { %v3820_v40 = vpop.permute.xlu1 %3819 }
 0x344   : > { %v3837_v50 = vsel %vm3127_vm14, %v3835_v51, %v3820_v40  ;;  %7357 = vmatmul.mubr.bf16.gmra.mxu1 %v9525_v0  ;;  %v4301_v51 = vrot.slane %v4278_v38, 4 }
 0x345   : > { %7373 = vmatpush3.bf16.msra.mxu1 %v7646_v46  ;;  %7360 = vmatprep.mubr.bf16.mxu1 %v9542_v42  ;;  %v3839_v34 = vsel %vm3144_vm2, %v3837_v50, %v3822_v63  ;;  %v4045_v22 = vpop.permute.xlu0 %4044  ;;  %v7662_v63 = vld [vmem:[%s10504_s3 + $0xd0] sm:$0xff]   ;;  %v7677_v50 = vld [vmem:[%s10504_s3 + $0x1e0] sm:$0xff]  }
 0x346   : > { %7374 = vmatprep.subr.bf16.mxu1 %v7647_v30  ;;  %v4302_v14 = vsel %vm3262_vm3, %v4301_v51, %v9316_v57  ;;  %v7676_v57 = vld [vmem:[%s10504_s3 + $0x1e8] sm:$0xff]  }
 0x347   : > { %v3827_v47 = vpop.permute.xlu1 %3826 }
 0x348   : > { %v9632_v18 = vsel %vm3161_vm11, %v3839_v34, %v3827_v47 }
 0x349   : > { %7375 = vmatpush3.bf16.msra.mxu1 %v7647_v30  ;;  %v4051_v27 = vpop.permute.xlu0 %4050  ;;  %v3868_v61 = vrot.slane %v9632_v18, 4 }
 0x34a   : > { %7376 = vmatprep.subr.bf16.mxu1 %v7649_v13 }
 0x34b   : > { %v4249_v31 = vpop.permute.xlu1 %4248 }
 0x34c   : > { %7361 = vmatmul.mubr.bf16.gmra.mxu1 %v9562_v41  ;;  %v4266_v53 = vsel %vm3059_vm15, 0, %v4249_v31  ;;  %v7679_v31 = vld [vmem:[%s10504_s3 + $0x1d0] sm:$0xff]  }
 0x34d   : > { %7377 = vmatpush3.bf16.msra.mxu1 %v7649_v13  ;;  %7380 = vmatprep.mubr.bf16.mxu1 %v9200_v2  ;;  %v4042_v2 = vpop.permute.xlu0 %4041  ;;  %v7678_v13 = vld [vmem:[%s10504_s3 + $0x1d8] sm:$0xff]  }
 0x34e   : > { %7378 = vmatprep.subr.bf16.mxu1 %v7650_v29 }
 0x34f   : > { %v4251_v35 = vpop.permute.xlu1 %4250 }
 0x350   : > { %v4268_v16 = vsel %vm3076_vm0, %v4266_v53, %v4251_v35  ;;  %v7680_v35 = vld [vmem:[%s10504_s3 + $0x1c8] sm:$0xff]  }
 0x351   : > { %7379 = vmatpush3.bf16.msra.mxu1 %v7650_v29 }
 0x352   : > { %7396 = vmatprep.subr.bf16.mxu1 %v7652_v58 }
 0x353   : > { %v4253_v11 = vpop.permute.xlu1 %4252 }
 0x354   : > { %v4270_v43 = vsel %vm3093_vm13, %v4268_v16, %v4253_v11  ;;  %7381 = vmatmul.mubr.bf16.vlgmr.msra.gmra.mxu1 %v9269_v59  ;;  %v4048_v59 = vpop.permute.xlu0 %4047  ;;  %v7681_v11 = vld [vmem:[%s10504_s3 + $0x1c0] sm:$0xff]  }
 0x355   : > { %7397 = vmatpush3.bf16.msra.mxu1 %v7652_v58  ;;  %7384 = vmatprep.mubr.bf16.mxu1 %v9312_v32 }
 0x356   : > { %7398 = vmatprep.subr.bf16.mxu1 %v7654_v20 }
 0x357   : > { %v4255_v6 = vpop.permute.xlu1 %4254 }
 0x358   : > { %v9654_v54 = vsel %vm3110_vm1, %v4270_v43, %v4255_v6  ;;  %v4054_v45 = vpop.permute.xlu0 %4053 }
 0x359   : > { %7399 = vmatpush3.bf16.msra.mxu1 %v7654_v20 }
 0x35a   : > { %7400 = vmatprep.subr.bf16.mxu1 %v7656_v48 }
 0x35b   : > { %v4036_v28 = vpop.permute.xlu1 %4035 }
 0x35c   : > { %v4056_v19 = vsel %vm3059_vm15, %v9298_v15, %v4036_v28  ;;  %7385 = vmatmul.mubr.bf16.gmra.mxu1 %v9466_v3  ;;  %vm10618_vm15 = vcmask 1043459  }
 0x35d   : > { %v4058_v52 = vsel %vm3076_vm0, %v4056_v19, %v4039_v33  ;;  %7401 = vmatpush3.bf16.msra.mxu1 %v7656_v48  ;;  %7388 = vmatprep.mubr.bf16.mxu1 %v9525_v0  ;;  %v7675_v33 = vld [vmem:[%s10504_s3 + $0x1f0] sm:$0xff]  }
 0x35e   : > { %v4060_v62 = vsel %vm3093_vm13, %v4058_v52, %v4042_v2  ;;  %7402 = vmatprep.subr.bf16.mxu1 %v7658_v49  ;;  %v4675_v2 = vrot.slane %v9583_v21, 4  ;;  %vm10616_vm13 = vcmask 1041409  }
 0x35f   : > { %v4062_v55 = vsel %vm3110_vm1, %v4060_v62, %v4045_v22  ;;  %v4257_v40 = vpop.permute.xlu1 %4256  ;;  %v4264_v22 = vpop.permute.xlu0 %4263  ;;  %vm10619_vm7 = vmmov %vm10616_vm13 }
 0x360   : > { %v4064_v56 = vsel %vm3127_vm14, %v4062_v55, %v4048_v59 }
 0x361   : > { %7403 = vmatpush3.bf16.msra.mxu1 %v7658_v49  ;;  %v4066_v15 = vsel %vm3144_vm2, %v4064_v56, %v4051_v27 }
 0x362   : > { %7404 = vmatprep.subr.bf16.mxu1 %v7660_v12  ;;  %v9672_v5 = vsel %vm3161_vm11, %v4066_v15, %v4054_v45 }
 0x363   : > { %7457 = vmatmul.mubr.bf16.gmra.mxu0 %v9672_v5  ;;  %v4259_v34 = vpop.permute.xlu1 %4258  ;;  %v4303_v47 = vrot.slane %v9672_v5, 4 }
 0x364   : > { %7508 = vmatprep.mubr.bf16.mxu0 %v9312_v32  ;;  %7389 = vmatmul.mubr.bf16.gmra.mxu1 %v9542_v42  ;;  %v7665_v32 = vld [vmem:[%s10504_s3 + $0xc0] sm:$0xff]  }
 0x365   : > { %7405 = vmatpush3.bf16.msra.mxu1 %v7660_v12  ;;  %7392 = vmatprep.mubr.bf16.mxu1 %v9562_v41  ;;  %v7318_v48 = vpop.f32.mrf.mxu1  ;;  %v4676_v6 = vsel %vm3262_vm3, %v4303_v47, %v4675_v2 }
 0x366   : > { %7406 = vmatprep.subr.bf16.mxu1 %v7662_v63 }
 0x367   : > { %v4651_v29 = vpop.permute.xlu1 %4650 }
 0x368   : > { %v4653_v27 = vsel %vm3161_vm11, %v9304_v4, %v4651_v29 }
 0x369   : > { %7407 = vmatpush3.bf16.msra.mxu1 %v7662_v63  ;;  %v4673_v20 = vrot.slane %v4653_v27, 4 }
 0x36a   : > { %7408 = vmatprep.subr.bf16.mxu1 %v7664_v25 }
 0x36b   : > { %7509 = vmatmul.mubr.bf16.vlgmr.msra.gmra.mxu0 %v9466_v3  ;;  %v7667_v3 = vld [vmem:[%s10504_s3 + $0x170] sm:$0xff]   ;;  %v4674_v4 = vsel %vm3262_vm3, %v4673_v20, %v9470_v10  ;;  %v3370_v10 = vpop.f32.mrf.mxu1 }
 0x36c   : > { %7393 = vmatmul.mubr.bf16.gmra.mxu1 %v9603_v23  ;;  %7512 = vmatprep.mubr.bf16.mxu0 %v9525_v0  ;;  %v7669_v0 = vld [vmem:[%s10504_s3 + $0x160] sm:$0xff]  }
 0x36d   : > { %7409 = vmatpush3.bf16.msra.mxu1 %v7664_v25  ;;  %7412 = vmatprep.mubr.bf16.mxu1 %v3865_v17 }
 0x36e   : > { %7410 = vmatprep.subr.bf16.mxu1 %v7665_v32 }
 0x371   : > { %7411 = vmatpush3.bf16.msra.mxu1 %v7665_v32 }
 0x372   : > { %7460 = vmatprep.subr.bf16.mxu1 %v7666_v24 }
 0x373   : > { %7513 = vmatmul.mubr.bf16.gmra.mxu0 %v9542_v42  ;;  %v3866_v42 = vrot.slane %v9603_v23, 4 }
 0x374   : > { %7413 = vmatmul.mubr.bf16.vlgmr.msra.gmra.mxu1 %v9330_v7  ;;  %7516 = vmatprep.mubr.bf16.mxu0 %v9562_v41  ;;  %v7670_v7 = vld [vmem:[%s10504_s3 + $0x158] sm:$0xff]   ;;  %v7671_v41 = vld [vmem:[%s10504_s3 + $0x150] sm:$0xff]  }
 0x375   : > { %7461 = vmatpush3.bf16.msra.mxu1 %v7666_v24  ;;  %7416 = vmatprep.mubr.bf16.mxu1 %v9481_v39  ;;  %v9726_v46 = vsel %vm3262_vm3, %v9567_v44, %v3866_v42  ;;  %v7673_v44 = vld [vmem:[%s10504_s3 + $0x140] sm:$0xff]   ;;  %v3869_v30 = vsel %vm3262_vm3, %v3866_v42, %v3868_v61  ;;  %v4304_v58 = vsel %vm3262_vm3, %v3866_v42, %v4303_v47 }
 0x376   : > { %7462 = vmatprep.subr.bf16.mxu1 %v7667_v3 }
 0x379   : > { %7463 = vmatpush3.bf16.msra.mxu1 %v7667_v3 }
 0x37a   : > { %7464 = vmatprep.subr.bf16.mxu1 %v7668_v37 }
 0x37b   : > { %7517 = vmatmul.mubr.bf16.gmra.mxu0 %v9603_v23  ;;  %v7672_v23 = vld [vmem:[%s10504_s3 + $0x148] sm:$0xff]  }
 0x37c   : > { %7417 = vmatmul.mubr.bf16.gmra.mxu1 %v9533_v9  ;;  %7520 = vmatprep.mubr.bf16.mxu0 %v9672_v5 }
 0x37d   : > { %7465 = vmatpush3.bf16.msra.mxu1 %v7668_v37  ;;  %7420 = vmatprep.mubr.bf16.mxu1 %v9547_v36 }
 0x37e   : > { %7466 = vmatprep.subr.bf16.mxu1 %v7669_v0 }
 0x381   : > { %7467 = vmatpush3.bf16.msra.mxu1 %v7669_v0 }
 0x382   : > { %7468 = vmatprep.subr.bf16.mxu1 %v7670_v7 }
 0x383   : > { %7521 = vmatmul.mubr.bf16.gmra.mxu0 %v9583_v21 }
 0x384   : > { %7421 = vmatmul.mubr.bf16.gmra.mxu1 %v9573_v8 }
 0x385   : > { %7469 = vmatpush3.bf16.msra.mxu1 %v7670_v7  ;;  %7424 = vmatprep.mubr.bf16.mxu1 %v9726_v46 }
 0x386   : > { %7470 = vmatprep.subr.bf16.mxu1 %v7671_v41 }
 0x389   : > { %7471 = vmatpush3.bf16.msra.mxu1 %v7671_v41 }
 0x38a   : > { %7472 = vmatprep.subr.bf16.mxu1 %v7672_v23 }
 0x38c   : > { %7425 = vmatmul.mubr.bf16.gmra.mxu1 %v3869_v30 }
 0x38d   : > { %7473 = vmatpush3.bf16.msra.mxu1 %v7672_v23  ;;  %7476 = vmatprep.mubr.bf16.mxu1 %v4302_v14 }
 0x38e   : > { %7474 = vmatprep.subr.bf16.mxu1 %v7673_v44 }
 0x391   : > { %7475 = vmatpush3.bf16.msra.mxu1 %v7673_v44 }
 0x392   : > { %7524 = vmatprep.subr.bf16.mxu1 %v7674_v60 }
 0x394   : > { %7477 = vmatmul.mubr.bf16.vlgmr.msra.gmra.mxu1 %v9481_v39  ;;  %v4274_v39 = vsel %vm3127_vm14, %v9654_v54, %v4257_v40  ;;  %v7319_v54 = vpop.f32.mrf.mxu1  ;;  %vm10617_vm14 = vcmask 1042434  }
 0x395   : > { %7525 = vmatpush3.bf16.msra.mxu1 %v7674_v60  ;;  %7480 = vmatprep.mubr.bf16.mxu1 %v9533_v9  ;;  %v4276_v18 = vsel %vm3144_vm2, %v4274_v39, %v4259_v34  ;;  %vm10620_vm6 = vmmov %vm10617_vm14 }
 0x396   : > { %7526 = vmatprep.subr.bf16.mxu1 %v7675_v33  ;;  %v4280_v53 = vsel %vm3161_vm11, %v4276_v18, %v4264_v22  ;;  %v3373_v59 = vpop.f32.mrf.mxu1  ;;  %v9789_v22 = vpop.f32.mrf.mxu0  ;;  %vm4913_vm11 = vcmask 257024  }
 0x397   : > { %v4305_v16 = vrot.slane %v4280_v53, 4 }
 0x399   : > { %7527 = vmatpush3.bf16.msra.mxu1 %v7675_v33  ;;  %v4306_v43 = vsel %vm3262_vm3, %v4303_v47, %v4305_v16  ;;  %v4677_v49 = vsel %vm3262_vm3, %v4675_v2, %v4305_v16  ;;  %v9791_v16 = vpop.f32.mrf.mxu0 }
 0x39a   : > { %7528 = vmatprep.subr.bf16.mxu1 %v7676_v57 }
 0x39c   : > { %7481 = vmatmul.mubr.bf16.gmra.mxu1 %v9547_v36 }
 0x39d   : > { %7529 = vmatpush3.bf16.msra.mxu1 %v7676_v57  ;;  %7484 = vmatprep.mubr.bf16.mxu1 %v9573_v8 }
 0x39e   : > { %7530 = vmatprep.subr.bf16.mxu1 %v7677_v50 }
 0x3a1   : > { %7531 = vmatpush3.bf16.msra.mxu1 %v7677_v50 }
 0x3a2   : > { %7532 = vmatprep.subr.bf16.mxu1 %v7678_v13 }
 0x3a4   : > { %7485 = vmatmul.mubr.bf16.gmra.mxu1 %v9726_v46 }
 0x3a5   : > { %7533 = vmatpush3.bf16.msra.mxu1 %v7678_v13  ;;  %7488 = vmatprep.mubr.bf16.mxu1 %v4304_v58 }
 0x3a6   : > { %7534 = vmatprep.subr.bf16.mxu1 %v7679_v31 }
 0x3a9   : > { %7535 = vmatpush3.bf16.msra.mxu1 %v7679_v31 }
 0x3aa   : > { %7536 = vmatprep.subr.bf16.mxu1 %v7680_v35 }
 0x3ac   : > { %7489 = vmatmul.mubr.bf16.gmra.mxu1 %v4306_v43 }
 0x3ad   : > { %7537 = vmatpush3.bf16.msra.mxu1 %v7680_v35  ;;  %7540 = vmatprep.mubr.bf16.mxu1 %v4674_v4 }
 0x3ae   : > { %7538 = vmatprep.subr.bf16.mxu1 %v7681_v11 }
 0x3b1   : > { %7539 = vmatpush3.bf16.msra.mxu1 %v7681_v11 }
 0x3b4   : > { %7541 = vmatmul.mubr.bf16.vlgmr.msra.gmra.mxu1 %v9533_v9  ;;  %v7322_v9 = vpop.f32.mrf.mxu1 }
 0x3b5   : > { %7544 = vmatprep.mubr.bf16.mxu1 %v9547_v36 }
 0x3b6   : > { %v3386_v28 = vpop.f32.mrf.mxu1 }
 0x3b8   : > { %v7323_v36 = vpop.f32.mrf.mxu1 }
 0x3ba   : > { %v3389_v19 = vpop.f32.mrf.mxu1 }
 0x3bc   : > { %7545 = vmatmul.mubr.bf16.gmra.mxu1 %v9573_v8 }
 0x3bd   : > { %7548 = vmatprep.mubr.bf16.mxu1 %v9726_v46 }
 0x3c4   : > { %7549 = vmatmul.mubr.bf16.gmra.mxu1 %v4304_v58 }
 0x3c5   : > { %7552 = vmatprep.mubr.bf16.mxu1 %v4676_v6  ;;  %v9793_v6 = vpop.f32.mrf.mxu0 }
 0x3cc   : > { %7553 = vmatmul.mubr.bf16.gmra.mxu1 %v4677_v49 }
 0x3cf   : > { %v7326_v8 = vpop.f32.mrf.mxu1 }
 0x3d1   : > { %v3402_v52 = vpop.f32.mrf.mxu1 }
 0x3d3   : > { %v7327_v62 = vpop.f32.mrf.mxu1 }
 0x3d5   : > { %v3405_v12 = vpop.f32.mrf.mxu1 }
 0x3ec   : > { %v7330_v21 = vpop.f32.mrf.mxu1 }
 0x3ee   : > { %v3418_v55 = vpop.f32.mrf.mxu1 }
 0x3f0   : > { %v7331_v56 = vpop.f32.mrf.mxu1 }
 0x3f2   : > { %v3421_v45 = vpop.f32.mrf.mxu1 }
 0x3f4   : > { %v7350_v15 = vpop.f32.mrf.mxu1 }
 0x3f5   : > { %v3524_v33 = vadd.f32 %v7350_v15, %v7318_v48 }
 0x3f6   : > { %v3515_v5 = vpop.f32.mrf.mxu1 }
 0x3f7   : > { %v3516_v50 = vadd.f32 %v3515_v5, %v3370_v10 }
 0x3f8   : > { %v7351_v63 = vpop.f32.mrf.mxu1 }
 0x3f9   : > { %v3527_v13 = vadd.f32 %v7351_v63, %v7319_v54 }
 0x3fa   : > { %v3518_v1 = vpop.f32.mrf.mxu1 }
 0x3fb   : > { %v3519_v29 = vadd.f32 %v3518_v1, %v3373_v59  ;;  %v9795_v59 = vpop.f32.mrf.mxu0 }
 0x3fc   : > { %v7354_v25 = vpop.f32.mrf.mxu1 }
 0x3fd   : > { %v3540_v58 = vadd.f32 %v7354_v25, %v7322_v9 }
 0x3fe   : > { %v3531_v26 = vpop.f32.mrf.mxu1 }
 0x3ff   : > { %v3532_v20 = vadd.f32 %v3531_v26, %v3386_v28 }
 0x400   : > { %v7355_v32 = vpop.f32.mrf.mxu1 }
 0x401   : > { %v3543_v4 = vadd.f32 %v7355_v32, %v7323_v36 }
 0x402   : > { %v3534_v17 = vpop.f32.mrf.mxu1 }
 0x403   : > { %v3535_v24 = vadd.f32 %v3534_v17, %v3389_v19 }
 0x404   : > { %v7358_v3 = vpop.f32.mrf.mxu1 }
 0x405   : > { %v3556_v37 = vadd.f32 %v7358_v3, %v7326_v8 }
 0x406   : > { %v3547_v0 = vpop.f32.mrf.mxu1 }
 0x407   : > { %v3548_v7 = vadd.f32 %v3547_v0, %v3402_v52  ;;  %v9797_v52 = vpop.f32.mrf.mxu0 }
 0x408   : > { %v7359_v42 = vpop.f32.mrf.mxu1 }
 0x409   : > { %v3559_v41 = vadd.f32 %v7359_v42, %v7327_v62 }
 0x40a   : > { %v3550_v46 = vpop.f32.mrf.mxu1 }
 0x40b   : > { %v3551_v38 = vadd.f32 %v3550_v46, %v3405_v12 }
 0x40c   : > { %v7362_v23 = vpop.f32.mrf.mxu1 }
 0x40d   : > { %v3572_v61 = vadd.f32 %v7362_v23, %v7330_v21  ;;  %v9803_v21 = vpop.f32.mrf.mxu0 }
 0x40e   : > { %v3563_v51 = vpop.f32.mrf.mxu1 }
 0x40f   : > { %v3564_v44 = vadd.f32 %v3563_v51, %v3418_v55  ;;  %v9807_v5 = vpop.f32.mrf.mxu0 }
 0x410   : > { %v7363_v30 = vpop.f32.mrf.mxu1 }
 0x411   : > { %v3575_v14 = vadd.f32 %v7363_v30, %v7331_v56  ;;  %v9809_v32 = vpop.f32.mrf.mxu0 }
 0x412   : > { %v3566_v60 = vpop.f32.mrf.mxu1 }
 0x413   : > { %v3567_v40 = vadd.f32 %v3566_v60, %v3421_v45  ;;  %v9811_v3 = vpop.f32.mrf.mxu0 }
 0x414   : > { %v7382_v57 = vpop.f32.mrf.mxu1 }
 0x415   : > { %v3796_v34 = vadd.f32 %v7382_v57, %v3524_v33 }
 0x416   : > { %v3731_v39 = vpop.f32.mrf.mxu1 }
 0x417   : > { %v3794_v47 = vadd.f32 %v3731_v39, %v3516_v50 }
 0x418   : > { %v7383_v18 = vpop.f32.mrf.mxu1 }
 0x419   : > { %v3797_v31 = vadd.f32 %v7383_v18, %v3527_v13 }
 0x41a   : > { %v3734_v53 = vpop.f32.mrf.mxu1 }
 0x41b   : > { %v3795_v27 = vadd.f32 %v3734_v53, %v3519_v29 }
 0x41c   : > { %v7386_v35 = vpop.f32.mrf.mxu1 }
 0x41d   : > { %v3800_v11 = vadd.f32 %v7386_v35, %v3540_v58 }
 0x41e   : > { %v3747_v43 = vpop.f32.mrf.mxu1 }
 0x41f   : > { %v3798_v2 = vadd.f32 %v3747_v43, %v3532_v20 }
 0x420   : > { %v7387_v48 = vpop.f32.mrf.mxu1 }
 0x421   : > { %v3801_v10 = vadd.f32 %v7387_v48, %v3543_v4 }
 0x422   : > { %v3750_v54 = vpop.f32.mrf.mxu1 }
 0x423   : > { %v3799_v49 = vadd.f32 %v3750_v54, %v3535_v24 }
 0x424   : > { %v7390_v19 = vpop.f32.mrf.mxu1 }
 0x425   : > { %v3804_v8 = vadd.f32 %v7390_v19, %v3556_v37 }
 0x426   : > { %v3763_v9 = vpop.f32.mrf.mxu1 }
 0x427   : > { %v9799_v62 = vadd.f32 %v3763_v9, %v3548_v7 }
 0x428   : > { %v7391_v28 = vpop.f32.mrf.mxu1 }
 0x429   : > { %v9801_v12 = vadd.f32 %v7391_v28, %v3559_v41  ;;  %v9813_v41 = vpop.f32.mrf.mxu0 }
 0x42a   : > { %v3766_v36 = vpop.f32.mrf.mxu1 }
 0x42b   : > { %v9805_v55 = vadd.f32 %v3766_v36, %v3551_v38  ;;  %v9815_v51 = vpop.f32.mrf.mxu0 }
 0x42c   : > { %v7394_v56 = vpop.f32.mrf.mxu1 }
 0x42d   : > { %v3808_v45 = vadd.f32 %v7394_v56, %v3572_v61  ;;  %v9817_v33 = vpop.f32.mrf.mxu0 }
 0x42e   : > { %v3779_v15 = vpop.f32.mrf.mxu1 }
 0x42f   : > { %v3806_v63 = vadd.f32 %v3779_v15, %v3564_v44  ;;  %v9819_v50 = vpop.f32.mrf.mxu0 }
 0x430   : > { %v7395_v1 = vpop.f32.mrf.mxu1 }
 0x431   : > { %v3809_v25 = vadd.f32 %v7395_v1, %v3575_v14  ;;  %v9821_v18 = vpop.f32.mrf.mxu0 }
 0x432   : > { %v3782_v26 = vpop.f32.mrf.mxu1 }
 0x433   : > { %v3807_v17 = vadd.f32 %v3782_v26, %v3567_v40  ;;  %v9823_v53 = vpop.f32.mrf.mxu0 }
 0x434   : > { %v7414_v24 = vpop.f32.mrf.mxu1 }
 0x435   : > { %v4020_v37 = vadd.f32 %v7414_v24, %v3796_v34  ;;  %v9825_v20 = vpop.f32.mrf.mxu0 }
 0x436   : > { %v3955_v0 = vpop.f32.mrf.mxu1  ;;  %10612 = vst [vmem:[#allocation6_spill] sm:$0xff] %v9825_v20 }
 0x437   : > { %v4018_v7 = vadd.f32 %v3955_v0, %v3794_v47  ;;  %v7510_v48 = vpop.f32.mrf.mxu0 }
 0x438   : > { %v7415_v42 = vpop.f32.mrf.mxu1 }
 0x439   : > { %v4021_v46 = vadd.f32 %v7415_v42, %v3797_v31  ;;  %v4570_v19 = vpop.f32.mrf.mxu0 }
 0x43a   : > { %v3958_v38 = vpop.f32.mrf.mxu1 }
 0x43b   : > { %v4019_v23 = vadd.f32 %v3958_v38, %v3795_v27  ;;  %v7511_v28 = vpop.f32.mrf.mxu0 }
 0x43c   : > { %v7418_v61 = vpop.f32.mrf.mxu1 }
 0x43d   : > { %v4024_v44 = vadd.f32 %v7418_v61, %v3800_v11  ;;  %v4573_v15 = vpop.f32.mrf.mxu0  ;;  %v4234_v61 = vadd.f32 %v9789_v22, %v4020_v37 }
 0x43e   : > { %v3971_v30 = vpop.f32.mrf.mxu1 }
 0x43f   : > { %v4022_v14 = vadd.f32 %v3971_v30, %v3798_v2  ;;  %v7514_v26 = vpop.f32.mrf.mxu0 }
 0x440   : > { %v7419_v60 = vpop.f32.mrf.mxu1 }
 0x441   : > { %v4025_v40 = vadd.f32 %v7419_v60, %v3801_v10 }
 0x442   : > { %v3974_v57 = vpop.f32.mrf.mxu1 }
 0x443   : > { %v4023_v34 = vadd.f32 %v3974_v57, %v3799_v49  ;;  %v4239_v37 = vadd.f32 %v9807_v5, %v4025_v40 }
 0x444   : > { %v7422_v39 = vpop.f32.mrf.mxu1 }
 0x445   : > { %v4028_v13 = vadd.f32 %v7422_v39, %v3804_v8 }
 0x446   : > { %v3987_v47 = vpop.f32.mrf.mxu1 }
 0x447   : > { %v4026_v30 = vadd.f32 %v3987_v47, %v9799_v62  ;;  %v4238_v62 = vadd.f32 %v9797_v52, %v4024_v44  ;;  %v4237_v47 = vadd.f32 %v9809_v32, %v4023_v34  ;;  %v9855_v32 = vld [vmem:[%s10505_s4] ss:$0 sm:$0xff] }
 0x448   : > { %v7423_v29 = vpop.f32.mrf.mxu1 }
 0x449   : > { %v4029_v60 = vadd.f32 %v7423_v29, %v9801_v12  ;;  %v4236_v12 = vadd.f32 %v9803_v21, %v4022_v14 }
 0x44a   : > { %v3990_v31 = vpop.f32.mrf.mxu1 }
 0x44c   : > { %v7426_v58 = vpop.f32.mrf.mxu1 }
 0x44d   : > { %v4032_v27 = vadd.f32 %v7426_v58, %v3808_v45  ;;  %v4027_v58 = vadd.f32 %v3990_v31, %v9805_v55  ;;  %v4242_v55 = vadd.f32 %v9811_v3, %v4028_v13 }
 0x44e   : > { %v4003_v35 = vpop.f32.mrf.mxu1 }
 0x44f   : > { %v4030_v11 = vadd.f32 %v4003_v35, %v3806_v63  ;;  %v4586_v63 = vpop.f32.mrf.mxu0  ;;  %v4241_v29 = vadd.f32 %v9817_v33, %v4027_v58  ;;  %v9858_v3 = vadd.f32 %v9819_v50, %v4032_v27 }
 0x450   : > { %v7427_v43 = vpop.f32.mrf.mxu1 }
 0x451   : > { %v4033_v4 = vadd.f32 %v7427_v43, %v3809_v25  ;;  %v7515_v38 = vpop.f32.mrf.mxu0  ;;  %v4232_v43 = vadd.f32 %v9791_v16, %v4018_v7  ;;  %v4240_v16 = vadd.f32 %v9813_v41, %v4026_v30  ;;  %v9861_v41 = vadd.f32 %v9821_v18, %v4030_v11 }
 0x452   : > { %v4006_v2 = vpop.f32.mrf.mxu1 }
 0x453   : > { %v4031_v10 = vadd.f32 %v4006_v2, %v3807_v17  ;;  %v4589_v39 = vpop.f32.mrf.mxu0  ;;  %v4235_v2 = vadd.f32 %v9793_v6, %v4021_v46  ;;  %v4243_v6 = vadd.f32 %v9815_v51, %v4029_v60  ;;  %v9864_v31 = vadd.f32 %v9823_v53, %v4033_v4 }
 0x454   : > { %v7478_v54 = vpop.f32.mrf.mxu1 }
 0x455   : > { %v4457_v35 = vadd.f32 %v7478_v54, %v4234_v61 }
 0x456   : > { %v4392_v49 = vpop.f32.mrf.mxu1 }
 0x457   : > { %v4455_v22 = vadd.f32 %v4392_v49, %v4232_v43  ;;  %v4635_v52 = vadd.f32 %v7510_v48, %v4457_v35  ;;  %v10614_v48 = vld [vmem:[#allocation6_spill] sm:$0xff] }
 0x458   : > { %v7479_v8 = vpop.f32.mrf.mxu1  ;;  %v9867_v54 = vadd.f32 %v10614_v48, %v4031_v10 }
 0x459   : > { %v4458_v46 = vadd.f32 %v7479_v8, %v4235_v2  ;;  %v4633_v34 = vadd.f32 %v4570_v19, %v4455_v22 }
 0x45a   : > { %v4395_v9 = vpop.f32.mrf.mxu1 }
 0x45b   : > { %v4636_v50 = vadd.f32 %v7511_v28, %v4458_v46 }
 0x45c   : > { %v7482_v36 = vpop.f32.mrf.mxu1 }
 0x45d   : > { %v4461_v44 = vadd.f32 %v7482_v36, %v4238_v62 }
 0x45e   : > { %v4408_v56 = vpop.f32.mrf.mxu1 }
 0x45f   : > { %v4459_v21 = vadd.f32 %v4408_v56, %v4236_v12  ;;  %v4639_v18 = vadd.f32 %v7514_v26, %v4461_v44 }
 0x460   : > { %v7483_v1 = vpop.f32.mrf.mxu1 }
 0x461   : > { %v4462_v14 = vadd.f32 %v7483_v1, %v4239_v37  ;;  %v9870_v11 = vadd.f32 %v4586_v63, %v4459_v21 }
 0x462   : > { %v4411_v45 = vpop.f32.mrf.mxu1 }
 0x463   : > { %v4460_v5 = vadd.f32 %v4411_v45, %v4237_v47  ;;  %v9872_v19 = vadd.f32 %v7515_v38, %v4462_v14 }
 0x464   : > { %v7486_v24 = vpop.f32.mrf.mxu1 }
 0x465   : > { %v4465_v33 = vadd.f32 %v7486_v24, %v4242_v55  ;;  %v9874_v1 = vadd.f32 %v4589_v39, %v4460_v5 }
 0x466   : > { %v4424_v0 = vpop.f32.mrf.mxu1 }
 0x467   : > { %v4463_v13 = vadd.f32 %v4424_v0, %v4240_v16 }
 0x468   : > { %v7487_v42 = vpop.f32.mrf.mxu1 }
 0x469   : > { %v4466_v24 = vadd.f32 %v7487_v42, %v4243_v6 }
 0x46a   : > { %v9827_v25 = vpop.f32.mrf.mxu1 }
 0x46b   : > { %10613 = vst [vmem:[#allocation2_spill] sm:$0xff] %v9827_v25  ;;  %v4233_v25 = vadd.f32 %v9795_v59, %v4019_v23  ;;  %v7518_v59 = vpop.f32.mrf.mxu0 }
 0x46c   : > { %v9829_v17 = vpop.f32.mrf.mxu1  ;;  %v9878_v61 = vadd.f32 %v7518_v59, %v4465_v33 }
 0x46d   : > { %v4456_v23 = vadd.f32 %v4395_v9, %v4233_v25  ;;  %v4602_v8 = vpop.f32.mrf.mxu0 }
 0x46e   : > { %v9834_v57 = vpop.f32.mrf.mxu1  ;;  %v9880_v28 = vadd.f32 %v4602_v8, %v4463_v13 }
 0x46f   : > { %v4634_v27 = vadd.f32 %v4573_v15, %v4456_v23  ;;  %v7519_v15 = vpop.f32.mrf.mxu0 }
 0x470   : > { %v9840_v20 = vpop.f32.mrf.mxu1  ;;  %v9890_v23 = vadd.f32 %v7519_v15, %v4466_v24  ;;  %v4467_v15 = vadd.f32 %v9834_v57, %v9861_v41 }
 0x471   : > { %v4605_v16 = vpop.f32.mrf.mxu0 }
 0x472   : > { %v9849_v7 = vpop.f32.mrf.mxu1  ;;  %v10615_v43 = vld [vmem:[#allocation2_spill] sm:$0xff] }
 0x473   : > { %v4464_v42 = vadd.f32 %v10615_v43, %v4241_v29  ;;  %v7522_v8 = vpop.f32.mrf.mxu0 }
 0x474   : > { %v7542_v40 = vpop.f32.mrf.mxu1 }
 0x475   : > { %v4828_v51 = vadd.f32 %v7542_v40, %v4635_v52 }
 0x476   : > { %v4763_v49 = vpop.f32.mrf.mxu1 }
 0x477   : > { %v4851_v9 = vadd.f32 %v9855_v32, %v4828_v51  ;;  %v4826_v36 = vadd.f32 %v4763_v49, %v4633_v34 }
 0x478   : > { %v7543_v56 = vpop.f32.mrf.mxu1 }
 0x479   : > { %v4883_v53 = vcombine.high %v4851_v9, %v4851_v9  ;;  %v4942_v4 = vsel %vm4913_vm11, %v4851_v9, -inf  ;;  %v4849_v10 = vadd.f32 %v9855_v32, %v4826_v36  ;;  %v4829_v45 = vadd.f32 %v7543_v56, %v4636_v50 }
 0x47a   : > { %v4943_v0 = vrot.slane %v4942_v4, 4  ;;  %v4766_v25 = vpop.f32.mrf.mxu1  ;;  %v4469_v9 = vadd.f32 %v9829_v17, %v9858_v3  ;;  %v4618_v17 = vpop.f32.mrf.mxu0  ;;  %v4470_v3 = vadd.f32 %v9840_v20, %v9864_v31 }
 0x47b   : > { %v4949_v26 = vsel %vm4913_vm11, %v4883_v53, -inf  ;;  %v4881_v63 = vcombine.high %v4849_v10, %v4849_v10  ;;  %v4914_v38 = vsel %vm4913_vm11, %v4849_v10, -inf  ;;  %v4852_v30 = vadd.f32 %v9855_v32, %v4829_v45 }
 0x47c   : > { %v4944_v60 = vmax.f32 %v4942_v4, %v4943_v0  ;;  %v4950_v39 = vrot.slane %v4949_v26, 4  ;;  %v4915_v58 = vrot.slane %v4914_v38, 4  ;;  %v4827_v35 = vadd.f32 %v4766_v25, %v4634_v27  ;;  %v7546_v34 = vpop.f32.mrf.mxu1 }
 0x47d   : > { %v4921_v2 = vsel %vm4913_vm11, %v4881_v63, -inf  ;;  %v4884_v22 = vcombine.high %v4852_v30, %v4852_v30  ;;  %v4956_v62 = vsel %vm4913_vm11, %v4852_v30, -inf  ;;  %v4832_v10 = vadd.f32 %v7546_v34, %v4639_v18 }
 0x47e   : > { %v4945_v12 = vrot.slane %v4944_v60, 2  ;;  %v4951_v37 = vmax.f32 %v4949_v26, %v4950_v39  ;;  %v4916_v47 = vmax.f32 %v4914_v38, %v4915_v58  ;;  %v4922_v55 = vrot.slane %v4921_v2, 4 }
 0x47f   : > { %v4957_v6 = vrot.slane %v4956_v62, 4  ;;  %v4963_v59 = vsel %vm4913_vm11, %v4884_v22, -inf  ;;  %v4850_v46 = vadd.f32 %v9855_v32, %v4827_v35  ;;  %v9898_v38 = vadd.f32 %v4605_v16, %v4464_v42  ;;  %v4779_v42 = vpop.f32.mrf.mxu1 }
 0x480   : > { %v4946_v52 = vmax.f32 %v4944_v60, %v4945_v12  ;;  %v4952_v44 = vrot.slane %v4951_v37, 2  ;;  %v4917_v29 = vrot.slane %v4916_v47, 2  ;;  %v4923_v21 = vmax.f32 %v4921_v2, %v4922_v55 }
 0x481   : > { %v4958_v14 = vmax.f32 %v4956_v62, %v4957_v6  ;;  %v4964_v5 = vrot.slane %v4963_v59, 4  ;;  %v4882_v40 = vcombine.high %v4850_v46, %v4850_v46  ;;  %v4928_v51 = vsel %vm4913_vm11, %v4850_v46, -inf }
 0x482   : > { %v4947_v33 = vrot.slane %v4946_v52, 1  ;;  %v4953_v13 = vmax.f32 %v4951_v37, %v4952_v44  ;;  %v4918_v48 = vmax.f32 %v4916_v47, %v4917_v29  ;;  %v4924_v49 = vrot.slane %v4923_v21, 2  ;;  %v7523_v37 = vpop.f32.mrf.mxu0  ;;  %v7684_v29 = vld [vmem:[%s10506_s5 + $0x70] sm:$0xff]  }
 0x483   : > { %v4965_v36 = vmax.f32 %v4963_v59, %v4964_v5  ;;  %v4929_v50 = vrot.slane %v4928_v51, 4  ;;  %v4935_v27 = vsel %vm4913_vm11, %v4882_v40, -inf  ;;  %v4959_v24 = vrot.slane %v4958_v14, 2 }
 0x484   : > { %v4948_v56 = vmax.f32 %v4946_v52, %v4947_v33  ;;  %v4919_v53 = vrot.slane %v4918_v48, 1  ;;  %v4925_v4 = vmax.f32 %v4923_v21, %v4924_v49  ;;  %v4954_v45 = vrot.slane %v4953_v13, 1 }
 0x485   : > { %v4930_v0 = vmax.f32 %v4928_v51, %v4929_v50  ;;  %v4936_v25 = vrot.slane %v4935_v27, 4  ;;  %v4966_v30 = vrot.slane %v4965_v36, 2  ;;  %v4855_v43 = vadd.f32 %v9855_v32, %v4832_v10  ;;  %v7547_v51 = vpop.f32.mrf.mxu1  ;;  %v7685_v50 = vld [vmem:[%s10506_s5 + $0x30] sm:$0xff]  }
 0x486   : > { %v4920_v26 = vmax.f32 %v4918_v48, %v4919_v53  ;;  %v4926_v63 = vrot.slane %v4925_v4, 1  ;;  %v5142_v58 = vmax.f32 %v4948_v56, 0.0  ;;  %v9903_v2 = vmax.f32 %v4953_v13, %v4954_v45 }
 0x487   : > { %v4931_v60 = vrot.slane %v4930_v0, 2  ;;  %v4937_v39 = vmax.f32 %v4935_v27, %v4936_v25  ;;  %v9905_v22 = vmax.f32 %v4958_v14, %v4959_v24  ;;  %v9909_v62 = vadd.f32 %v9849_v7, %v9867_v54  ;;  %v7682_v7 = vld [vmem:[%s10506_s5 + $0x78] sm:$0xff]   ;;  %v4782_v25 = vpop.f32.mrf.mxu1 }
 0x488   : > { %v4927_v18 = vmax.f32 %v4925_v4, %v4926_v63  ;;  %v5138_v35 = vmax.f32 %v4920_v26, 0.0  ;;  %v9911_v31 = vadd.f32 %v7522_v8, %v4469_v9  ;;  %v9913_v12 = vadd.f32 %v4618_v17, %v4467_v15  ;;  %v7683_v54 = vld [vmem:[%s10506_s5 + $0x38] sm:$0xff]   ;;  %7170 = vmatprep.subr.bf16.mxu1 %v7682_v7 }
 0x489   : > { %v4932_v57 = vmax.f32 %v4930_v0, %v4931_v60  ;;  %v4938_v41 = vrot.slane %v4937_v39, 2  ;;  %v9915_v55 = vmax.f32 %v4965_v36, %v4966_v30  ;;  %v9917_v59 = vpack.c.bf16 %v5142_v58, %v5142_v58  ;;  %7171 = vmatpush3.bf16.msra.mxu1 %v7683_v54  ;;  %v7687_v58 = vld [vmem:[%s10506_s5 + $0x28] sm:$0xff]  }
 0x48a   : > { %v5139_v20 = vmax.f32 %v4927_v18, 0.0  ;;  %v5170_v47 = vpack.c.bf16 %v5138_v35, %v5138_v35  ;;  %v4887_v52 = vcombine.high %v4855_v43, %v4855_v43  ;;  %v9919_v44 = vadd.f32 %v7523_v37, %v4470_v3  ;;  %7172 = vmatprep.subr.bf16.mxu1 %v7684_v29 }
 0x48b   : > { %v4933_v16 = vrot.slane %v4932_v57, 1  ;;  %v4939_v6 = vmax.f32 %v4937_v39, %v4938_v41  ;;  %v5143_v21 = vmax.f32 %v9903_v2, 0.0  ;;  %v4961_v14 = vrot.slane %v9905_v22, 1 }
 0x48c   : > { %v5171_v46 = vpack.c.bf16 %v5139_v20, %v5139_v20  ;;  %v4998_v33 = vsel %vm4913_vm11, %v4855_v43, -inf  ;;  %v5005_v13 = vsel %vm4913_vm11, %v4887_v52, -inf  ;;  %v4830_v48 = vadd.f32 %v4779_v42, %v9870_v11  ;;  %v7686_v11 = vld [vmem:[%s10506_s5 + $0x68] sm:$0xff]  }
 0x48d   : > { %v4934_v5 = vmax.f32 %v4932_v57, %v4933_v16  ;;  %v4940_v40 = vrot.slane %v4939_v6, 1  ;;  %v5234_v49 = vunpack.c.l.b16 %v5170_v47  ;;  %v4968_v8 = vrot.slane %v9915_v55, 1  ;;  %7173 = vmatpush3.bf16.msra.mxu1 %v7685_v50 }
 0x48e   : > { %v5235_v34 = vunpack.c.l.b16 %v5171_v46  ;;  %v5238_v27 = vunpack.c.l.b16 %v9917_v59  ;;  %v4999_v56 = vrot.slane %v4998_v33, 4  ;;  %v5006_v53 = vrot.slane %v5005_v13, 4  ;;  %7174 = vmatprep.subr.bf16.mxu1 %v7686_v11 }
 0x48f   : > { %v4941_v9 = vmax.f32 %v4939_v6, %v4940_v40  ;;  %v5140_v36 = vmax.f32 %v4934_v5, 0.0  ;;  %v4853_v4 = vadd.f32 %v9855_v32, %v4830_v48  ;;  %v4833_v0 = vadd.f32 %v7547_v51, %v9872_v19 }
 0x490   : > { %v5266_v10 = vsel %vm10616_vm13, %v5235_v34, %v5234_v49  ;;  %v5000_v15 = vmax.f32 %v4998_v33, %v4999_v56  ;;  %v5007_v26 = vmax.f32 %v5005_v13, %v5006_v53  ;;  %v4831_v43 = vadd.f32 %v4782_v25, %v9874_v1  ;;  %v7550_v56 = vpop.f32.mrf.mxu1  ;;  %vm10621_vm13 = vmmov %vm10618_vm15 }
 0x491   : > { %v5141_v45 = vmax.f32 %v4941_v9, 0.0  ;;  %v5172_v24 = vpack.c.bf16 %v5140_v36, %v5140_v36  ;;  %v4885_v63 = vcombine.high %v4853_v4, %v4853_v4  ;;  %v4970_v17 = vsel %vm4913_vm11, %v4853_v4, -inf  ;;  %7175 = vmatpush3.bf16.msra.mxu1 %v7687_v58 }
 0x492   : > { %v4971_v60 = vrot.slane %v4970_v17, 4  ;;  %v4856_v39 = vadd.f32 %v9855_v32, %v4833_v0  ;;  %v5001_v18 = vrot.slane %v5000_v15, 2  ;;  %v5008_v35 = vrot.slane %v5007_v26, 2 }
 0x493   : > { %v5173_v3 = vpack.c.bf16 %v5141_v45, %v5141_v45  ;;  %v5236_v30 = vunpack.c.l.b16 %v5172_v24  ;;  %v4977_v19 = vsel %vm4913_vm11, %v4885_v63, -inf  ;;  %v9960_v33 = vpack.c.bf16 %v5143_v21, %v5143_v21 }
 0x494   : > { %v4972_v41 = vmax.f32 %v4970_v17, %v4971_v60  ;;  %v4978_v42 = vrot.slane %v4977_v19, 4  ;;  %v5002_v20 = vmax.f32 %v5000_v15, %v5001_v18  ;;  %v5009_v37 = vmax.f32 %v5007_v26, %v5008_v35 }
 0x495   : > { %v5237_v2 = vunpack.c.l.b16 %v5173_v3  ;;  %v5267_v57 = vsel %vm10617_vm14, %v5236_v30, %v5266_v10  ;;  %v4888_v47 = vcombine.high %v4856_v39, %v4856_v39  ;;  %v5012_v16 = vsel %vm4913_vm11, %v4856_v39, -inf  ;;  %v4621_v10 = vpop.f32.mrf.mxu0  ;;  %v4795_v3 = vpop.f32.mrf.mxu1 }
 0x496   : > { %v4973_v59 = vrot.slane %v4972_v41, 2  ;;  %v4979_v46 = vmax.f32 %v4977_v19, %v4978_v42  ;;  %v5013_v52 = vrot.slane %v5012_v16, 4  ;;  %v5003_v1 = vrot.slane %v5002_v20, 1 }
 0x497   : > { %v5268_v6 = vsel %vm10618_vm15, %v5237_v2, %v5267_v57  ;;  %v5010_v54 = vrot.slane %v5009_v37, 1  ;;  %v5019_v29 = vsel %vm4913_vm11, %v4888_v47, -inf  ;;  %v9965_v13 = vmax.f32 %v9905_v22, %v4961_v14  ;;  %vm10623_vm15 = vmmov %vm10619_vm7 }
 0x498   : > { %v9957_v7 = vsel %vm2611_vm4, %v5238_v27, %v5268_v6  ;;  %v4974_v5 = vmax.f32 %v4972_v41, %v4973_v59  ;;  %v4980_v40 = vrot.slane %v4979_v46, 2  ;;  %v5014_v51 = vmax.f32 %v5012_v16, %v5013_v52 }
 0x499   : > { %v5020_v34 = vrot.slane %v5019_v29, 4  ;;  %v5004_v48 = vmax.f32 %v5002_v20, %v5003_v1  ;;  %v4854_v49 = vadd.f32 %v9855_v32, %v4831_v43  ;;  %v5011_v9 = vmax.f32 %v5009_v37, %v5010_v54 }
 0x49a   : > { %v4975_v36 = vrot.slane %v4974_v5, 1  ;;  %v4981_v50 = vmax.f32 %v4979_v46, %v4980_v40  ;;  %v5015_v27 = vrot.slane %v5014_v51, 2  ;;  %v9969_v53 = vmax.f32 %v9915_v55, %v4968_v8  ;;  %v7551_v46 = vpop.f32.mrf.mxu1 }
 0x49b   : > { %v5021_v4 = vmax.f32 %v5019_v29, %v5020_v34  ;;  %v4886_v11 = vcombine.high %v4854_v49, %v4854_v49  ;;  %v4984_v21 = vsel %vm4913_vm11, %v4854_v49, -inf  ;;  %v5150_v45 = vmax.f32 %v5004_v48, 0.0 }
 0x49c   : > { %v4976_v24 = vmax.f32 %v4974_v5, %v4975_v36  ;;  %v4982_v22 = vrot.slane %v4981_v50, 1  ;;  %v5016_v14 = vmax.f32 %v5014_v51, %v5015_v27  ;;  %v4985_v0 = vrot.slane %v4984_v21, 4 }
 0x49d   : > { %v4991_v25 = vsel %vm4913_vm11, %v4886_v11, -inf  ;;  %v4836_v15 = vadd.f32 %v7550_v56, %v9878_v61  ;;  %v9975_v26 = vadd.f32 %v4621_v10, %v9909_v62  ;;  %v5151_v63 = vmax.f32 %v5011_v9, 0.0  ;;  %v4798_v11 = vpop.f32.mrf.mxu1 }
 0x49e   : > { %v4983_v55 = vmax.f32 %v4981_v50, %v4982_v22  ;;  %v5146_v8 = vmax.f32 %v4976_v24, 0.0  ;;  %v5017_v17 = vrot.slane %v5016_v14, 1  ;;  %v5239_v30 = vunpack.c.l.b16 %v9960_v33  ;;  %v7692_v33 = vld [vmem:[%s10506_s5 + $0xf0] sm:$0xff]  }
 0x49f   : > { %v5144_v60 = vmax.f32 %v9965_v13, 0.0  ;;  %v4986_v39 = vmax.f32 %v4984_v21, %v4985_v0  ;;  %v4992_v58 = vrot.slane %v4991_v25, 4  ;;  %v5145_v18 = vmax.f32 %v9969_v53, 0.0 }
 0x4a0   : > { %v9980_v35 = vpack.c.bf16 %v5150_v45, %v5150_v45  ;;  %v5147_v19 = vmax.f32 %v4983_v55, 0.0  ;;  %v5022_v61 = vrot.slane %v5021_v4, 2  ;;  %v4859_v2 = vadd.f32 %v9855_v32, %v4836_v15 }
 0x4a1   : > { %v4987_v43 = vrot.slane %v4986_v39, 2  ;;  %v4993_v62 = vmax.f32 %v4991_v25, %v4992_v58  ;;  %v4834_v57 = vadd.f32 %v4795_v3, %v9880_v28  ;;  %v9984_v41 = vpack.c.bf16 %v5151_v63, %v5151_v63 }
 0x4a2   : > { %v5178_v42 = vpack.c.bf16 %v5146_v8, %v5146_v8  ;;  %v5179_v20 = vpack.c.bf16 %v5147_v19, %v5147_v19  ;;  %v5018_v37 = vmax.f32 %v5016_v14, %v5017_v17  ;;  %v4891_v6 = vcombine.high %v4859_v2, %v4859_v2 }
 0x4a3   : > { %v4988_v47 = vmax.f32 %v4986_v39, %v4987_v43  ;;  %v4994_v16 = vrot.slane %v4993_v62, 2  ;;  %v5054_v59 = vsel %vm4913_vm11, %v4859_v2, -inf  ;;  %v5246_v52 = vunpack.c.l.b16 %v9980_v35 }
 0x4a4   : > { %v5243_v1 = vunpack.c.l.b16 %v5179_v20  ;;  %v9988_v54 = vmax.f32 %v5021_v4, %v5022_v61  ;;  %v5055_v29 = vrot.slane %v5054_v59, 4  ;;  %v5061_v28 = vsel %vm4913_vm11, %v4891_v6, -inf }
 0x4a5   : > { %v4989_v5 = vrot.slane %v4988_v47, 1  ;;  %v4995_v40 = vmax.f32 %v4993_v62, %v4994_v16  ;;  %v4857_v51 = vadd.f32 %v9855_v32, %v4834_v57  ;;  %v5247_v34 = vunpack.c.l.b16 %v9984_v41 }
 0x4a6   : > { %v5242_v48 = vunpack.c.l.b16 %v5178_v42  ;;  %v5152_v49 = vmax.f32 %v5018_v37, 0.0  ;;  %v5056_v9 = vmax.f32 %v5054_v59, %v5055_v29  ;;  %v5062_v27 = vrot.slane %v5061_v28, 4 }
 0x4a7   : > { %v4990_v36 = vmax.f32 %v4988_v47, %v4989_v5  ;;  %v4996_v50 = vrot.slane %v4995_v40, 1  ;;  %v4889_v56 = vcombine.high %v4857_v51, %v4857_v51  ;;  %v5026_v10 = vsel %vm4913_vm11, %v4857_v51, -inf }
 0x4a8   : > { %v5273_v4 = vsel %vm10619_vm7, %v5243_v1, %v5242_v48  ;;  %v5057_v21 = vrot.slane %v5056_v9, 2  ;;  %v4837_v45 = vadd.f32 %v7551_v46, %v9890_v23  ;;  %v5063_v14 = vmax.f32 %v5061_v28, %v5062_v27  ;;  %vm10624_vm7 = vmmov %vm10620_vm6 }
 0x4a9   : > { %v4997_v24 = vmax.f32 %v4995_v40, %v4996_v50  ;;  %v5148_v22 = vmax.f32 %v4990_v36, 0.0  ;;  %v5027_v0 = vrot.slane %v5026_v10, 4  ;;  %v5033_v15 = vsel %vm4913_vm11, %v4889_v56, -inf }
 0x4aa   : > { %v5058_v25 = vmax.f32 %v5056_v9, %v5057_v21  ;;  %v4860_v63 = vadd.f32 %v9855_v32, %v4837_v45  ;;  %v4835_v55 = vadd.f32 %v4798_v11, %v9898_v38  ;;  %v5064_v3 = vrot.slane %v5063_v14, 2  ;;  %v7554_v11 = vpop.f32.mrf.mxu1 }
 0x4ab   : > { %v5149_v8 = vmax.f32 %v4997_v24, 0.0  ;;  %v5180_v17 = vpack.c.bf16 %v5148_v22, %v5148_v22  ;;  %v5028_v39 = vmax.f32 %v5026_v10, %v5027_v0  ;;  %v5034_v35 = vrot.slane %v5033_v15, 4 }
 0x4ac   : > { %v5059_v58 = vrot.slane %v5058_v25, 1  ;;  %v4892_v19 = vcombine.high %v4860_v63, %v4860_v63  ;;  %v5068_v23 = vsel %vm4913_vm11, %v4860_v63, -inf  ;;  %v5065_v62 = vmax.f32 %v5063_v14, %v5064_v3 }
 0x4ad   : > { %v5181_v61 = vpack.c.bf16 %v5149_v8, %v5149_v8  ;;  %v5244_v43 = vunpack.c.l.b16 %v5180_v17  ;;  %v5029_v2 = vrot.slane %v5028_v39, 2  ;;  %v5184_v57 = vpack.c.bf16 %v5152_v49, %v5152_v49 }
 0x4ae   : > { %v5035_v41 = vmax.f32 %v5033_v15, %v5034_v35  ;;  %v5069_v42 = vrot.slane %v5068_v23, 4  ;;  %v5075_v20 = vsel %vm4913_vm11, %v4892_v19, -inf  ;;  %v5024_v38 = vrot.slane %v9988_v54, 1  ;;  %v4811_v19 = vpop.f32.mrf.mxu1 }
 0x4af   : > { %v5245_v37 = vunpack.c.l.b16 %v5181_v61  ;;  %v5274_v47 = vsel %vm10620_vm6, %v5244_v43, %v5273_v4  ;;  %v5030_v16 = vmax.f32 %v5028_v39, %v5029_v2  ;;  %v5060_v6 = vmax.f32 %v5058_v25, %v5059_v58  ;;  %vm10625_vm6 = vmmov %vm10621_vm13 }
 0x4b0   : > { %v5036_v59 = vrot.slane %v5035_v41, 2  ;;  %v5070_v46 = vmax.f32 %v5068_v23, %v5069_v42  ;;  %v5076_v1 = vrot.slane %v5075_v20, 4  ;;  %v5066_v5 = vrot.slane %v5065_v62, 1 }
 0x4b1   : > { %v5275_v29 = vsel %vm10621_vm13, %v5245_v37, %v5274_v47  ;;  %v5031_v40 = vrot.slane %v5030_v16, 1  ;;  %v4858_v28 = vadd.f32 %v9855_v32, %v4835_v55  ;;  %v5248_v51 = vunpack.c.l.b16 %v5184_v57 }
 0x4b2   : > { %v5276_v48 = vsel %vm2611_vm4, %v5246_v52, %v5275_v29  ;;  %v5037_v49 = vmax.f32 %v5035_v41, %v5036_v59  ;;  %v5071_v9 = vrot.slane %v5070_v46, 2  ;;  %v10009_v36 = vpack.c.bf16 %v5144_v60, %v5144_v60  ;;  %v7555_v59 = vpop.f32.mrf.mxu1 }
 0x4b3   : > { %v5277_v50 = vsel %vm2613_vm5, %v5247_v34, %v5276_v48  ;;  %v5032_v27 = vmax.f32 %v5030_v16, %v5031_v40  ;;  %v5077_v56 = vmax.f32 %v5075_v20, %v5076_v1  ;;  %v5025_v4 = vmax.f32 %v9988_v54, %v5024_v38 }
 0x4b4   : > { %vm10622_vm14 = vcmask 1046534   ;;  %v5038_v10 = vrot.slane %v5037_v49, 1  ;;  %v5072_v45 = vmax.f32 %v5070_v46, %v5071_v9  ;;  %v5067_v52 = vmax.f32 %v5065_v62, %v5066_v5 }
 0x4b5   : > { %v10014_v21 = vsel %vm10622_vm14, %v5248_v51, %v5277_v50  ;;  %v5158_v24 = vmax.f32 %v5060_v6, 0.0  ;;  %v5078_v22 = vrot.slane %v5077_v56, 2  ;;  %v4890_v14 = vcombine.high %v4858_v28, %v4858_v28  ;;  %vm10626_vm13 = vmmov %vm10622_vm14 }
 0x4b6   : > { %v5039_v13 = vmax.f32 %v5037_v49, %v5038_v10  ;;  %v5154_v0 = vmax.f32 %v5032_v27, 0.0  ;;  %v5040_v60 = vsel %vm4913_vm11, %v4858_v28, -inf  ;;  %v4840_v34 = vadd.f32 %v7554_v11, %v9911_v31  ;;  %vm10627_vm14 = vmmov %vm10626_vm13 }
 0x4b7   : > { %v10021_v25 = vpack.c.bf16 %v5145_v18, %v5145_v18  ;;  %v5240_v54 = vunpack.c.l.b16 %v10009_v36  ;;  %v5073_v15 = vrot.slane %v5072_v45, 1  ;;  %v5041_v63 = vrot.slane %v5040_v60, 4 }
 0x4b8   : > { %v5153_v55 = vmax.f32 %v5025_v4, 0.0  ;;  %v5079_v8 = vmax.f32 %v5077_v56, %v5078_v22  ;;  %v5047_v17 = vsel %vm4913_vm11, %v4890_v14, -inf  ;;  %v4863_v3 = vadd.f32 %v9855_v32, %v4840_v34 }
 0x4b9   : > { %v10026_v39 = vpack.c.bf16 %v5158_v24, %v5158_v24  ;;  %v5155_v58 = vmax.f32 %v5039_v13, 0.0  ;;  %v5042_v35 = vmax.f32 %v5040_v60, %v5041_v63  ;;  %v5048_v31 = vrot.slane %v5047_v17, 4 }
 0x4ba   : > { %v5159_v53 = vmax.f32 %v5067_v52, 0.0  ;;  %v5186_v23 = vpack.c.bf16 %v5154_v0, %v5154_v0  ;;  %v4895_v18 = vcombine.high %v4863_v3, %v4863_v3  ;;  %v5110_v61 = vsel %vm4913_vm11, %v4863_v3, -inf }
 0x4bb   : > { %v5074_v43 = vmax.f32 %v5072_v45, %v5073_v15  ;;  %v5043_v62 = vrot.slane %v5042_v35, 2  ;;  %v5049_v2 = vmax.f32 %v5047_v17, %v5048_v31  ;;  %v5111_v57 = vrot.slane %v5110_v61, 4 }
 0x4bc   : > { %v10029_v41 = vpack.c.bf16 %v5153_v55, %v5153_v55  ;;  %v5080_v42 = vrot.slane %v5079_v8, 1  ;;  %v5117_v20 = vsel %vm4913_vm11, %v4895_v18, -inf  ;;  %v4838_v38 = vadd.f32 %v4811_v19, %v9913_v12 }
 0x4bd   : > { %v5187_v37 = vpack.c.bf16 %v5155_v58, %v5155_v58  ;;  %v5044_v47 = vmax.f32 %v5042_v35, %v5043_v62  ;;  %v5050_v16 = vrot.slane %v5049_v2, 2  ;;  %v5112_v6 = vmax.f32 %v5110_v61, %v5111_v57 }
 0x4be   : > { %v10033_v46 = vpack.c.bf16 %v5159_v53, %v5159_v53  ;;  %v5254_v1 = vunpack.c.l.b16 %v10026_v39  ;;  %v5118_v29 = vrot.slane %v5117_v20, 4  ;;  %v4861_v5 = vadd.f32 %v9855_v32, %v4838_v38 }
 0x4bf   : > { %v5250_v40 = vunpack.c.l.b16 %v5186_v23  ;;  %v5160_v28 = vmax.f32 %v5074_v43, 0.0  ;;  %v5045_v51 = vrot.slane %v5044_v47, 1  ;;  %v5051_v48 = vmax.f32 %v5049_v2, %v5050_v16  ;;  %v4814_v2 = vpop.f32.mrf.mxu1 }
 0x4c0   : > { %v5113_v49 = vrot.slane %v5112_v6, 2  ;;  %v4893_v9 = vcombine.high %v4861_v5, %v4861_v5  ;;  %v5082_v12 = vsel %vm4913_vm11, %v4861_v5, -inf  ;;  %v4841_v50 = vadd.f32 %v7555_v59, %v9919_v44 }
 0x4c1   : > { %v5251_v27 = vunpack.c.l.b16 %v5187_v37  ;;  %v5081_v56 = vmax.f32 %v5079_v8, %v5080_v42  ;;  %v5046_v11 = vmax.f32 %v5044_v47, %v5045_v51  ;;  %v5052_v4 = vrot.slane %v5051_v48, 1 }
 0x4c2   : > { %v5119_v10 = vmax.f32 %v5117_v20, %v5118_v29  ;;  %v5083_v45 = vrot.slane %v5082_v12, 4  ;;  %v5089_v52 = vsel %vm4913_vm11, %v4893_v9, -inf  ;;  %v4864_v24 = vadd.f32 %v9855_v32, %v4841_v50 }
 0x4c3   : > { %v5192_v22 = vpack.c.bf16 %v5160_v28, %v5160_v28  ;;  %v5053_v14 = vmax.f32 %v5051_v48, %v5052_v4  ;;  %v5156_v13 = vmax.f32 %v5046_v11, 0.0  ;;  %v5090_v0 = vrot.slane %v5089_v52, 4 }
 0x4c4   : > { %v5114_v60 = vmax.f32 %v5112_v6, %v5113_v49  ;;  %v5084_v34 = vmax.f32 %v5082_v12, %v5083_v45  ;;  %v4896_v15 = vcombine.high %v4864_v24, %v4864_v24  ;;  %v5124_v63 = vsel %vm4913_vm11, %v4864_v24, -inf }
 0x4c5   : > { %v5280_v44 = vsel %vm10623_vm15, %v5251_v27, %v5250_v40  ;;  %v5157_v55 = vmax.f32 %v5053_v14, 0.0  ;;  %v5188_v8 = vpack.c.bf16 %v5156_v13, %v5156_v13  ;;  %v5091_v17 = vmax.f32 %v5089_v52, %v5090_v0  ;;  %v7688_v27 = vld [vmem:[%s10506_s5 + $0xf8] sm:$0xff]  }
 0x4c6   : > { %v5120_v3 = vrot.slane %v5119_v10, 2  ;;  %v5085_v39 = vrot.slane %v5084_v34, 2  ;;  %v5125_v58 = vrot.slane %v5124_v63, 4  ;;  %v5131_v35 = vsel %vm4913_vm11, %v4896_v15, -inf  ;;  %7142 = vmatprep.subr.bf16.mxu0 %v7688_v27 }
 0x4c7   : > { %v5161_v31 = vmax.f32 %v5081_v56, 0.0  ;;  %v5189_v19 = vpack.c.bf16 %v5157_v55, %v5157_v55  ;;  %v5252_v53 = vunpack.c.l.b16 %v5188_v8  ;;  %v5092_v23 = vrot.slane %v5091_v17, 2  ;;  %v7689_v56 = vld [vmem:[%s10506_s5 + $0xb8] sm:$0xff]  }
 0x4c8   : > { %v5115_v18 = vrot.slane %v5114_v60, 1  ;;  %v5086_v61 = vmax.f32 %v5084_v34, %v5085_v39  ;;  %v5126_v43 = vmax.f32 %v5124_v63, %v5125_v58  ;;  %v5132_v62 = vrot.slane %v5131_v35, 4  ;;  %7143 = vmatpush3.bf16.msra.mxu0 %v7689_v56  ;;  %v7695_v39 = vld [vmem:[%s10506_s5 + $0x18] sm:$0xff]  }
 0x4c9   : > { %v5255_v57 = vunpack.c.l.b16 %v10033_v46  ;;  %v5253_v42 = vunpack.c.l.b16 %v5189_v19  ;;  %v5281_v20 = vsel %vm10624_vm7, %v5252_v53, %v5280_v44  ;;  %v5093_v38 = vmax.f32 %v5091_v17, %v5092_v23  ;;  %7144 = vmatprep.subr.bf16.mxu0 %v7692_v33  ;;  %v7697_v33 = vld [vmem:[%s10506_s5 + $0xa8] sm:$0xff]  }
 0x4ca   : > { %v5121_v37 = vmax.f32 %v5119_v10, %v5120_v3  ;;  %v5087_v47 = vrot.slane %v5086_v61, 1  ;;  %v5127_v16 = vrot.slane %v5126_v43, 2  ;;  %v5133_v6 = vmax.f32 %v5131_v35, %v5132_v62 }
 0x4cb   : > { %v5256_v59 = vunpack.c.l.b16 %v5192_v22  ;;  %v5282_v29 = vsel %vm10625_vm6, %v5253_v42, %v5281_v20  ;;  %v5094_v5 = vrot.slane %v5093_v38, 1  ;;  %v4839_v40 = vadd.f32 %v4814_v2, %v9975_v26  ;;  %v7690_v26 = vld [vmem:[%s10506_s5 + $0x60] sm:$0xff]  }
 0x4cc   : > { %v5193_v28 = vpack.c.bf16 %v5161_v31, %v5161_v31  ;;  %v5283_v51 = vsel %vm2611_vm4, %v5254_v1, %v5282_v29  ;;  %v5116_v48 = vmax.f32 %v5114_v60, %v5115_v18  ;;  %v5088_v49 = vmax.f32 %v5086_v61, %v5087_v47  ;;  %7176 = vmatprep.subr.bf16.mxu1 %v7690_v26 }
 0x4cd   : > { %v5284_v46 = vsel %vm2613_vm5, %v5255_v57, %v5283_v51  ;;  %v5128_v9 = vmax.f32 %v5126_v43, %v5127_v16  ;;  %v5134_v12 = vrot.slane %v5133_v6, 2  ;;  %v4862_v50 = vadd.f32 %v9855_v32, %v4839_v40  ;;  %v7691_v32 = vld [vmem:[%s10506_s5 + $0x20] sm:$0xff]  }
 0x4ce   : > { %v5241_v1 = vunpack.c.l.b16 %v10021_v25  ;;  %v5285_v11 = vsel %vm10626_vm13, %v5256_v59, %v5284_v46  ;;  %v5122_v4 = vrot.slane %v5121_v37, 1  ;;  %v5095_v10 = vmax.f32 %v5093_v38, %v5094_v5  ;;  %7177 = vmatpush3.bf16.msra.mxu1 %v7691_v32 }
 0x4cf   : > { %v5162_v45 = vmax.f32 %v5088_v49, 0.0  ;;  %v5135_v52 = vmax.f32 %v5133_v6, %v5134_v12  ;;  %v4894_v24 = vcombine.high %v4862_v50, %v4862_v50  ;;  %v5096_v22 = vsel %vm4913_vm11, %v4862_v50, -inf }
 0x4d0   : > { %v5249_v14 = vunpack.c.l.b16 %v10029_v41  ;;  %v5166_v13 = vmax.f32 %v5116_v48, 0.0  ;;  %v5097_v0 = vrot.slane %v5096_v22, 4  ;;  %v5270_v25 = vsel %vm2613_vm5, %v5239_v30, %v9957_v7  ;;  %v7693_v7 = vld [vmem:[%s10506_s5 + $0xb0] sm:$0xff]   ;;  %v7694_v30 = vld [vmem:[%s10506_s5 + $0x58] sm:$0xff]  }
 0x4d1   : > { %v5257_v60 = vunpack.c.l.b16 %v5193_v28  ;;  %v5129_v34 = vrot.slane %v5128_v9, 1  ;;  %v5103_v15 = vsel %vm4913_vm11, %v4894_v24, -inf  ;;  %v5271_v63 = vsel %vm10627_vm14, %v5240_v54, %v5270_v25  ;;  %7178 = vmatprep.subr.bf16.mxu1 %v7694_v30  ;;  %7145 = vmatpush3.bf16.msra.mxu0 %v7693_v7  ;;  %v7698_v7 = vld [vmem:[%s10506_s5 + $0x50] sm:$0xff]  }
 0x4d2   : > { %v5123_v44 = vmax.f32 %v5121_v37, %v5122_v4  ;;  %v5163_v55 = vmax.f32 %v5095_v10, 0.0  ;;  %v5098_v41 = vmax.f32 %v5096_v22, %v5097_v0  ;;  %v5104_v8 = vrot.slane %v5103_v15, 4  ;;  %7179 = vmatpush3.bf16.msra.mxu1 %v7695_v39 }
 0x4d3   : > { %v5194_v17 = vpack.c.bf16 %v5162_v45, %v5162_v45  ;;  %v5136_v36 = vrot.slane %v5135_v52, 1  ;;  %vm10628_vm11 = vcmask 1047559   ;;  %v10090_v58 = vpack.c.bf16 %v5166_v13, %v5166_v13  ;;  %7180 = vmatprep.subr.bf16.mxu1 %v7698_v7 }
 0x4d4   : > { %v5272_v54 = vsel %vm10628_vm11, %v5241_v1, %v5271_v63  ;;  %vm10629_vm15 = vmmov %vm10628_vm11  ;;  %v5099_v35 = vrot.slane %v5098_v41, 2  ;;  %v5105_v31 = vmax.f32 %v5103_v15, %v5104_v8  ;;  %v5130_v53 = vmax.f32 %v5128_v9, %v5129_v34  ;;  %v7696_v8 = vld [vmem:[%s10506_s5 + $0xe8] sm:$0xff]  }
 0x4d5   : > { %v5279_v3 = vsel %vm10629_vm15, %v5249_v14, %v10014_v21  ;;  %vm10630_vm7 = vmmov %vm10628_vm11  ;;  %v5294_v23 = vpack.c.b16 %v5272_v54, %v5272_v54  ;;  %v5167_v61 = vmax.f32 %v5123_v44, 0.0  ;;  %v5195_v21 = vpack.c.bf16 %v5163_v55, %v5163_v55  ;;  %7146 = vmatprep.subr.bf16.mxu0 %v7696_v8 }
 0x4d6   : > { %v5286_v19 = vsel %vm10630_vm7, %v5257_v60, %v5285_v11  ;;  %v5100_v43 = vmax.f32 %v5098_v41, %v5099_v35  ;;  %v5106_v62 = vrot.slane %v5105_v31, 2  ;;  %v5258_v2 = vunpack.c.l.b16 %v5194_v17  ;;  %7147 = vmatpush3.bf16.msra.mxu0 %v7697_v33 }
 0x4d7   : > { %v10093_v18 = vpack.c.b16 %v5286_v19, %v5279_v3  ;;  %v5137_v57 = vmax.f32 %v5135_v52, %v5136_v36  ;;  %v10096_v42 = vsel %vm3262_vm3, 0, %v5294_v23  ;;  %v5168_v6 = vmax.f32 %v5130_v53, 0.0  ;;  %v7699_v3 = vld [vmem:[%s10506_s5 + $0x10] sm:$0xff]  }
 0x4d8   : > { %v5101_v38 = vrot.slane %v5100_v43, 1  ;;  %v5107_v37 = vmax.f32 %v5105_v31, %v5106_v62  ;;  %v5372_v47 = vrot.slane %v10096_v42, 3  ;;  %v10102_v59 = vshrl.u32 %v10096_v42, 16  ;;  %7181 = vmatpush3.bf16.msra.mxu1 %v7699_v3  ;;  %v7702_v62 = vld [vmem:[%s10506_s5 + $0x48] sm:$0xff]  }
 0x4d9   : > { %v5373_v20 = vrot.slane %v10093_v18, 3  ;;  %v5327_v16 = vrot.slane %v10093_v18, 1  ;;  %v10105_v29 = vshll.u32 %v10093_v18, 16  ;;  %v10108_v5 = vshrl.u32 %v10093_v18, 16  ;;  %7182 = vmatprep.subr.bf16.mxu1 %v7702_v62 }
 0x4da   : > { %v5102_v40 = vmax.f32 %v5100_v43, %v5101_v38  ;;  %v5108_v28 = vrot.slane %v5107_v37, 1  ;;  %v5326_v48 = vrot.slane %v10096_v42, 1  ;;  %v5259_v49 = vunpack.c.l.b16 %v5195_v21  ;;  %v7701_v43 = vld [vmem:[%s10506_s5 + $0xa0] sm:$0xff]  }
 0x4db   : > { %v5374_v51 = vsel %vm2977_vm12, %v5372_v47, %v5373_v20  ;;  %v5384_v46 = vrot.slane %v10108_v5, 3  ;;  %v5385_v9 = vrot.slane %v10105_v29, 4  ;;  %v10118_v12 = vshll.u32 %v10096_v42, 16  ;;  %v7703_v47 = vld [vmem:[%s10506_s5 + $0x8] sm:$0xff]  }
 0x4dc   : > { %5377 = vrot.lane.b32.xlu0 %v5374_v51, %s7791_s23  ;;  %v5169_v50 = vmax.f32 %v5137_v57, 0.0  ;;  %v5109_v27 = vmax.f32 %v5107_v37, %v5108_v28  ;;  %v5164_v56 = vmax.f32 %v5102_v40, 0.0  ;;  %v5328_v26 = vsel %vm2811_vm9, %v5326_v48, %v5327_v16  ;;  %7183 = vmatpush3.bf16.msra.mxu1 %v7703_v47 }
 0x4dd   : > { %v5381_v1 = vrot.slane %v10102_v59, 3  ;;  %v10124_v11 = vor.u32 %v5385_v9, %v5384_v46  ;;  %v5306_v4 = vrot.slane %v10118_v12, 1  ;;  %v5360_v10 = vrot.slane %v10108_v5, 2  ;;  %v7704_v46 = vld [vmem:[%s10506_s5 + $0xd8] sm:$0xff]  }
 0x4de   : > { %v5165_v32 = vmax.f32 %v5109_v27, 0.0  ;;  %v5196_v45 = vpack.c.bf16 %v5164_v56, %v5164_v56  ;;  %v5311_v52 = vrot.slane %v10105_v29, 1  ;;  %v5361_v24 = vrot.slane %v10105_v29, 3  ;;  %v7705_v9 = vld [vmem:[%s10506_s5 + $0x98] sm:$0xff]   ;;  %v7707_v27 = vld [vmem:[%s10506_s5] sm:$0xff]  }
 0x4df   : > { %v5199_v22 = vpack.c.bf16 %v5167_v61, %v5167_v61  ;;  %vm10631_vm6 = vcmask 1041409   ;;  %v5469_v13 = vsel %vm3010_vm8, %v5381_v1, %v10124_v11  ;;  %v5357_v0 = vrot.slane %v10102_v59, 2 }
 0x4e0   : > { %v5287_v14 = vsel %vm10631_vm6, %v5259_v49, %v5258_v2  ;;  %5331 = vrot.lane.b32.xlu0 %v5328_v26, %s7791_s23  ;;  %v5197_v25 = vpack.c.bf16 %v5165_v32, %v5165_v32  ;;  %v5260_v60 = vunpack.c.l.b16 %v5196_v45  ;;  %5470 = vrot.lane.b32.xlu1 %v5469_v13, %s7793_s25  ;;  %v5307_v34 = vor.u32 %v5306_v4, %v10102_v59 }
 0x4e1   : > { %v5358_v15 = vrot.slane %v10118_v12, 3  ;;  %v5200_v63 = vpack.c.bf16 %v5168_v6, %v5168_v6  ;;  %v5201_v44 = vpack.c.bf16 %v5169_v50, %v5169_v50  ;;  %v10140_v55 = vor.u32 %v5361_v24, %v5360_v10  ;;  %v7706_v50 = vld [vmem:[%s10506_s5 + $0x40] sm:$0xff]  }
 0x4e2   : > { %v5338_v41 = vrot.slane %v10108_v5, 1  ;;  %v5261_v30 = vunpack.c.l.b16 %v5197_v25  ;;  %vm10632_vm13 = vcmask 1042434   ;;  %vm10633_vm14 = vsmask.f32 7424  ;;  %7184 = vmatprep.subr.bf16.mxu1 %v7706_v50  ;;  %v7710_v25 = vld [vmem:[%s10506_s5 + $0xc8] sm:$0xff]  }
 0x4e3   : > { %v5288_v17 = vsel %vm10632_vm13, %v5260_v60, %v5287_v14  ;;  %v5312_v36 = vsel %vm10633_vm14, %v5307_v34, %v5311_v52  ;;  %v5339_v54 = vrot.slane %v10105_v29, 2  ;;  %v5262_v39 = vunpack.c.l.b16 %v10090_v58  ;;  %v7700_v58 = vld [vmem:[%s10506_s5 + $0xe0] sm:$0xff]   ;;  %7185 = vmatpush3.bf16.msra.mxu1 %v7707_v27  ;;  %v7711_v60 = vld [vmem:[%s10506_s5 + $0x88] sm:$0xff]  }
 0x4e4   : > { %v5263_v35 = vunpack.c.l.b16 %v5199_v22  ;;  %5320 = vrot.lane.b32.xlu0 %v5312_v36, %s7790_s22  ;;  %vm10634_vm11 = vcmask 1043459   ;;  %v5359_v19 = vor.u32 %v5358_v15, %v5357_v0  ;;  %v5335_v53 = vrot.slane %v10102_v59, 1  ;;  %7148 = vmatprep.subr.bf16.mxu0 %v7700_v58  ;;  %v7708_v59 = vld [vmem:[%s10506_s5 + $0xd0] sm:$0xff]  }
 0x4e5   : > { %v5289_v31 = vsel %vm10634_vm11, %v5261_v30, %v5288_v17  ;;  %v5336_v23 = vrot.slane %v10118_v12, 2  ;;  %v5264_v61 = vunpack.c.l.b16 %v5200_v63  ;;  %v5265_v2 = vunpack.c.l.b16 %v5201_v44  ;;  %7149 = vmatpush3.bf16.msra.mxu0 %v7701_v43  ;;  %v7712_v44 = vld [vmem:[%s10506_s5 + $0xc0] sm:$0xff]  }
 0x4e6   : > { %v5290_v21 = vsel %vm2611_vm4, %v5262_v39, %v5289_v31  ;;  %vm10635_vm15 = vsmask.f32 5376  ;;  %v10178_v37 = vor.u32 %v5339_v54, %v5338_v41  ;;  %vm10636_vm7 = vcmask 1046534   ;;  %7150 = vmatprep.subr.bf16.mxu0 %v7704_v46  ;;  %v7713_v41 = vld [vmem:[%s10506_s5 + $0x80] sm:$0xff]  }
 0x4e7   : > { %v5291_v57 = vsel %vm2613_vm5, %v5263_v35, %v5290_v21  ;;  %v5363_v38 = vsel %vm10635_vm15, %v5359_v19, %v10140_v55  ;;  %vm10637_vm6 = vcmask 1047559   ;;  %v5337_v28 = vor.u32 %v5336_v23, %v5335_v53 }
 0x4e8   : > { %v5292_v6 = vsel %vm10636_vm7, %v5264_v61, %v5291_v57  ;;  %5368 = vrot.lane.b32.xlu0 %v5363_v38, %s7790_s22  ;;  %v5382_v51 = vrot.slane %v10118_v12, 4  ;;  %vm10638_vm13 = vsmask.f32 6400  ;;  %v5315_v15 = vor.u32 %v10108_v5, %v5311_v52 }
 0x4e9   : > { %v5293_v40 = vsel %vm10637_vm6, %v5265_v2, %v5292_v6  ;;  %v5341_v49 = vsel %vm10638_vm13, %v5337_v28, %v10178_v37  ;;  %7151 = vmatpush3.bf16.msra.mxu0 %v7705_v9  ;;  %v5353_v3 = vrot.slane %v10093_v18, 2  ;;  %v5352_v35 = vrot.slane %v10096_v42, 2 }
 0x4ea   : > { %v5296_v48 = vpack.c.b16 %v5293_v40, %v5293_v40  ;;  %v5383_v4 = vor.u32 %v5382_v51, %v5381_v1  ;;  %v7709_v1 = vld [vmem:[%s10506_s5 + $0x90] sm:$0xff]   ;;  %7152 = vmatprep.subr.bf16.mxu0 %v7708_v59 }
 0x4eb   : > { %v5354_v31 = vsel %vm2895_vm10, %v5352_v35, %v5353_v3 }
 0x4ec   : > { %v10199_v12 = vsel %vm3262_vm3, %v5296_v48, 0  ;;  %5348 = vrot.lane.b32.xlu0 %v5341_v49, %s7793_s25  ;;  %v5387_v24 = vsel %vm3010_vm8, %v5383_v4, %v10124_v11 }
 0x4ed   : > { %v5375_v56 = vrot.slane %v10199_v12, 3  ;;  %v5316_v26 = vshll.u32 %v10199_v12, 16  ;;  %v5342_v10 = vshrl.u32 %v10199_v12, 16  ;;  %v5329_v45 = vrot.slane %v10199_v12, 1  ;;  %7153 = vmatpush3.bf16.msra.mxu0 %v7709_v1 }
 0x4ee   : > { %7154 = vmatprep.subr.bf16.mxu0 %v7710_v25  ;;  %v5355_v6 = vrot.slane %v10199_v12, 2 }
 0x4ef   : > { %v5376_v32 = vsel %vm2977_vm12, %v5373_v20, %v5375_v56  ;;  %v5388_v22 = vrot.slane %v5342_v10, 3  ;;  %v5389_v14 = vrot.slane %v5316_v26, 4  ;;  %v5330_v13 = vsel %vm2811_vm9, %v5327_v16, %v5329_v45  ;;  %vm10639_vm9 = vmmov %vm10633_vm14 }
 0x4f0   : > { %5379 = vrot.lane.b32.xlu1 %v5376_v32, %s7791_s23  ;;  %5392 = vrot.lane.b32.xlu0 %v5387_v24, %s7793_s25  ;;  %v5318_v0 = vrot.slane %v5316_v26, 1  ;;  %v5364_v16 = vrot.slane %v5342_v10, 2  ;;  %v5365_v63 = vrot.slane %v5316_v26, 3  ;;  %v5344_v5 = vrot.slane %v5342_v10, 1  ;;  %vm10641_vm14 = vmmov %vm10638_vm13 }
 0x4f1   : > { %v5390_v20 = vor.u32 %v5389_v14, %v5388_v22  ;;  %7155 = vmatpush3.bf16.msra.mxu0 %v7711_v60  ;;  %v5345_v52 = vrot.slane %v5316_v26, 2 }
 0x4f2   : > { %v5458_v8 = vor.u32 %v5342_v10, %v5318_v0  ;;  %7156 = vmatprep.subr.bf16.mxu0 %v7712_v44  ;;  %v5366_v29 = vor.u32 %v5365_v63, %v5364_v16  ;;  %v7714_v63 = vld [vmem:[%s10508_s7 + $0x78] sm:$0xff]  }
 0x4f3   : > { %v5391_v34 = vsel %vm3010_vm8, %v10124_v11, %v5390_v20  ;;  %v5319_v11 = vsel %vm10639_vm9, %v5315_v15, %v5318_v0  ;;  %vm10640_vm8 = vmmov %vm10635_vm15  ;;  %v5346_v7 = vor.u32 %v5345_v52, %v5344_v5  ;;  %v7715_v44 = vld [vmem:[%s10508_s7 + $0x38] sm:$0xff]   ;;  %v7720_v5 = vld [vmem:[%s10508_s7 + $0x60] sm:$0xff]   ;;  %vm5951_vm15 = vcmask 1040384  }
 0x4f4   : > { %5333 = vrot.lane.b32.xlu1 %v5330_v13, %s7791_s23  ;;  %5394 = vrot.lane.b32.xlu0 %v5391_v34, %s7793_s25  ;;  %v5367_v33 = vsel %vm10640_vm8, %v10140_v55, %v5366_v29  ;;  %v7721_v52 = vld [vmem:[%s10508_s7 + $0x20] sm:$0xff]  }
 0x4f5   : > { %7157 = vmatpush3.bf16.msra.mxu0 %v7713_v41  ;;  %v5347_v30 = vsel %vm10641_vm14, %v10178_v37, %v5346_v7  ;;  %v7716_v41 = vld [vmem:[%s10508_s7 + $0x70] sm:$0xff]  }
 0x4f6   : > { %7198 = vmatprep.subr.bf16.mxu0 %v7714_v63 }
 0x4f8   : > { %5322 = vrot.lane.b32.xlu1 %v5319_v11, %s7790_s22  ;;  %5459 = vrot.lane.b32.xlu0 %v5458_v8, %s7790_s22  ;;  %v7717_v11 = vld [vmem:[%s10508_s7 + $0x30] sm:$0xff]   ;;  %v7718_v8 = vld [vmem:[%s10508_s7 + $0x68] sm:$0xff]  }
 0x4fc   : > { %5465 = vrot.lane.b32.xlu1 %v5366_v29, %s7790_s22  ;;  %5461 = vrot.lane.b32.xlu0 %v5329_v45, %s7791_s23  ;;  %v7719_v29 = vld [vmem:[%s10508_s7 + $0x28] sm:$0xff]  }
 0x500   : > { %5370 = vrot.lane.b32.xlu1 %v5367_v33, %s7790_s22  ;;  %5463 = vrot.lane.b32.xlu0 %v5346_v7, %s7793_s25  ;;  %v7722_v33 = vld [vmem:[%s10508_s7 + $0x58] sm:$0xff]  }
 0x501   : > { %v7723_v7 = vld [vmem:[%s10508_s7 + $0x18] sm:$0xff]  }
 0x504   : > { %5350 = vrot.lane.b32.xlu1 %v5347_v30, %s7793_s25  ;;  %v7724_v30 = vld [vmem:[%s10508_s7 + $0x50] sm:$0xff]  }
 0x508   : > { %5467 = vrot.lane.b32.xlu1 %v5375_v56, %s7791_s23 }
 0x50c   : > { %5472 = vrot.lane.b32.xlu1 %v5390_v20, %s7793_s25 }
 0x54e   : > { %v5378_v17 = vpop.permute.xlu0 %5377 }
 0x552   : > { %v5332_v36 = vpop.permute.xlu0 %5331  ;;  %v5471_v39 = vpop.permute.xlu1 %5470 }
 0x556   : > { %v5321_v54 = vpop.permute.xlu0 %5320 }
 0x557   : > { %v5397_v23 = vsel %vm3076_vm0, %v10096_v42, %v5321_v54  ;;  %v5356_v42 = vsel %vm2895_vm10, %v5353_v3, %v5355_v6  ;;  %v7727_v54 = vld [vmem:[%s10508_s7 + $0x8] sm:$0xff]   ;;  %v7728_v3 = vld [vmem:[%s10508_s7 + $0x40] sm:$0xff]   ;;  %vm10643_vm10 = vmmov %vm10636_vm7  ;;  %vm10646_vm7 = vcmask 1042434  }
 0x558   : > { %v5401_v43 = vsel %vm3110_vm1, %v5397_v23, %v5332_v36  ;;  %v7726_v36 = vld [vmem:[%s10508_s7 + $0x48] sm:$0xff]  }
 0x55a   : > { %v5369_v55 = vpop.permute.xlu0 %5368 }
 0x55b   : > { %v5412_v53 = vsel %vm3076_vm0, %v5354_v31, %v5369_v55  ;;  %v7729_v55 = vld [vmem:[%s10508_s7] sm:$0xff]  }
 0x55c   : > { %v5417_v58 = vsel %vm3110_vm1, %v5412_v53, %v5378_v17  ;;  %v7725_v17 = vld [vmem:[%s10508_s7 + $0x10] sm:$0xff]  }
 0x55d   : > { %v5486_v48 = vsel %vm3144_vm2, %v5417_v58, %v5471_v39 }
 0x55e   : > { %v5349_v19 = vpop.permute.xlu0 %5348  ;;  %v5531_v4 = vrot.slane %v5486_v48, 4 }
 0x55f   : > { %v5405_v2 = vsel %vm3144_vm2, %v5401_v43, %v5349_v19  ;;  %v6920_v43 = vld [vmem:[%s10507_s6] ss:$0 sm:$0xff] }
 0x560   : > { %v5528_v32 = vrot.slane %v5405_v2, 4 }
 0x562   : > { %v5380_v61 = vpop.permute.xlu1 %5379  ;;  %v5393_v21 = vpop.permute.xlu0 %5392 }
 0x563   : > { %v5421_v62 = vsel %vm3144_vm2, %v5417_v58, %v5393_v21 }
 0x564   : > { %5815 = vmatprep.mubr.bf16.mxu1 %v5421_v62 }
 0x565   : > { %5816 = vmatmul.mubr.bf16.vlgmr.msra.gmra.mxu1 %v5405_v2 }
 0x566   : > { %v5334_v57 = vpop.permute.xlu1 %5333  ;;  %v5395_v38 = vpop.permute.xlu0 %5394 }
 0x56a   : > { %v5323_v37 = vpop.permute.xlu1 %5322  ;;  %v5460_v47 = vpop.permute.xlu0 %5459 }
 0x56b   : > { %v5399_v51 = vsel %vm3076_vm0, %v10093_v18, %v5323_v37  ;;  %v5475_v59 = vsel %vm3076_vm0, %v10199_v12, %v5460_v47 }
 0x56c   : > { %v5403_v26 = vsel %vm3110_vm1, %v5399_v51, %v5334_v57 }
 0x56e   : > { %v5466_v40 = vpop.permute.xlu1 %5465  ;;  %v5462_v46 = vpop.permute.xlu0 %5461 }
 0x56f   : > { %v5477_v14 = vsel %vm3110_vm1, %v5475_v59, %v5462_v46  ;;  %v5482_v13 = vsel %vm3076_vm0, %v5355_v6, %v5466_v40 }
 0x572   : > { %v5371_v28 = vpop.permute.xlu1 %5370  ;;  %v5464_v24 = vpop.permute.xlu0 %5463 }
 0x573   : > { %v5415_v49 = vsel %vm3076_vm0, %v5356_v42, %v5371_v28  ;;  %v5479_v20 = vsel %vm3144_vm2, %v5477_v14, %v5464_v24  ;;  %vm10644_vm0 = vcmask 1041409  }
 0x574   : > { %v5419_v9 = vsel %vm3110_vm1, %v5415_v49, %v5380_v61  ;;  %v5534_v60 = vrot.slane %v5479_v20, 4 }
 0x575   : > { %v5424_v50 = vsel %vm3144_vm2, %v5419_v9, %v5395_v38 }
 0x576   : > { %v5351_v27 = vpop.permute.xlu1 %5350  ;;  %v5532_v56 = vrot.slane %v5424_v50, 4  ;;  %5823 = vmatprep.mubr.bf16.mxu1 %v5424_v50 }
 0x577   : > { %v5408_v10 = vsel %vm3144_vm2, %v5403_v26, %v5351_v27 }
 0x578   : > { %v5529_v45 = vrot.slane %v5408_v10, 4  ;;  %5824 = vmatmul.mubr.bf16.gmra.mxu1 %v5408_v10  ;;  %v5533_v18 = vsel %vm3262_vm3, %v5531_v4, %v5532_v56 }
 0x579   : > { %5670 = vmatprep.mubr.bf16.mxu0 %v5533_v18 }
 0x57a   : > { %v5468_v1 = vpop.permute.xlu1 %5467  ;;  %v5530_v22 = vsel %vm3262_vm3, %v5528_v32, %v5529_v45  ;;  %v5535_v12 = vsel %vm3262_vm3, %v5529_v45, %v5534_v60 }
 0x57b   : > { %5671 = vmatmul.mubr.bf16.vlgmr.msra.gmra.mxu0 %v5530_v22  ;;  %v5484_v0 = vsel %vm3110_vm1, %v5482_v13, %v5468_v1 }
 0x57c   : > { %7199 = vmatpush3.bf16.msra.mxu0 %v7715_v44 }
 0x57d   : > { %7200 = vmatprep.subr.bf16.mxu0 %v7716_v41 }
 0x57e   : > { %v5473_v25 = vpop.permute.xlu1 %5472 }
 0x57f   : > { %v5488_v34 = vsel %vm3144_vm2, %v5484_v0, %v5473_v25  ;;  %vm5855_vm2 = vcmask 519168  }
 0x580   : > { %v5536_v15 = vrot.slane %v5488_v34, 4  ;;  %7201 = vmatpush3.bf16.msra.mxu0 %v7717_v11 }
 0x581   : > { %7202 = vmatprep.subr.bf16.mxu0 %v7718_v8 }
 0x582   : > { %v5537_v16 = vsel %vm3262_vm3, %v5532_v56, %v5536_v15  ;;  %vm10642_vm3 = vmmov %vm10634_vm11 }
 0x583   : > { %5678 = vmatprep.mubr.bf16.mxu0 %v5537_v16  ;;  %vm10645_vm11 = vmmov %vm10637_vm6 }
 0x584   : > { %5679 = vmatmul.mubr.bf16.gmra.mxu0 %v5535_v12  ;;  %vm10647_vm6 = vmmov %vm10642_vm3 }
 0x585   : > { %7203 = vmatpush3.bf16.msra.mxu0 %v7719_v29  ;;  %vm10649_vm9 = vmmov %vm10642_vm3 }
 0x586   : > { %7204 = vmatprep.subr.bf16.mxu0 %v7720_v5  ;;  %vm10650_vm8 = vmmov %vm10645_vm11 }
 0x589   : > { %7205 = vmatpush3.bf16.msra.mxu0 %v7721_v52 }
 0x58a   : > { %7206 = vmatprep.subr.bf16.mxu0 %v7722_v33 }
 0x58d   : > { %7207 = vmatpush3.bf16.msra.mxu0 %v7723_v7 }
 0x58e   : > { %7208 = vmatprep.subr.bf16.mxu0 %v7724_v30 }
 0x591   : > { %7209 = vmatpush3.bf16.msra.mxu0 %v7725_v17 }
 0x592   : > { %7210 = vmatprep.subr.bf16.mxu0 %v7726_v36 }
 0x595   : > { %7211 = vmatpush3.bf16.msra.mxu0 %v7727_v54 }
 0x596   : > { %7212 = vmatprep.subr.bf16.mxu0 %v7728_v3 }
 0x599   : > { %7213 = vmatpush3.bf16.msra.mxu0 %v7729_v55 }
 0x625   : > { %v7186_v39 = vpop.f32.mrf.mxu1 }
 0x627   : > { %v7187_v35 = vpop.f32.mrf.mxu1 }
 0x628   : > { %v7188_v21 = vadd.f32 %v7187_v35, %v7186_v39 }
 0x629   : > { %v7189_v31 = vpop.f32.mrf.mxu1 }
 0x62b   : > { %v7190_v19 = vpop.f32.mrf.mxu1 }
 0x62c   : > { %v7191_v37 = vadd.f32 %v7190_v19, %v7189_v31 }
 0x638   : > { %v7192_v23 = vpop.f32.mrf.mxu1 }
 0x63a   : > { %v7193_v57 = vpop.f32.mrf.mxu1 }
 0x63b   : > { %v7158_v53 = vpop.f32.mrf.mxu0  ;;  %v7194_v27 = vadd.f32 %v7193_v57, %v7192_v23 }
 0x63c   : > { %v7195_v48 = vpop.f32.mrf.mxu1 }
 0x63d   : > { %v7159_v61 = vpop.f32.mrf.mxu0 }
 0x63e   : > { %v7160_v58 = vadd.f32 %v7159_v61, %v7158_v53  ;;  %v7196_v59 = vpop.f32.mrf.mxu1 }
 0x63f   : > { %v7161_v62 = vpop.f32.mrf.mxu0  ;;  %v7197_v34 = vadd.f32 %v7196_v59, %v7195_v48 }
 0x640   : > { %v5818_v2 = vadd.f32 %v7188_v21, %v7160_v58 }
 0x641   : > { %v7162_v38 = vpop.f32.mrf.mxu0 }
 0x642   : > { %v5839_v47 = vadd.f32 %v6920_v43, %v5818_v2  ;;  %v7163_v6 = vadd.f32 %v7162_v38, %v7161_v62 }
 0x644   : > { %v5847_v40 = vcombine.high %v5839_v47, %v5839_v47  ;;  %v5856_v42 = vsel %vm5855_vm2, %v5839_v47, -inf  ;;  %v5821_v28 = vadd.f32 %v7191_v37, %v7163_v6  ;;  %v7164_v51 = vpop.f32.mrf.mxu0 }
 0x645   : > { %v5857_v49 = vrot.slane %v5856_v42, 4 }
 0x646   : > { %v5863_v46 = vsel %vm5855_vm2, %v5847_v40, -inf  ;;  %v5840_v9 = vadd.f32 %v6920_v43, %v5821_v28  ;;  %v7165_v50 = vpop.f32.mrf.mxu0 }
 0x647   : > { %v5858_v56 = vmax.f32 %v5856_v42, %v5857_v49  ;;  %v5864_v26 = vrot.slane %v5863_v46, 4  ;;  %v7166_v4 = vadd.f32 %v7165_v50, %v7164_v51 }
 0x648   : > { %v5848_v10 = vcombine.high %v5840_v9, %v5840_v9  ;;  %v5870_v32 = vsel %vm5855_vm2, %v5840_v9, -inf  ;;  %v7167_v45 = vpop.f32.mrf.mxu0 }
 0x649   : > { %v5859_v18 = vrot.slane %v5858_v56, 2  ;;  %v5865_v24 = vmax.f32 %v5863_v46, %v5864_v26  ;;  %v5871_v1 = vrot.slane %v5870_v32, 4  ;;  %v5826_v22 = vadd.f32 %v7194_v27, %v7166_v4 }
 0x64a   : > { %v5877_v14 = vsel %vm5855_vm2, %v5848_v10, -inf  ;;  %v7168_v20 = vpop.f32.mrf.mxu0 }
 0x64b   : > { %v5860_v13 = vmax.f32 %v5858_v56, %v5859_v18  ;;  %v5866_v0 = vrot.slane %v5865_v24, 2  ;;  %v5872_v25 = vmax.f32 %v5870_v32, %v5871_v1  ;;  %v5878_v60 = vrot.slane %v5877_v14, 4 }
 0x64c   : > { %v5841_v15 = vadd.f32 %v6920_v43, %v5826_v22  ;;  %v7169_v16 = vadd.f32 %v7168_v20, %v7167_v45 }
 0x64d   : > { %v5861_v12 = vrot.slane %v5860_v13, 1  ;;  %v5867_v63 = vmax.f32 %v5865_v24, %v5866_v0  ;;  %v5873_v44 = vrot.slane %v5872_v25, 2  ;;  %v5879_v41 = vmax.f32 %v5877_v14, %v5878_v60 }
 0x64e   : > { %v5849_v11 = vcombine.high %v5841_v15, %v5841_v15  ;;  %v5884_v8 = vsel %vm5855_vm2, %v5841_v15, -inf  ;;  %v5829_v29 = vadd.f32 %v7197_v34, %v7169_v16 }
 0x64f   : > { %v5862_v5 = vmax.f32 %v5860_v13, %v5861_v12  ;;  %v5868_v52 = vrot.slane %v5867_v63, 1  ;;  %v5874_v33 = vmax.f32 %v5872_v25, %v5873_v44  ;;  %v5880_v7 = vrot.slane %v5879_v41, 2 }
 0x650   : > { %v5885_v30 = vrot.slane %v5884_v8, 4  ;;  %v5891_v17 = vsel %vm5855_vm2, %v5849_v11, -inf  ;;  %v5842_v36 = vadd.f32 %v6920_v43, %v5829_v29 }
 0x651   : > { %v5869_v54 = vmax.f32 %v5867_v63, %v5868_v52  ;;  %v5875_v3 = vrot.slane %v5874_v33, 1  ;;  %v5881_v55 = vmax.f32 %v5879_v41, %v5880_v7  ;;  %v5892_v35 = vrot.slane %v5891_v17, 4 }
 0x652   : > { %v5886_v39 = vmax.f32 %v5884_v8, %v5885_v30  ;;  %v5850_v31 = vcombine.high %v5842_v36, %v5842_v36  ;;  %v5898_v19 = vsel %vm5855_vm2, %v5842_v36, -inf  ;;  %v5912_v53 = vmax.f32 %v5862_v5, 0.0  ;;  %v7732_v36 = vld [vmem:[%s10510_s9 + $0x74] ss:$8 sps:$4 sm:$0xff]  }
 0x653   : > { %v5913_v23 = vmax.f32 %v5869_v54, 0.0  ;;  %v5876_v61 = vmax.f32 %v5874_v33, %v5875_v3  ;;  %v5882_v21 = vrot.slane %v5881_v55, 1  ;;  %v5893_v62 = vmax.f32 %v5891_v17, %v5892_v35  ;;  %v7730_v17 = vld [vmem:[%s10510_s9 + $0x70] ss:$8 sps:$4 sm:$0xff]   ;;  %v7735_v3 = vld [vmem:[%s10510_s9 + $0x64] ss:$8 sps:$4 sm:$0xff]   ;;  %6441 = vmatprep.subr.bf16.mxu1 %v7732_v36 }
 0x654   : > { %v5887_v58 = vrot.slane %v5886_v39, 2  ;;  %v5899_v2 = vrot.slane %v5898_v19, 4  ;;  %v5905_v57 = vsel %vm5855_vm2, %v5850_v31, -inf  ;;  %v5920_v28 = vpack.c.bf16 %v5912_v53, %v5912_v53  ;;  %6442 = vmatpush1.bf16.msra.mxu1 %v7730_v17  ;;  %v7738_v31 = vld [vmem:[%s10510_s9 + $0x54] ss:$8 sps:$4 sm:$0xff]  }
 0x655   : > { %v5921_v38 = vpack.c.bf16 %v5913_v23, %v5913_v23  ;;  %v5883_v37 = vmax.f32 %v5881_v55, %v5882_v21  ;;  %v5914_v43 = vmax.f32 %v5876_v61, 0.0  ;;  %v5894_v6 = vrot.slane %v5893_v62, 2  ;;  %6443 = vmatprep.subr.bf16.mxu1 %v7735_v3 }
 0x656   : > { %v5888_v47 = vmax.f32 %v5886_v39, %v5887_v58  ;;  %v5900_v40 = vmax.f32 %v5898_v19, %v5899_v2  ;;  %v5906_v42 = vrot.slane %v5905_v57, 4  ;;  %v5936_v32 = vunpack.c.l.b16 %v5920_v28  ;;  %v7733_v39 = vld [vmem:[%s10510_s9 + $0x60] ss:$8 sps:$4 sm:$0xff]   ;;  %v7736_v58 = vld [vmem:[%s10510_s9 + $0x50] ss:$8 sps:$4 sm:$0xff]  }
 0x657   : > { %v5915_v51 = vmax.f32 %v5883_v37, 0.0  ;;  %v5895_v49 = vmax.f32 %v5893_v62, %v5894_v6  ;;  %v5937_v50 = vunpack.c.l.b16 %v5921_v38  ;;  %v5922_v27 = vpack.c.bf16 %v5914_v43, %v5914_v43  ;;  %v7739_v38 = vld [vmem:[%s10510_s9 + $0x40] ss:$8 sps:$4 sm:$0xff]   ;;  %v7744_v37 = vld [vmem:[%s10510_s9 + $0x34] ss:$8 sps:$4 sm:$0xff]  }
 0x658   : > { %v5889_v48 = vrot.slane %v5888_v47, 1  ;;  %v5901_v46 = vrot.slane %v5900_v40, 2  ;;  %v5907_v9 = vmax.f32 %v5905_v57, %v5906_v42  ;;  %6444 = vmatpush1.bf16.msra.mxu1 %v7733_v39  ;;  %v7741_v57 = vld [vmem:[%s10510_s9 + $0x44] ss:$8 sps:$4 sm:$0xff]   ;;  %v7742_v43 = vld [vmem:[%s10510_s9 + $0x30] ss:$8 sps:$4 sm:$0xff]  }
 0x659   : > { %v5896_v26 = vrot.slane %v5895_v49, 1  ;;  %v5923_v45 = vpack.c.bf16 %v5915_v51, %v5915_v51  ;;  %v5944_v22 = vsel %vm10642_vm3, %v5937_v50, %v5936_v32  ;;  %v5938_v14 = vunpack.c.l.b16 %v5922_v27  ;;  %6445 = vmatprep.subr.bf16.mxu1 %v7738_v31  ;;  %v7745_v6 = vld [vmem:[%s10510_s9 + $0x20] ss:$8 sps:$4 sm:$0xff]   ;;  %v7756_v27 = vld [vmem:[%s10510_s9 + $0xf4] ss:$8 sps:$4 sm:$0xff]  }
 0x65a   : > { %v5890_v56 = vmax.f32 %v5888_v47, %v5889_v48  ;;  %v5902_v4 = vmax.f32 %v5900_v40, %v5901_v46  ;;  %v5908_v10 = vrot.slane %v5907_v9, 2  ;;  %v7747_v47 = vld [vmem:[%s10510_s9 + $0x24] ss:$8 sps:$4 sm:$0xff]   ;;  %v7750_v46 = vld [vmem:[%s10510_s9 + $0x14] ss:$8 sps:$4 sm:$0xff]  }
 0x65b   : > { %v5897_v18 = vmax.f32 %v5895_v49, %v5896_v26  ;;  %v5939_v60 = vunpack.c.l.b16 %v5923_v45  ;;  %v5945_v12 = vsel %vm2611_vm4, %v5938_v14, %v5944_v22  ;;  %v7748_v49 = vld [vmem:[%s10510_s9 + $0x10] ss:$8 sps:$4 sm:$0xff]   ;;  %v7751_v50 = vld [vmem:[%s10510_s9] ss:$8 sps:$4 sm:$0xff]   ;;  %v7759_v26 = vld [vmem:[%s10510_s9 + $0xe4] ss:$8 sps:$4 sm:$0xff]  }
 0x65c   : > { %v5916_v24 = vmax.f32 %v5890_v56, 0.0  ;;  %v5903_v59 = vrot.slane %v5902_v4, 1  ;;  %v5909_v1 = vmax.f32 %v5907_v9, %v5908_v10  ;;  %6446 = vmatpush1.bf16.msra.mxu1 %v7736_v58  ;;  %v7753_v9 = vld [vmem:[%s10510_s9 + $0x4] ss:$8 sps:$4 sm:$0xff]   ;;  %v7754_v56 = vld [vmem:[%s10510_s9 + $0xf0] ss:$8 sps:$4 sm:$0xff]  }
 0x65d   : > { %v5917_v20 = vmax.f32 %v5897_v18, 0.0  ;;  %v5946_v11 = vsel %vm2613_vm5, %v5939_v60, %v5945_v12  ;;  %6447 = vmatprep.subr.bf16.mxu1 %v7741_v57  ;;  %v7762_v10 = vld [vmem:[%s10510_s9 + $0xd4] ss:$8 sps:$4 sm:$0xff]   ;;  %v7760_v32 = vld [vmem:[%s10510_s9 + $0xd0] ss:$8 sps:$4 sm:$0xff]  }
 0x65e   : > { %v5924_v13 = vpack.c.bf16 %v5916_v24, %v5916_v24  ;;  %v5904_v0 = vmax.f32 %v5902_v4, %v5903_v59  ;;  %v5910_v25 = vrot.slane %v5909_v1, 1  ;;  %v7757_v4 = vld [vmem:[%s10510_s9 + $0xe0] ss:$8 sps:$4 sm:$0xff]   ;;  %v7765_v45 = vld [vmem:[%s10510_s9 + $0xc4] ss:$8 sps:$4 sm:$0xff]  }
 0x65f   : > { %v5925_v34 = vpack.c.bf16 %v5917_v20, %v5917_v20  ;;  %v7763_v18 = vld [vmem:[%s10510_s9 + $0xc0] ss:$8 sps:$4 sm:$0xff]   ;;  %v7768_v24 = vld [vmem:[%s10510_s9 + $0xb4] ss:$8 sps:$4 sm:$0xff]   ;;  %v7766_v59 = vld [vmem:[%s10510_s9 + $0xb0] ss:$8 sps:$4 sm:$0xff]  }
 0x660   : > { %v5911_v15 = vmax.f32 %v5909_v1, %v5910_v25  ;;  %v5918_v16 = vmax.f32 %v5904_v0, 0.0  ;;  %v5940_v63 = vunpack.c.l.b16 %v5924_v13  ;;  %6448 = vmatpush1.bf16.msra.mxu1 %v7739_v38  ;;  %v7771_v1 = vld [vmem:[%s10510_s9 + $0xa4] ss:$8 sps:$4 sm:$0xff]   ;;  %v7769_v22 = vld [vmem:[%s10510_s9 + $0xa0] ss:$8 sps:$4 sm:$0xff]  }
 0x661   : > { %v5941_v8 = vunpack.c.l.b16 %v5925_v34  ;;  %6449 = vmatprep.subr.bf16.mxu1 %v7744_v37  ;;  %v7774_v14 = vld [vmem:[%s10510_s9 + $0x94] ss:$8 sps:$4 sm:$0xff]   ;;  %v7772_v20 = vld [vmem:[%s10510_s9 + $0x90] ss:$8 sps:$4 sm:$0xff]   ;;  %v7777_v13 = vld [vmem:[%s10510_s9 + $0x84] ss:$8 sps:$4 sm:$0xff]   ;;  %v6158_v34 = vlaneseq }
 0x662   : > { %v5919_v44 = vmax.f32 %v5911_v15, 0.0  ;;  %v5926_v41 = vpack.c.bf16 %v5918_v16, %v5918_v16  ;;  %v5947_v5 = vsel %vm10643_vm10, %v5940_v63, %v5946_v11  ;;  %v7775_v0 = vld [vmem:[%s10510_s9 + $0x80] ss:$8 sps:$4 sm:$0xff]   ;;  %v7797_v25 = vmov 1983009808  }
 0x663   : > { %v5948_v30 = vsel %vm10645_vm11, %v5941_v8, %v5947_v5  ;;  %v6156_v60 = vunpack.c.l.s4 %v7797_v25  ;;  %v10458_v16 = vshrl.u32 %v6158_v34, 7  ;;  %v6921_v63 = vld [vmem:[%s10509_s8] ss:$0 sm:$0xff] }
 0x664   : > { %v5927_v29 = vpack.c.bf16 %v5919_v44, %v5919_v44  ;;  %v5942_v52 = vunpack.c.l.b16 %v5926_v41  ;;  %6450 = vmatpush1.bf16.msra.mxu1 %v7742_v43 }
 0x665   : > { %6451 = vmatprep.subr.bf16.mxu1 %v7747_v47  ;;  %v6157_v15 = vunpack.c.0.s8 %v6156_v60 }
 0x666   : > { %v5943_v33 = vunpack.c.l.b16 %v5927_v29 }
 0x667   : > { %v10464_v11 = vsub.s32 %v6157_v15, %v10458_v16  ;;  %v6273_v15 = vsub.s32 0, %v10458_v16 }
 0x668   : > { %v5949_v7 = vsel %vm10644_vm0, %v5943_v33, %v5942_v52  ;;  %6452 = vmatpush1.bf16.msra.mxu1 %v7745_v6 }
 0x669   : > { %v5950_v54 = vpack.c.b16 %v5949_v7, %v5948_v30  ;;  %6453 = vmatprep.subr.bf16.mxu1 %v7750_v46 }
 0x66b   : > { %v5953_v55 = vsel %vm5951_vm15, 0, %v5950_v54 }
 0x66c   : > { %v5955_v35 = vsel %vm2977_vm12, %v5953_v55, 0  ;;  %6454 = vmatpush1.bf16.msra.mxu1 %v7748_v49  ;;  %vm6226_vm12 = vsmask.f32 256 }
 0x66d   : > { %v5956_v19 = vshrl.u32 %v5955_v35, 16  ;;  %v5958_v53 = vshll.u32 %v5955_v35, 16  ;;  %v5965_v40 = vrot.slane %v5955_v35, 1  ;;  %6455 = vmatprep.subr.bf16.mxu1 %v7753_v9  ;;  %vm6227_vm13 = vmand %vm5951_vm15, %vm6226_vm12 }
 0x66f   : > { %v5966_v23 = vrot.slane %v5956_v19, 1  ;;  %v5967_v61 = vrot.slane %v5958_v53, 2  ;;  %v5960_v21 = vrot.slane %v5958_v53, 1 }
 0x670   : > { %6456 = vmatpush1.bf16.msra.mxu1 %v7751_v50 }
 0x671   : > { %v5968_v62 = vor.u32 %v5967_v61, %v5966_v23  ;;  %v5961_v2 = vor.u32 %v5960_v21, %v5956_v19  ;;  %6457 = vmatprep.subr.bf16.mxu1 %v7756_v27 }
 0x673   : > { %5969 = vrot.lane.b32.xlu1 %v5968_v62, %s7791_s23  ;;  %5962 = vrot.lane.b32.xlu0 %v5961_v2, %s7791_s23 }
 0x674   : > { %6458 = vmatpush2.bf16.msra.mxu1 %v7754_v56 }
 0x675   : > { %6459 = vmatprep.subr.bf16.mxu1 %v7759_v26 }
 0x678   : > { %6460 = vmatpush2.bf16.msra.mxu1 %v7757_v4 }
 0x679   : > { %6461 = vmatprep.subr.bf16.mxu1 %v7762_v10 }
 0x67c   : > { %6462 = vmatpush2.bf16.msra.mxu1 %v7760_v32 }
 0x67d   : > { %6463 = vmatprep.subr.bf16.mxu1 %v7765_v45 }
 0x680   : > { %6464 = vmatpush2.bf16.msra.mxu1 %v7763_v18 }
 0x681   : > { %6465 = vmatprep.subr.bf16.mxu1 %v7768_v24 }
 0x684   : > { %6466 = vmatpush2.bf16.msra.mxu1 %v7766_v59 }
 0x685   : > { %6467 = vmatprep.subr.bf16.mxu1 %v7771_v1 }
 0x688   : > { %6468 = vmatpush2.bf16.msra.mxu1 %v7769_v22 }
 0x689   : > { %6469 = vmatprep.subr.bf16.mxu1 %v7774_v14 }
 0x68c   : > { %6470 = vmatpush2.bf16.msra.mxu1 %v7772_v20 }
 0x68d   : > { %6471 = vmatprep.subr.bf16.mxu1 %v7777_v13 }
 0x690   : > { %6472 = vmatpush2.bf16.msra.mxu1 %v7775_v0 }
 0x6e5   : > { %v5970_v42 = vpop.permute.xlu1 %5969  ;;  %v5963_v28 = vpop.permute.xlu0 %5962 }
 0x6e6   : > { %v5972_v51 = vsel %vm3110_vm1, %v5955_v35, %v5963_v28  ;;  %v5976_v48 = vsel %vm3110_vm1, %v5965_v40, %v5970_v42  ;;  %vm6175_vm1 = vcmask 1041408  }
 0x6e7   : > { %6145 = vmatprep.mubr.bf16.mxu0 %v5976_v48 }
 0x6e8   : > { %6146 = vmatmul.mubr.bf16.vlgmr.msra.gmra.mxu0 %v5972_v51 }
 0x7a8   : > { %v7214_v12 = vpop.f32.mrf.mxu0 }
 0x7aa   : > { %v7215_v44 = vpop.f32.mrf.mxu0 }
 0x7ab   : > { %v7216_v41 = vadd.f32 %v7215_v44, %v7214_v12  ;;  %v6277_v12 = vsub.s32 1, %v10458_v16 }
 0x7ac   : > { %v7217_v8 = vpop.f32.mrf.mxu0 }
 0x7ad   : > { %v6148_v29 = vadd.f32 %v7216_v41, %v6921_v63  ;;  %v6269_v63 = vld [vmem:[%s10511_s10] sm:$0x3] }
 0x7ae   : > { %v7218_v5 = vpop.f32.mrf.mxu0  ;;  %v6274_v44 = vrot.slane %v6269_v63, %v6273_v15  ;;  %v6278_v41 = vrot.slane %v6269_v63, %v6277_v12 }
 0x7af   : > { %v6154_v52 = vcombine.high %v6148_v29, %v6148_v29  ;;  %v6161_v33 = vrot.slane %v6148_v29, %v10464_v11 }
 0x7b1   : > { %v6168_v7 = vrot.slane %v6154_v52, %v10464_v11  ;;  %v6169_v30 = vcombine.high %v6161_v33, %v6161_v33  ;;  %v6176_v17 = vsel %vm6175_vm1, %v6161_v33, -inf }
 0x7b2   : > { %v6177_v36 = vrot.slane %v6176_v17, 4 }
 0x7b3   : > { %v6170_v54 = vcombine.high %v6168_v7, %v6168_v7  ;;  %v6183_v3 = vsel %vm6175_vm1, %v6169_v30, -inf  ;;  %v6190_v55 = vsel %vm6175_vm1, %v6168_v7, -inf }
 0x7b4   : > { %v6178_v39 = vmax.f32 %v6176_v17, %v6177_v36  ;;  %v6184_v35 = vrot.slane %v6183_v3, 4  ;;  %v6191_v31 = vrot.slane %v6190_v55, 4 }
 0x7b5   : > { %v6197_v19 = vsel %vm6175_vm1, %v6170_v54, -inf }
 0x7b6   : > { %v6179_v53 = vrot.slane %v6178_v39, 2  ;;  %v6185_v23 = vmax.f32 %v6183_v3, %v6184_v35  ;;  %v6192_v61 = vmax.f32 %v6190_v55, %v6191_v31  ;;  %v6198_v21 = vrot.slane %v6197_v19, 4 }
 0x7b8   : > { %v6180_v58 = vmax.f32 %v6178_v39, %v6179_v53  ;;  %v6186_v62 = vrot.slane %v6185_v23, 2  ;;  %v6193_v2 = vrot.slane %v6192_v61, 2  ;;  %v6199_v57 = vmax.f32 %v6197_v19, %v6198_v21 }
 0x7ba   : > { %v6181_v38 = vrot.slane %v6180_v58, 1  ;;  %v6187_v37 = vmax.f32 %v6185_v23, %v6186_v62  ;;  %v6194_v43 = vmax.f32 %v6192_v61, %v6193_v2  ;;  %v6200_v47 = vrot.slane %v6199_v57, 2 }
 0x7bc   : > { %v6182_v6 = vmax.f32 %v6180_v58, %v6181_v38  ;;  %v6188_v40 = vrot.slane %v6187_v37, 1  ;;  %v6195_v42 = vrot.slane %v6194_v43, 1  ;;  %v6201_v28 = vmax.f32 %v6199_v57, %v6200_v47 }
 0x7be   : > { %v6189_v51 = vmax.f32 %v6187_v37, %v6188_v40  ;;  %v6196_v48 = vmax.f32 %v6194_v43, %v6195_v42  ;;  %v6202_v49 = vrot.slane %v6201_v28, 1  ;;  %v6204_v46 = vmax.f32 %v6182_v6, 0.0 }
 0x7c0   : > { %v6203_v9 = vmax.f32 %v6201_v28, %v6202_v49  ;;  %v6205_v50 = vmax.f32 %v6189_v51, 0.0  ;;  %v6206_v27 = vmax.f32 %v6196_v48, 0.0  ;;  %v6208_v56 = vpack.c.bf16 %v6204_v46, %v6204_v46 }
 0x7c2   : > { %v6209_v26 = vpack.c.bf16 %v6205_v50, %v6205_v50  ;;  %v6210_v4 = vpack.c.bf16 %v6206_v27, %v6206_v27  ;;  %v6207_v10 = vmax.f32 %v6203_v9, 0.0  ;;  %v6216_v32 = vunpack.c.l.b16 %v6208_v56 }
 0x7c4   : > { %v6217_v45 = vunpack.c.l.b16 %v6209_v26  ;;  %v6218_v18 = vunpack.c.l.b16 %v6210_v4  ;;  %v6211_v24 = vpack.c.bf16 %v6207_v10, %v6207_v10 }
 0x7c6   : > { %v6219_v59 = vunpack.c.l.b16 %v6211_v24  ;;  %v6220_v1 = vsel %vm10646_vm7, %v6217_v45, %v6216_v32 }
 0x7c7   : > { %v6221_v22 = vsel %vm10647_vm6, %v6218_v18, %v6220_v1 }
 0x7c8   : > { %v6222_v14 = vsel %vm2611_vm4, %v6219_v59, %v6221_v22  ;;  %vm10648_vm4 = vmmov %vm10644_vm0 }
 0x7c9   : > { %v6223_v20 = vpack.c.b16 %v6222_v14, %v6222_v14 }
 0x7cb   : > { %v6228_v13 = vsel %vm6227_vm13, 0, %v6223_v20 }
 0x7cc   : > { %v6232_v0 = vshll.u32 %v6228_v13, 16  ;;  %v6230_v25 = vshrl.u32 %v6228_v13, 16 }
 0x7ce   : > { %v6234_v60 = vrot.slane %v6232_v0, 1 }
 0x7d0   : > { %v6235_v34 = vor.u32 %v6234_v60, %v6230_v25 }
 0x7d2   : > { %6473 = vmatprep.mubr.bf16.mxu1 %v6235_v34 }
 0x7d3   : > { %6474 = vmatmul.mubr.bf16.vlgmr.msra.gmra.mxu1 %v6228_v13 }
 0x893   : > { %v6475_v8 = vpop.f32.mrf.mxu1 }
 0x894   : > { %v6476_v5 = vadd.f32 %v6475_v8, %v6274_v44 }
 0x895   : > { %v6477_v29 = vpop.f32.mrf.mxu1 }
 0x896   : > { %v6478_v52 = vadd.f32 %v6477_v29, %v6278_v41 }
 0x897   : > { %v6479_v33 = vpop.f32.mrf.mxu1 }
 0x898   : > { %v6484_v7 = vcombine.low %v6476_v5, %v6478_v52 }
 0x899   : > { %v6480_v30 = vpop.f32.mrf.mxu1 }
 0x89a   : > { %v6491_v17 = vrot.slane %v6484_v7, %v10464_v11 }
 0x89c   : > { %v6492_v36 = vcombine.high %v6491_v17, %v6491_v17  ;;  %v6499_v54 = vrot.slane %v6491_v17, %v10464_v11 }
 0x89e   : > { %v6500_v3 = vcombine.high %v6499_v54, %v6499_v54  ;;  %v6507_v16 = vrot.slane %v6492_v36, %v10464_v11  ;;  %v6513_v55 = vsel %vm6175_vm1, %v6499_v54, -inf }
 0x89f   : > { %v6514_v39 = vrot.slane %v6513_v55, 4 }
 0x8a0   : > { %v6508_v35 = vcombine.high %v6507_v16, %v6507_v16  ;;  %v6520_v31 = vsel %vm6175_vm1, %v6500_v3, -inf  ;;  %v6527_v19 = vsel %vm6175_vm1, %v6507_v16, -inf }
 0x8a1   : > { %v6515_v53 = vmax.f32 %v6513_v55, %v6514_v39  ;;  %v6521_v23 = vrot.slane %v6520_v31, 4  ;;  %v6528_v61 = vrot.slane %v6527_v19, 4 }
 0x8a2   : > { %v6534_v21 = vsel %vm6175_vm1, %v6508_v35, -inf }
 0x8a3   : > { %v6516_v58 = vrot.slane %v6515_v53, 2  ;;  %v6522_v62 = vmax.f32 %v6520_v31, %v6521_v23  ;;  %v6529_v2 = vmax.f32 %v6527_v19, %v6528_v61  ;;  %v6535_v57 = vrot.slane %v6534_v21, 4 }
 0x8a5   : > { %v6517_v38 = vmax.f32 %v6515_v53, %v6516_v58  ;;  %v6523_v37 = vrot.slane %v6522_v62, 2  ;;  %v6530_v43 = vrot.slane %v6529_v2, 2  ;;  %v6536_v47 = vmax.f32 %v6534_v21, %v6535_v57 }
 0x8a7   : > { %v6518_v6 = vrot.slane %v6517_v38, 1  ;;  %v6524_v40 = vmax.f32 %v6522_v62, %v6523_v37  ;;  %v6531_v42 = vmax.f32 %v6529_v2, %v6530_v43  ;;  %v6537_v28 = vrot.slane %v6536_v47, 2 }
 0x8a9   : > { %v6525_v51 = vrot.slane %v6524_v40, 1  ;;  %v6532_v48 = vrot.slane %v6531_v42, 1  ;;  %v6538_v49 = vmax.f32 %v6536_v47, %v6537_v28  ;;  %v6519_v46 = vmax.f32 %v6517_v38, %v6518_v6 }
 0x8ab   : > { %v6526_v9 = vmax.f32 %v6524_v40, %v6525_v51  ;;  %v6533_v50 = vmax.f32 %v6531_v42, %v6532_v48  ;;  %v6539_v27 = vrot.slane %v6538_v49, 1  ;;  %v6541_v4 = vmax.f32 %v6519_v46, 0.0 }
 0x8ad   : > { %v6540_v56 = vmax.f32 %v6538_v49, %v6539_v27  ;;  %v6542_v26 = vmax.f32 %v6526_v9, 0.0  ;;  %v6543_v10 = vmax.f32 %v6533_v50, 0.0 }
 0x8af   : > { %v6544_v32 = vmax.f32 %v6540_v56, 0.0  ;;  %v6549_v45 = vcombine.low %v6541_v4, %v6542_v26 }
 0x8b1   : > { %v6557_v18 = vcombine.low %v6543_v10, %v6544_v32  ;;  %v6556_v59 = vrot.slane %v6549_v45, %v10464_v11 }
 0x8b3   : > { %v6564_v24 = vrot.slane %v6557_v18, %v10464_v11 }
 0x8b5   : > { %v6567_v1 = vrot.slane %v6564_v24, 7 }
 0x8b7   : > { %v6568_v22 = vsel %vm10648_vm4, %v6567_v1, %v6556_v59 }
 0x8b8   : > { %v6569_v14 = vsel %vm10649_vm9, %v6567_v1, %v6568_v22 }
 0x8b9   : > { %v6570_v20 = vsel %vm2613_vm5, %v6567_v1, %v6569_v14 }
 0x8ba   : > { %v6571_v13 = vsel %vm10650_vm8, %v6567_v1, %v6570_v20 }
 0x8bb   : > { %6573 = vst [vmem:[%s386_s16] sm:$0xf] %v6571_v13 }
 0x8bc PF: > { %s21_s17 = sadd.s32 1, %s7787_s17  }
 0x8bd   : > { %p18_p4 = scmp.ge.s32.totalorder %s21_s17, 4  }
 0x8bf   :  { %20 = sbr.rel (!%p18_p4) target bundleno = 1 (0x1), region = 102 }

</bundles_post_ra>
